<compile_context>
chip_gen: v7x
topology: tpu7x:2x2x1
jax: 0.10.0
libtpu: 0.0.40
codegen_flags: <defaults>
</compile_context>

<pallas_src>
import math
import functools

import jax
import jax.numpy as jnp
from jax.experimental import pallas as pl
from jax.experimental.pallas import tpu as pltpu


# ---- fused sin/cos: shared range reduction, Cephes single-precision tails ----
_TWO_OVER_PI = 0.6366197723675814
_PI2_1 = 1.5703125                      # pi/2 split so n*_PI2_1 is exact
_PI2_2 = 4.837512969970703125e-4
_PI2_3 = 7.54978995489188216e-8
_S1, _S2, _S3 = -1.6666654611e-1, 8.3321608736e-3, -1.9515295891e-4
_C1, _C2, _C3 = 4.166664568298827e-2, -1.388731625493765e-3, 2.443315711809948e-5


def _fused_sincos(q, compute_dtype):
    """Return (sin(q), cos(q)) with a single shared range reduction.

    q is f32; the reduction stays f32 (phase accuracy), the two polynomial
    tails and the quadrant selects run in `compute_dtype` (bf16 on v6e/v7x
    roughly doubles throughput on the binding VALU slot).
    """
    n = jnp.floor(q * _TWO_OVER_PI + 0.5)
    r = q - n * _PI2_1
    r = r - n * _PI2_2
    r = r - n * _PI2_3

    ni = n.astype(jnp.int32)
    swap = (ni & 1) == 1             # odd quadrants: sin <-> cos
    neg_sin = (ni & 2) == 2          # quadrants 2,3: negate sin
    neg_cos = ((ni + 1) & 2) == 2    # quadrants 1,2: negate cos

    r = r.astype(compute_dtype)
    r2 = r * r
    sin_r = r + r * r2 * ((_S3 * r2 + _S2) * r2 + _S1)
    cos_r = 1.0 - 0.5 * r2 + r2 * r2 * ((_C3 * r2 + _C2) * r2 + _C1)

    s = jnp.where(swap, cos_r, sin_r)
    c = jnp.where(swap, sin_r, cos_r)
    s = jnp.where(neg_sin, -s, s)
    c = jnp.where(neg_cos, -c, c)
    return s, c


def _merff_kernel(h_ref, wt_ref, wh_ref, ones_ref, e_ref, acc_ref,
                  *, out_scale, compute_dtype):
    """Grid: (frame tiles [parallel], RFF-D tiles [reduction, innermost])."""
    j = pl.program_id(1)

    @pl.when(j == 0)
    def _():
        acc_ref[...] = jnp.zeros_like(acc_ref)

    # q = h @ (w_rff.T / sigma) for this D-tile               (rows, td) [MXU]
    q = jnp.dot(h_ref[...], wt_ref[...], preferred_element_type=jnp.float32)

    # RFF features, shared range reduction                     (rows, td) [VPU]
    zs, zc = _fused_sincos(q, compute_dtype)

    # Sum over each frame's atoms on the (nearly idle) MXU via a resident
    # block-diagonal ones matrix; avoids a reshape + sublane reduce and any
    # relayout when num_atoms is not a multiple of 8.           (tf, td)  [MXU]
    sc = jnp.dot(ones_ref[...], zc, preferred_element_type=jnp.float32)
    ss = jnp.dot(ones_ref[...], zs, preferred_element_type=jnp.float32)

    # Lane-dense accumulation of the head contraction (VPU); cross-lane
    # reduce + narrow store deferred to the last D-tile.
    wc = wh_ref[0:1, :]
    ws = wh_ref[1:2, :]
    acc_ref[...] += sc * wc + ss * ws

    @pl.when(j == pl.num_programs(1) - 1)
    def _():
        e_ref[...] = (out_scale * jnp.sum(acc_ref[...], axis=-1,
                                          keepdims=True)).astype(e_ref.dtype)


def _vmem_limit_bytes():
    """~75% of this generation's per-core VMEM (64 MiB v7x, 128 MiB v5e/v6e)."""
    cap = 64 * 1024 * 1024          # conservative fallback
    try:
        cap = int(getattr(pltpu.get_tpu_info(), "vmem_capacity_bytes", cap))
    except Exception:
        pass
    return (cap * 3) // 4


def _estimate_vmem(tile_frames, tile_d, num_atoms, d, in_bytes, h_bufs):
    rows = tile_frames * num_atoms
    return (h_bufs * rows * d * in_bytes          # h tile(s)
            + 2 * d * tile_d * in_bytes           # w_rff.T tile (double buf)
            + 2 * 2 * tile_d * in_bytes           # merged head weights
            + tile_frames * rows * in_bytes       # block-diag ones (resident)
            + tile_frames * tile_d * 4            # f32 accumulator
            + 3 * rows * tile_d * 4)              # q / sin / cos live values


def merffgnn_energy(h, w_rff, w_lin, *, sigma, frames, num_atoms,
                    tile_frames=None, tile_d=512, use_bf16=False,
                    single_buffer_h=True):
    """energy = Linear(mean_atoms(RFF(h)))  ->  (frames, 1) float32.

    `h` is the per-atom representation from the GNN backbone; atoms of frame
    f occupy contiguous rows [f*num_atoms, (f+1)*num_atoms) (same assumption
    as the original reshape(frames, num_atoms, d); no padded atom rows).
    """
    N, d = h.shape
    D = w_rff.shape[0]
    assert N == frames * num_atoms
    assert w_lin.shape == (1, 2 * D)
    assert D % tile_d == 0
    assert tile_d == D or tile_d % 128 == 0

    vmem_limit = _vmem_limit_bytes()
    in_bytes = 2 if use_bf16 else 4
    h_bufs = 1 if single_buffer_h else 2

    if tile_frames is None:
        # >=2 frame tiles so the "parallel" axis can shard across both v7x
        # TensorCores; shrink further if the VMEM estimate is too large.
        tile_frames = frames
        if frames % 2 == 0 and (frames // 2) % 8 == 0:
            tile_frames = frames // 2
        budget = int(0.6 * vmem_limit)
        while (tile_frames % 2 == 0 and (tile_frames // 2) % 8 == 0
               and frames % (tile_frames // 2) == 0
               and _estimate_vmem(tile_frames, tile_d, num_atoms, d,
                                  in_bytes, h_bufs) > budget):
            tile_frames //= 2

    assert frames % tile_frames == 0
    if tile_frames != frames:
        assert tile_frames % 8 == 0        # (8, 128) tiling of partial blocks

    rows = tile_frames * num_atoms

    # Fold 1/sigma into the lane-dense (d, D) RFF weights in f32 *before* any
    # bf16 cast (one-time (D x d) op; removes a per-step (rows x tile_d) VPU
    # multiply from the kernel).
    w_rff_t = w_rff.T.astype(jnp.float32) / float(sigma)
    # Merge the cos/sin halves of the linear head into one (2, D) operand.
    w_head = jnp.concatenate([w_lin[:, :D], w_lin[:, D:]], axis=0)
    # Block-"diagonal" ones matrix: row f has ones over frame f's atom rows.
    ones_mat = jnp.repeat(jnp.eye(tile_frames, dtype=jnp.float32),
                          num_atoms, axis=1)                    # (tf, rows)

    compute_dtype = jnp.bfloat16 if use_bf16 else jnp.float32
    h_in = h.astype(compute_dtype)
    w_in = w_rff_t.astype(compute_dtype)
    wh_in = w_head.astype(compute_dtype)
    ones_in = ones_mat.astype(compute_dtype)

    out_scale = math.sqrt(2.0 / D) / num_atoms     # fold sqrt(2/D) and 1/A
    kernel = functools.partial(_merff_kernel, out_scale=out_scale,
                               compute_dtype=compute_dtype)

    def _call(h_single_buffered):
        h_kwargs = {}
        if h_single_buffered:
            # h's block index is constant along the reduction axis, so its
            # second pipeline buffer is pure VMEM waste.
            h_kwargs["pipeline_mode"] = pl.Buffered(buffer_count=1)
        return pl.pallas_call(
            kernel,
            out_shape=jax.ShapeDtypeStruct((frames, 1), jnp.float32),
            grid_spec=pltpu.PrefetchScalarGridSpec(
                num_scalar_prefetch=0,
                grid=(frames // tile_frames, D // tile_d),
                in_specs=[
                    pl.BlockSpec((rows, d), lambda i, j: (i, 0), **h_kwargs),
                    pl.BlockSpec((d, tile_d), lambda i, j: (0, j)),       # w_rff.T/sigma
                    pl.BlockSpec((2, tile_d), lambda i, j: (0, j)),       # [wc; ws]
                    pl.BlockSpec((tile_frames, rows), lambda i, j: (0, 0)),  # ones
                ],
                out_specs=pl.BlockSpec((tile_frames, 1), lambda i, j: (i, 0)),
                scratch_shapes=[pltpu.VMEM((tile_frames, tile_d), jnp.float32)],
            ),
            compiler_params=pltpu.CompilerParams(
                dimension_semantics=("parallel", "arbitrary"),
                vmem_limit_bytes=int(vmem_limit)),
        )(h_in, w_in, wh_in, ones_in)

    if single_buffer_h:
        try:
            return _call(True)
        except Exception:
            pass   # Buffered(1) unsupported -> default double-buffered pipeline
    return _call(False)


if __name__ == "__main__":
    # Small, forward-consistent shapes (exercise both grid axes).
    frames, num_atoms, d, D = 16, 8, 32, 512
    sigma = 1.5

    key = jax.random.PRNGKey(0)
    k1, k2, k3 = jax.random.split(key, 3)

    # TODO(synk): the SchNet GNN backbone (checkpoint-loaded) is not
    # reproducible here; `h` stands in for its per-atom representation output.
    h = jax.random.normal(k1, (frames * num_atoms, d), jnp.float32)
    # RFFFeatureMap._sample_w -> randn(D, d)
    w_rff = jax.random.normal(k2, (D, d), jnp.float32)
    # nn.Linear(2D, 1, bias=False) weight, deterministic synthetic init
    w_lin = jax.random.normal(k3, (1, 2 * D), jnp.float32) / math.sqrt(2 * D)

    energy = merffgnn_energy(h, w_rff, w_lin, sigma=sigma, frames=frames,
                             num_atoms=num_atoms, tile_d=256)
    jax.block_until_ready(energy)

    # pure-JAX reference of the same math
    q = (h.reshape(frames, num_atoms, d) @ w_rff.T) / sigma
    z = math.sqrt(2.0 / D) * jnp.concatenate([jnp.cos(q), jnp.sin(q)], axis=-1)
    e_ref = z.mean(axis=1) @ w_lin.T

    assert energy.shape == (frames, 1)
    assert jnp.allclose(energy, e_ref, rtol=1e-3, atol=1e-3), (energy, e_ref)

    # bf16 compute path (beneficial on v6e/v7x; still numerically safe
    # everywhere) -- looser tolerance.
    energy_bf16 = merffgnn_energy(h, w_rff, w_lin, sigma=sigma, frames=frames,
                                  num_atoms=num_atoms, tile_d=256,
                                  use_bf16=True)
    jax.block_until_ready(energy_bf16)
    assert jnp.allclose(energy_bf16, e_ref, rtol=5e-2, atol=5e-2)

    # TODO(synk): forces = -grad(energy, data.pos) requires autodiff through
    # the GNN backbone w.r.t. atom positions; not representable without it.
    print("KERNEL_OK")
</pallas_src>

<mosaic_0001>
module attributes {stable_mosaic.version = 11 : i64} {
  func.func @_merff_kernel(%arg0: i32, %arg1: i32, %arg2: memref<64x32xf32, #tpu.memory_space<vmem>>, %arg3: memref<32x256xf32, #tpu.memory_space<vmem>>, %arg4: memref<2x256xf32, #tpu.memory_space<vmem>>, %arg5: memref<8x64xf32, #tpu.memory_space<vmem>>, %arg6: memref<8x1xf32, #tpu.memory_space<vmem>>, %arg7: memref<8x256xf32, #tpu.memory_space<vmem>>) attributes {dimension_semantics = [#tpu.dimension_semantics<parallel>, #tpu.dimension_semantics<arbitrary>], iteration_bounds = array<i64: 2, 2>, scalar_prefetch = 0 : i64, scratch_operands = 1 : i64, tpu.core_type = #tpu.core_type<tc>, window_params = [{pipeline_mode = #tpu.pipeline_mode<synchronous>, transform_indices = @transform_0, window_bounds = array<i64: 64, 32>}, {transform_indices = @transform_1, window_bounds = array<i64: 32, 256>}, {transform_indices = @transform_2, window_bounds = array<i64: 2, 256>}, {pipeline_mode = #tpu.pipeline_mode<synchronous>, transform_indices = @transform_3, window_bounds = array<i64: 8, 64>}, {transform_indices = @transform_4, window_bounds = array<i64: 8, 1>}]} {
    %c0_i32 = arith.constant 0 : i32
    %0 = arith.cmpi eq, %arg1, %c0_i32 : i32
    %1 = arith.extui %0 : i1 to i32
    %c0_i32_0 = arith.constant 0 : i32
    %2 = arith.cmpi ne, %1, %c0_i32_0 : i32
    scf.if %2 {
      %cst_39 = arith.constant 0.000000e+00 : f32
      %85 = vector.broadcast %cst_39 : f32 to vector<8x256xf32>
      %c0_40 = arith.constant 0 : index
      %c0_41 = arith.constant 0 : index
      %86 = vector.load %arg7[%c0_40, %c0_41] : memref<8x256xf32, #tpu.memory_space<vmem>>, vector<8x256xf32>
      tpu.vector_store %arg7[%c0_40, %c0_41], %85 {strides = array<i32>} : memref<8x256xf32, #tpu.memory_space<vmem>>, vector<8x256xf32>,
    } else {
    }
    %c0 = arith.constant 0 : index
    %c0_1 = arith.constant 0 : index
    %3 = vector.load %arg2[%c0, %c0_1] : memref<64x32xf32, #tpu.memory_space<vmem>>, vector<64x32xf32>
    %c0_2 = arith.constant 0 : index
    %c0_3 = arith.constant 0 : index
    %4 = vector.load %arg3[%c0_2, %c0_3] : memref<32x256xf32, #tpu.memory_space<vmem>>, vector<32x256xf32>
    %cst = arith.constant dense<0.000000e+00> : vector<64x256xf32>
    %5 = tpu.matmul %3, %4, %cst {dimension_numbers = #tpu.dot_dimension_numbers<[1], [0], [0], [1], [0, 0, 1, 1], [], []>} : vector<64x32xf32>, vector<32x256xf32>, vector<64x256xf32> -> vector<64x256xf32>
    %cst_4 = arith.constant 0.636619746 : f32
    %6 = vector.broadcast %cst_4 : f32 to vector<64x256xf32>
    %7 = arith.mulf %5, %6 : vector<64x256xf32>
    %cst_5 = arith.constant 5.000000e-01 : f32
    %8 = vector.broadcast %cst_5 : f32 to vector<64x256xf32>
    %9 = arith.addf %7, %8 : vector<64x256xf32>
    %10 = math.floor %9 : vector<64x256xf32>
    %cst_6 = arith.constant 1.5703125 : f32
    %11 = vector.broadcast %cst_6 : f32 to vector<64x256xf32>
    %12 = arith.mulf %10, %11 : vector<64x256xf32>
    %13 = arith.subf %5, %12 : vector<64x256xf32>
    %cst_7 = arith.constant 4.83751297E-4 : f32
    %14 = vector.broadcast %cst_7 : f32 to vector<64x256xf32>
    %15 = arith.mulf %10, %14 : vector<64x256xf32>
    %16 = arith.subf %13, %15 : vector<64x256xf32>
    %cst_8 = arith.constant 7.549790e-08 : f32
    %17 = vector.broadcast %cst_8 : f32 to vector<64x256xf32>
    %18 = arith.mulf %10, %17 : vector<64x256xf32>
    %19 = arith.subf %16, %18 : vector<64x256xf32>
    %20 = arith.fptosi %10 : vector<64x256xf32> to vector<64x256xi32>
    %c1_i32 = arith.constant 1 : i32
    %21 = vector.broadcast %c1_i32 : i32 to vector<64x256xi32>
    %22 = arith.andi %20, %21 : vector<64x256xi32>
    %c1_i32_9 = arith.constant 1 : i32
    %23 = vector.broadcast %c1_i32_9 : i32 to vector<64x256xi32>
    %24 = arith.cmpi eq, %22, %23 : vector<64x256xi32>
    %c2_i32 = arith.constant 2 : i32
    %25 = vector.broadcast %c2_i32 : i32 to vector<64x256xi32>
    %26 = arith.andi %20, %25 : vector<64x256xi32>
    %c2_i32_10 = arith.constant 2 : i32
    %27 = vector.broadcast %c2_i32_10 : i32 to vector<64x256xi32>
    %28 = arith.cmpi eq, %26, %27 : vector<64x256xi32>
    %c1_i32_11 = arith.constant 1 : i32
    %29 = vector.broadcast %c1_i32_11 : i32 to vector<64x256xi32>
    %30 = arith.addi %20, %29 : vector<64x256xi32>
    %c2_i32_12 = arith.constant 2 : i32
    %31 = vector.broadcast %c2_i32_12 : i32 to vector<64x256xi32>
    %32 = arith.andi %30, %31 : vector<64x256xi32>
    %c2_i32_13 = arith.constant 2 : i32
    %33 = vector.broadcast %c2_i32_13 : i32 to vector<64x256xi32>
    %34 = arith.cmpi eq, %32, %33 : vector<64x256xi32>
    %35 = arith.mulf %19, %19 : vector<64x256xf32>
    %36 = arith.mulf %19, %35 : vector<64x256xf32>
    %cst_14 = arith.constant -1.95152956E-4 : f32
    %37 = vector.broadcast %cst_14 : f32 to vector<64x256xf32>
    %38 = arith.mulf %37, %35 : vector<64x256xf32>
    %cst_15 = arith.constant 0.00833216123 : f32
    %39 = vector.broadcast %cst_15 : f32 to vector<64x256xf32>
    %40 = arith.addf %38, %39 : vector<64x256xf32>
    %41 = arith.mulf %40, %35 : vector<64x256xf32>
    %cst_16 = arith.constant -0.166666552 : f32
    %42 = vector.broadcast %cst_16 : f32 to vector<64x256xf32>
    %43 = arith.addf %41, %42 : vector<64x256xf32>
    %44 = arith.mulf %36, %43 : vector<64x256xf32>
    %45 = arith.addf %19, %44 : vector<64x256xf32>
    %cst_17 = arith.constant 5.000000e-01 : f32
    %46 = vector.broadcast %cst_17 : f32 to vector<64x256xf32>
    %47 = arith.mulf %46, %35 : vector<64x256xf32>
    %cst_18 = arith.constant 1.000000e+00 : f32
    %48 = vector.broadcast %cst_18 : f32 to vector<64x256xf32>
    %49 = arith.subf %48, %47 : vector<64x256xf32>
    %50 = arith.mulf %35, %35 : vector<64x256xf32>
    %cst_19 = arith.constant 2.44331568E-5 : f32
    %51 = vector.broadcast %cst_19 : f32 to vector<64x256xf32>
    %52 = arith.mulf %51, %35 : vector<64x256xf32>
    %cst_20 = arith.constant -0.00138873165 : f32
    %53 = vector.broadcast %cst_20 : f32 to vector<64x256xf32>
    %54 = arith.addf %52, %53 : vector<64x256xf32>
    %55 = arith.mulf %54, %35 : vector<64x256xf32>
    %cst_21 = arith.constant 0.0416666456 : f32
    %56 = vector.broadcast %cst_21 : f32 to vector<64x256xf32>
    %57 = arith.addf %55, %56 : vector<64x256xf32>
    %58 = arith.mulf %50, %57 : vector<64x256xf32>
    %59 = arith.addf %49, %58 : vector<64x256xf32>
    %60 = arith.select %24, %59, %45 : vector<64x256xi1>, vector<64x256xf32>
    %61 = arith.select %24, %45, %59 : vector<64x256xi1>, vector<64x256xf32>
    %cst_22 = arith.constant 0.000000e+00 : f32
    %62 = vector.broadcast %cst_22 : f32 to vector<64x256xf32>
    %63 = arith.subf %62, %60 : vector<64x256xf32>
    %64 = arith.select %28, %63, %60 : vector<64x256xi1>, vector<64x256xf32>
    %cst_23 = arith.constant 0.000000e+00 : f32
    %65 = vector.broadcast %cst_23 : f32 to vector<64x256xf32>
    %66 = arith.subf %65, %61 : vector<64x256xf32>
    %67 = arith.select %34, %66, %61 : vector<64x256xi1>, vector<64x256xf32>
    %c0_24 = arith.constant 0 : index
    %c0_25 = arith.constant 0 : index
    %68 = vector.load %arg5[%c0_24, %c0_25] : memref<8x64xf32, #tpu.memory_space<vmem>>, vector<8x64xf32>
    %cst_26 = arith.constant dense<0.000000e+00> : vector<8x256xf32>
    %69 = tpu.matmul %68, %67, %cst_26 {dimension_numbers = #tpu.dot_dimension_numbers<[1], [0], [0], [1], [0, 0, 1, 1], [], []>} : vector<8x64xf32>, vector<64x256xf32>, vector<8x256xf32> -> vector<8x256xf32>
    %c0_27 = arith.constant 0 : index
    %c0_28 = arith.constant 0 : index
    %70 = vector.load %arg5[%c0_27, %c0_28] : memref<8x64xf32, #tpu.memory_space<vmem>>, vector<8x64xf32>
    %cst_29 = arith.constant dense<0.000000e+00> : vector<8x256xf32>
    %71 = tpu.matmul %70, %64, %cst_29 {dimension_numbers = #tpu.dot_dimension_numbers<[1], [0], [0], [1], [0, 0, 1, 1], [], []>} : vector<8x64xf32>, vector<64x256xf32>, vector<8x256xf32> -> vector<8x256xf32>
    %c0_30 = arith.constant 0 : index
    %c0_31 = arith.constant 0 : index
    %72 = vector.load %arg4[%c0_30, %c0_31] : memref<2x256xf32, #tpu.memory_space<vmem>>, vector<1x256xf32>
    %c1 = arith.constant 1 : index
    %c0_32 = arith.constant 0 : index
    %73 = vector.load %arg4[%c1, %c0_32] : memref<2x256xf32, #tpu.memory_space<vmem>>, vector<1x256xf32>
    %c0_33 = arith.constant 0 : index
    %c0_34 = arith.constant 0 : index
    %74 = vector.load %arg7[%c0_33, %c0_34] : memref<8x256xf32, #tpu.memory_space<vmem>>, vector<8x256xf32>
    %75 = vector.broadcast %72 : vector<1x256xf32> to vector<8x256xf32>
    %76 = arith.mulf %69, %75 : vector<8x256xf32>
    %77 = vector.broadcast %73 : vector<1x256xf32> to vector<8x256xf32>
    %78 = arith.mulf %71, %77 : vector<8x256xf32>
    %79 = arith.addf %76, %78 : vector<8x256xf32>
    %80 = arith.addf %74, %79 : vector<8x256xf32>
    %c0_35 = arith.constant 0 : index
    %c0_36 = arith.constant 0 : index
    %81 = vector.load %arg7[%c0_35, %c0_36] : memref<8x256xf32, #tpu.memory_space<vmem>>, vector<8x256xf32>
    tpu.vector_store %arg7[%c0_35, %c0_36], %80 {strides = array<i32>} : memref<8x256xf32, #tpu.memory_space<vmem>>, vector<8x256xf32>,
    %c1_i32_37 = arith.constant 1 : i32
    %82 = arith.cmpi eq, %arg1, %c1_i32_37 : i32
    %83 = arith.extui %82 : i1 to i32
    %c0_i32_38 = arith.constant 0 : i32
    %84 = arith.cmpi ne, %83, %c0_i32_38 : i32
    scf.if %84 {
      %c0_39 = arith.constant 0 : index
      %c0_40 = arith.constant 0 : index
      %85 = vector.load %arg7[%c0_39, %c0_40] : memref<8x256xf32, #tpu.memory_space<vmem>>, vector<8x256xf32>
      %cst_41 = arith.constant dense<0.000000e+00> : vector<8xf32>
      %86 = vector.multi_reduction <add>, %85, %cst_41 [1] : vector<8x256xf32> to vector<8xf32>
      %87 = vector.shape_cast %86 : vector<8xf32> to vector<8x1xf32>
      %cst_42 = arith.constant 7.812500e-03 : f32
      %88 = vector.broadcast %cst_42 : f32 to vector<8x1xf32>
      %89 = arith.mulf %88, %87 : vector<8x1xf32>
      %c0_43 = arith.constant 0 : index
      %c0_44 = arith.constant 0 : index
      %90 = vector.load %arg6[%c0_43, %c0_44] : memref<8x1xf32, #tpu.memory_space<vmem>>, vector<8x1xf32>
      tpu.vector_store %arg6[%c0_43, %c0_44], %89 {strides = array<i32>} : memref<8x1xf32, #tpu.memory_space<vmem>>, vector<8x1xf32>,
    } else {
    }
    return
  }
  func.func @transform_0(%arg0: i32, %arg1: i32) -> (i32, i32) {
    %c0_i32 = arith.constant 0 : i32
    %c0_i32_0 = arith.constant 0 : i32
    return %arg0, %c0_i32 : i32, i32
  }
  func.func @transform_1(%arg0: i32, %arg1: i32) -> (i32, i32) {
    %c0_i32 = arith.constant 0 : i32
    %c0_i32_0 = arith.constant 0 : i32
    return %c0_i32, %arg1 : i32, i32
  }
  func.func @transform_2(%arg0: i32, %arg1: i32) -> (i32, i32) {
    %c0_i32 = arith.constant 0 : i32
    %c0_i32_0 = arith.constant 0 : i32
    return %c0_i32, %arg1 : i32, i32
  }
  func.func @transform_3(%arg0: i32, %arg1: i32) -> (i32, i32) {
    %c0_i32 = arith.constant 0 : i32
    %c0_i32_0 = arith.constant 0 : i32
    %c0_i32_1 = arith.constant 0 : i32
    return %c0_i32, %c0_i32_0 : i32, i32
  }
  func.func @transform_4(%arg0: i32, %arg1: i32) -> (i32, i32) {
    %c0_i32 = arith.constant 0 : i32
    %c0_i32_0 = arith.constant 0 : i32
    return %arg0, %c0_i32 : i32, i32
  }
}

module attributes {stable_mosaic.version = 11 : i64} {
  func.func @_merff_kernel(%arg0: i32, %arg1: i32, %arg2: memref<64x32xf32, #tpu.memory_space<vmem>>, %arg3: memref<32x256xf32, #tpu.memory_space<vmem>>, %arg4: memref<2x256xf32, #tpu.memory_space<vmem>>, %arg5: memref<8x64xf32, #tpu.memory_space<vmem>>, %arg6: memref<8x1xf32, #tpu.memory_space<vmem>>, %arg7: memref<8x256xf32, #tpu.memory_space<vmem>>) attributes {dimension_semantics = [#tpu.dimension_semantics<parallel>, #tpu.dimension_semantics<arbitrary>], iteration_bounds = array<i64: 2, 2>, scalar_prefetch = 0 : i64, scratch_operands = 1 : i64, tpu.core_type = #tpu.core_type<tc>, window_params = [{transform_indices = @transform_0, window_bounds = array<i64: 64, 32>}, {transform_indices = @transform_1, window_bounds = array<i64: 32, 256>}, {transform_indices = @transform_2, window_bounds = array<i64: 2, 256>}, {pipeline_mode = #tpu.pipeline_mode<synchronous>, transform_indices = @transform_3, window_bounds = array<i64: 8, 64>}, {transform_indices = @transform_4, window_bounds = array<i64: 8, 1>}]} {
    %c0_i32 = arith.constant 0 : i32
    %0 = arith.cmpi eq, %arg1, %c0_i32 : i32
    %1 = arith.extui %0 : i1 to i32
    %c0_i32_0 = arith.constant 0 : i32
    %2 = arith.cmpi ne, %1, %c0_i32_0 : i32
    scf.if %2 {
      %cst_39 = arith.constant 0.000000e+00 : f32
      %85 = vector.broadcast %cst_39 : f32 to vector<8x256xf32>
      %c0_40 = arith.constant 0 : index
      %c0_41 = arith.constant 0 : index
      %86 = vector.load %arg7[%c0_40, %c0_41] : memref<8x256xf32, #tpu.memory_space<vmem>>, vector<8x256xf32>
      tpu.vector_store %arg7[%c0_40, %c0_41], %85 {strides = array<i32>} : memref<8x256xf32, #tpu.memory_space<vmem>>, vector<8x256xf32>,
    } else {
    }
    %c0 = arith.constant 0 : index
    %c0_1 = arith.constant 0 : index
    %3 = vector.load %arg2[%c0, %c0_1] : memref<64x32xf32, #tpu.memory_space<vmem>>, vector<64x32xf32>
    %c0_2 = arith.constant 0 : index
    %c0_3 = arith.constant 0 : index
    %4 = vector.load %arg3[%c0_2, %c0_3] : memref<32x256xf32, #tpu.memory_space<vmem>>, vector<32x256xf32>
    %cst = arith.constant dense<0.000000e+00> : vector<64x256xf32>
    %5 = tpu.matmul %3, %4, %cst {dimension_numbers = #tpu.dot_dimension_numbers<[1], [0], [0], [1], [0, 0, 1, 1], [], []>} : vector<64x32xf32>, vector<32x256xf32>, vector<64x256xf32> -> vector<64x256xf32>
    %cst_4 = arith.constant 0.636619746 : f32
    %6 = vector.broadcast %cst_4 : f32 to vector<64x256xf32>
    %7 = arith.mulf %5, %6 : vector<64x256xf32>
    %cst_5 = arith.constant 5.000000e-01 : f32
    %8 = vector.broadcast %cst_5 : f32 to vector<64x256xf32>
    %9 = arith.addf %7, %8 : vector<64x256xf32>
    %10 = math.floor %9 : vector<64x256xf32>
    %cst_6 = arith.constant 1.5703125 : f32
    %11 = vector.broadcast %cst_6 : f32 to vector<64x256xf32>
    %12 = arith.mulf %10, %11 : vector<64x256xf32>
    %13 = arith.subf %5, %12 : vector<64x256xf32>
    %cst_7 = arith.constant 4.83751297E-4 : f32
    %14 = vector.broadcast %cst_7 : f32 to vector<64x256xf32>
    %15 = arith.mulf %10, %14 : vector<64x256xf32>
    %16 = arith.subf %13, %15 : vector<64x256xf32>
    %cst_8 = arith.constant 7.549790e-08 : f32
    %17 = vector.broadcast %cst_8 : f32 to vector<64x256xf32>
    %18 = arith.mulf %10, %17 : vector<64x256xf32>
    %19 = arith.subf %16, %18 : vector<64x256xf32>
    %20 = arith.fptosi %10 : vector<64x256xf32> to vector<64x256xi32>
    %c1_i32 = arith.constant 1 : i32
    %21 = vector.broadcast %c1_i32 : i32 to vector<64x256xi32>
    %22 = arith.andi %20, %21 : vector<64x256xi32>
    %c1_i32_9 = arith.constant 1 : i32
    %23 = vector.broadcast %c1_i32_9 : i32 to vector<64x256xi32>
    %24 = arith.cmpi eq, %22, %23 : vector<64x256xi32>
    %c2_i32 = arith.constant 2 : i32
    %25 = vector.broadcast %c2_i32 : i32 to vector<64x256xi32>
    %26 = arith.andi %20, %25 : vector<64x256xi32>
    %c2_i32_10 = arith.constant 2 : i32
    %27 = vector.broadcast %c2_i32_10 : i32 to vector<64x256xi32>
    %28 = arith.cmpi eq, %26, %27 : vector<64x256xi32>
    %c1_i32_11 = arith.constant 1 : i32
    %29 = vector.broadcast %c1_i32_11 : i32 to vector<64x256xi32>
    %30 = arith.addi %20, %29 : vector<64x256xi32>
    %c2_i32_12 = arith.constant 2 : i32
    %31 = vector.broadcast %c2_i32_12 : i32 to vector<64x256xi32>
    %32 = arith.andi %30, %31 : vector<64x256xi32>
    %c2_i32_13 = arith.constant 2 : i32
    %33 = vector.broadcast %c2_i32_13 : i32 to vector<64x256xi32>
    %34 = arith.cmpi eq, %32, %33 : vector<64x256xi32>
    %35 = arith.mulf %19, %19 : vector<64x256xf32>
    %36 = arith.mulf %19, %35 : vector<64x256xf32>
    %cst_14 = arith.constant -1.95152956E-4 : f32
    %37 = vector.broadcast %cst_14 : f32 to vector<64x256xf32>
    %38 = arith.mulf %37, %35 : vector<64x256xf32>
    %cst_15 = arith.constant 0.00833216123 : f32
    %39 = vector.broadcast %cst_15 : f32 to vector<64x256xf32>
    %40 = arith.addf %38, %39 : vector<64x256xf32>
    %41 = arith.mulf %40, %35 : vector<64x256xf32>
    %cst_16 = arith.constant -0.166666552 : f32
    %42 = vector.broadcast %cst_16 : f32 to vector<64x256xf32>
    %43 = arith.addf %41, %42 : vector<64x256xf32>
    %44 = arith.mulf %36, %43 : vector<64x256xf32>
    %45 = arith.addf %19, %44 : vector<64x256xf32>
    %cst_17 = arith.constant 5.000000e-01 : f32
    %46 = vector.broadcast %cst_17 : f32 to vector<64x256xf32>
    %47 = arith.mulf %46, %35 : vector<64x256xf32>
    %cst_18 = arith.constant 1.000000e+00 : f32
    %48 = vector.broadcast %cst_18 : f32 to vector<64x256xf32>
    %49 = arith.subf %48, %47 : vector<64x256xf32>
    %50 = arith.mulf %35, %35 : vector<64x256xf32>
    %cst_19 = arith.constant 2.44331568E-5 : f32
    %51 = vector.broadcast %cst_19 : f32 to vector<64x256xf32>
    %52 = arith.mulf %51, %35 : vector<64x256xf32>
    %cst_20 = arith.constant -0.00138873165 : f32
    %53 = vector.broadcast %cst_20 : f32 to vector<64x256xf32>
    %54 = arith.addf %52, %53 : vector<64x256xf32>
    %55 = arith.mulf %54, %35 : vector<64x256xf32>
    %cst_21 = arith.constant 0.0416666456 : f32
    %56 = vector.broadcast %cst_21 : f32 to vector<64x256xf32>
    %57 = arith.addf %55, %56 : vector<64x256xf32>
    %58 = arith.mulf %50, %57 : vector<64x256xf32>
    %59 = arith.addf %49, %58 : vector<64x256xf32>
    %60 = arith.select %24, %59, %45 : vector<64x256xi1>, vector<64x256xf32>
    %61 = arith.select %24, %45, %59 : vector<64x256xi1>, vector<64x256xf32>
    %cst_22 = arith.constant 0.000000e+00 : f32
    %62 = vector.broadcast %cst_22 : f32 to vector<64x256xf32>
    %63 = arith.subf %62, %60 : vector<64x256xf32>
    %64 = arith.select %28, %63, %60 : vector<64x256xi1>, vector<64x256xf32>
    %cst_23 = arith.constant 0.000000e+00 : f32
    %65 = vector.broadcast %cst_23 : f32 to vector<64x256xf32>
    %66 = arith.subf %65, %61 : vector<64x256xf32>
    %67 = arith.select %34, %66, %61 : vector<64x256xi1>, vector<64x256xf32>
    %c0_24 = arith.constant 0 : index
    %c0_25 = arith.constant 0 : index
    %68 = vector.load %arg5[%c0_24, %c0_25] : memref<8x64xf32, #tpu.memory_space<vmem>>, vector<8x64xf32>
    %cst_26 = arith.constant dense<0.000000e+00> : vector<8x256xf32>
    %69 = tpu.matmul %68, %67, %cst_26 {dimension_numbers = #tpu.dot_dimension_numbers<[1], [0], [0], [1], [0, 0, 1, 1], [], []>} : vector<8x64xf32>, vector<64x256xf32>, vector<8x256xf32> -> vector<8x256xf32>
    %c0_27 = arith.constant 0 : index
    %c0_28 = arith.constant 0 : index
    %70 = vector.load %arg5[%c0_27, %c0_28] : memref<8x64xf32, #tpu.memory_space<vmem>>, vector<8x64xf32>
    %cst_29 = arith.constant dense<0.000000e+00> : vector<8x256xf32>
    %71 = tpu.matmul %70, %64, %cst_29 {dimension_numbers = #tpu.dot_dimension_numbers<[1], [0], [0], [1], [0, 0, 1, 1], [], []>} : vector<8x64xf32>, vector<64x256xf32>, vector<8x256xf32> -> vector<8x256xf32>
    %c0_30 = arith.constant 0 : index
    %c0_31 = arith.constant 0 : index
    %72 = vector.load %arg4[%c0_30, %c0_31] : memref<2x256xf32, #tpu.memory_space<vmem>>, vector<1x256xf32>
    %c1 = arith.constant 1 : index
    %c0_32 = arith.constant 0 : index
    %73 = vector.load %arg4[%c1, %c0_32] : memref<2x256xf32, #tpu.memory_space<vmem>>, vector<1x256xf32>
    %c0_33 = arith.constant 0 : index
    %c0_34 = arith.constant 0 : index
    %74 = vector.load %arg7[%c0_33, %c0_34] : memref<8x256xf32, #tpu.memory_space<vmem>>, vector<8x256xf32>
    %75 = vector.broadcast %72 : vector<1x256xf32> to vector<8x256xf32>
    %76 = arith.mulf %69, %75 : vector<8x256xf32>
    %77 = vector.broadcast %73 : vector<1x256xf32> to vector<8x256xf32>
    %78 = arith.mulf %71, %77 : vector<8x256xf32>
    %79 = arith.addf %76, %78 : vector<8x256xf32>
    %80 = arith.addf %74, %79 : vector<8x256xf32>
    %c0_35 = arith.constant 0 : index
    %c0_36 = arith.constant 0 : index
    %81 = vector.load %arg7[%c0_35, %c0_36] : memref<8x256xf32, #tpu.memory_space<vmem>>, vector<8x256xf32>
    tpu.vector_store %arg7[%c0_35, %c0_36], %80 {strides = array<i32>} : memref<8x256xf32, #tpu.memory_space<vmem>>, vector<8x256xf32>,
    %c1_i32_37 = arith.constant 1 : i32
    %82 = arith.cmpi eq, %arg1, %c1_i32_37 : i32
    %83 = arith.extui %82 : i1 to i32
    %c0_i32_38 = arith.constant 0 : i32
    %84 = arith.cmpi ne, %83, %c0_i32_38 : i32
    scf.if %84 {
      %c0_39 = arith.constant 0 : index
      %c0_40 = arith.constant 0 : index
      %85 = vector.load %arg7[%c0_39, %c0_40] : memref<8x256xf32, #tpu.memory_space<vmem>>, vector<8x256xf32>
      %cst_41 = arith.constant dense<0.000000e+00> : vector<8xf32>
      %86 = vector.multi_reduction <add>, %85, %cst_41 [1] : vector<8x256xf32> to vector<8xf32>
      %87 = vector.shape_cast %86 : vector<8xf32> to vector<8x1xf32>
      %cst_42 = arith.constant 7.812500e-03 : f32
      %88 = vector.broadcast %cst_42 : f32 to vector<8x1xf32>
      %89 = arith.mulf %88, %87 : vector<8x1xf32>
      %c0_43 = arith.constant 0 : index
      %c0_44 = arith.constant 0 : index
      %90 = vector.load %arg6[%c0_43, %c0_44] : memref<8x1xf32, #tpu.memory_space<vmem>>, vector<8x1xf32>
      tpu.vector_store %arg6[%c0_43, %c0_44], %89 {strides = array<i32>} : memref<8x1xf32, #tpu.memory_space<vmem>>, vector<8x1xf32>,
    } else {
    }
    return
  }
  func.func @transform_0(%arg0: i32, %arg1: i32) -> (i32, i32) {
    %c0_i32 = arith.constant 0 : i32
    %c0_i32_0 = arith.constant 0 : i32
    return %arg0, %c0_i32 : i32, i32
  }
  func.func @transform_1(%arg0: i32, %arg1: i32) -> (i32, i32) {
    %c0_i32 = arith.constant 0 : i32
    %c0_i32_0 = arith.constant 0 : i32
    return %c0_i32, %arg1 : i32, i32
  }
  func.func @transform_2(%arg0: i32, %arg1: i32) -> (i32, i32) {
    %c0_i32 = arith.constant 0 : i32
    %c0_i32_0 = arith.constant 0 : i32
    return %c0_i32, %arg1 : i32, i32
  }
  func.func @transform_3(%arg0: i32, %arg1: i32) -> (i32, i32) {
    %c0_i32 = arith.constant 0 : i32
    %c0_i32_0 = arith.constant 0 : i32
    %c0_i32_1 = arith.constant 0 : i32
    return %c0_i32, %c0_i32_0 : i32, i32
  }
  func.func @transform_4(%arg0: i32, %arg1: i32) -> (i32, i32) {
    %c0_i32 = arith.constant 0 : i32
    %c0_i32_0 = arith.constant 0 : i32
    return %arg0, %c0_i32 : i32, i32
  }
}

</mosaic_0001>

<bundles_post_ra>
// kernel: tpu_custom_call.1
= control target key start
LH: loop header
LB: loop body
LE: loop exit
PB: predicated region body
PF: predicated region fallthrough
CT: control target
= control target key end

     0   :  { %s1624_s15 = smov 0   ;;  %s1626_s16 = smov 0   ;;  %s2610_s0 = inlined_call_operand.vmem [shape: f32[128,32], index: 0, kind: input, shape index: {}]   ;;  %s2611_s1 = inlined_call_operand.vmem [shape: f32[32,512], index: 1, kind: input, shape index: {}]   ;;  %s2612_s2 = inlined_call_operand.vmem [shape: f32[2,512], index: 2, kind: input, shape index: {}]   ;;  %s2613_s3 = inlined_call_operand.vmem [shape: f32[8,64], index: 3, kind: input, shape index: {}]   ;;  %s2614_s4 = inlined_call_operand.vmem [shape: f32[16,1], index: 4, kind: output, shape index: {}]  }
   0x1   :  { %s1628_s17 = smov 0   ;;  %s1630_s18 = smov 0  }
   0x2   :  { %s1632_s19 = smov 0   ;;  %s1634_s20 = smov 0  }
   0x3   :  { %s1636_s21 = smov 0  }
   0x4 LB: > { %s23_s22 = sadd.s32 1, %s1587_s19  ;;  %s26_s23 = sadd.s32 1, %s1591_s20  ;;  %s1595_s21 = sphi %s1636_s21, %s14_s21   ;;  %s1591_s20 = sphi %s1634_s20, %s2785_s20   ;;  %s1587_s19 = sphi %s1632_s19, %s2784_s19   ;;  %s1583_s18 = sphi %s1630_s18, %s2783_s18   ;;  %s1579_s17 = sphi %s1628_s17, %s2782_s17   ;;  %s1575_s16 = sphi %s1626_s16, %s2781_s16   ;;  %s1571_s15 = sphi %s1624_s15, %s2780_s15  }
   0x5   : > { %p24_p0 = scmp.ge.s32.totalorder %s23_s22, 2  ;;  %s59_s24 = sadd.s32 1, %s1575_s16 }
   0x6   : > { %p66_p1 = scmp.ne.s32.totalorder %s1575_s16, %s1571_s15  ;;  %p67_p2 = scmp.eq.s32.totalorder %s1595_s21, 0 }
   0x7   : > { %s2787_s22 = smov (%p24_p0, %s23_s22), 0  ;;  %s2789_s23 = smov (!%p24_p0, %s26_s23), %s1591_s20 }
   0x8   : > { %s56_s25 = ssub.s32 %s1587_s19, %s2787_s22  ;;  %p68_p3 = por %p67_p2, %p66_p1 }
   0x9   : > { %p28_p4 = scmp.ge.s32.totalorder %s2789_s23, 2  ;;  %p57_p5 = scmp.eq.s32.totalorder %s56_s25, 0 }
   0xa   : > { %p1384_p6 = scmp.ge.s32.totalorder %s1595_s21, 4 }
   0xb   : > { %s2791_s23 = smov (%p28_p4, %s2789_s23), 0 }
   0xc   : > { %s1673_s26 = scalar_select %p57_p5, %s1575_s16, %s59_s24  }
   0xd   : > { %177 = sbr.rel (%p1384_p6) target bundleno = 28 (0x1c), region = 24 }
  0x14   : > { %180 = sbr.rel (!%p68_p3) target bundleno = 28 (0x1c), region = 28  ;;  %s182_s27 = sand.u32 (%p68_p3), 1, %s1575_s16  }
  0x15   : > { %s1410_s28 = sshll.u32 (%p68_p3), %s1587_s19, 4  ;;  %s1385_s29 = sshll.u32 (%p68_p3), %s182_s27, 6 }
  0x16   : > { %s187_s6 = scalar_lea.vmem (%p68_p3), %s2611_s1, %s1410_s28  ;;  %s184_s7 = scalar_lea.vmem (%p68_p3), [#allocation3], %s1385_s29 }
  0x17   : > { %v200_v0 = vld [vmem:[%s187_s6] sm:$0xff] (%p68_p3)  ;;  %v202_v1 = vld [vmem:[%s187_s6 + $0x8] sm:$0xff] (%p68_p3) }
  0x18   : > { %v204_v2 = vld [vmem:[%s187_s6 + $0x20] sm:$0xff] (%p68_p3)  ;;  %201 = vst [vmem:[%s184_s7] sm:$0xff] (%p68_p3), %v200_v0  ;;  %203 = vst [vmem:[%s184_s7 + $0x8] sm:$0xff] (%p68_p3), %v202_v1  ;;  %v206_v3 = vld [vmem:[%s187_s6 + $0x28] sm:$0xff] (%p68_p3) }
  0x19   : > { %205 = vst [vmem:[%s184_s7 + $0x10] sm:$0xff] (%p68_p3), %v204_v2  ;;  %v208_v4 = vld [vmem:[%s187_s6 + $0x40] sm:$0xff] (%p68_p3)  ;;  %v210_v5 = vld [vmem:[%s187_s6 + $0x48] sm:$0xff] (%p68_p3)  ;;  %207 = vst [vmem:[%s184_s7 + $0x18] sm:$0xff] (%p68_p3), %v206_v3 }
  0x1a   : > { %209 = vst [vmem:[%s184_s7 + $0x20] sm:$0xff] (%p68_p3), %v208_v4  ;;  %211 = vst [vmem:[%s184_s7 + $0x28] sm:$0xff] (%p68_p3), %v210_v5  ;;  %v212_v6 = vld [vmem:[%s187_s6 + $0x60] sm:$0xff] (%p68_p3)  ;;  %v214_v7 = vld [vmem:[%s187_s6 + $0x68] sm:$0xff] (%p68_p3) }
  0x1b   : > { %213 = vst [vmem:[%s184_s7 + $0x30] sm:$0xff] %v212_v6  ;;  %215 = vst [vmem:[%s184_s7 + $0x38] sm:$0xff] %v214_v7 }
  0x1c PF: > { %p1388_p7 = scmp.ge.s32.totalorder %s1595_s21, 1  ;;  %p229_p8 = scmp.lt.s32.totalorder %s1595_s21, 5 }
  0x1e   : > { %p230_p9 = pnand %p1388_p7, %p229_p8 }
  0x20   : > { %233 = sbr.rel (%p230_p9) target bundleno = 837 (0x345), region = 55 }
  0x27   : > { %s236_s8 = sand.u32 1, %s1571_s15   ;;  %s1390_s9 = sshll.u32 %s1583_s18, 3 }
  0x28   : > { %s1389_s10 = sshll.u32 %s236_s8, 6  ;;  %p271_p10 = scmp.lt.s32.totalorder %s1390_s9, 15 }
  0x29   : > { %s1392_s11 = sshll.u32 %s1579_s17, 1  ;;  %p283_p12 = scmp.lt.s32.totalorder %s1583_s18, 1 }
  0x2a   : > { %s2793_s9 = smov (!%p271_p10, %s1390_s9), 15  ;;  %p278_p11 = scmp.lt.s32.totalorder %s1392_s11, 3 }
  0x2b   : > { %s1391_s12 = sshll.u32 %s2793_s9, 3  ;;  %s2797_s18 = smov (!%p283_p12, %s1583_s18), 1 }
  0x2c   : > { %s1690_s24 = scalar_lea.vmem %s2610_s0, %s1391_s12  ;;  %s2795_s11 = smov (!%p278_p11, %s1392_s11), 3 }
  0x2d   : > { %s1393_s25 = sshll.u32 %s2795_s11, 1  ;;  %s1394_s29 = sshll.u32 %s2797_s18, 3 }
  0x2e   : > { %s1696_s15 = scalar_lea.vmem %s2612_s2, %s1393_s25  ;;  %s1701_s6 = scalar_lea.vmem %s2614_s4, %s1394_s29 }
  0x2f   : > { %s238_s7 = scalar_lea.vmem [#allocation3], %s1389_s10  ;;  %p1395_p13 = scmp.ne.s32.totalorder %s1579_s17, 0 }
  0x30   : > { %v1597_v8 = vmov (!%p1395_p13), 0.0  }
  0x31   : > { %290 = sbr.rel (%p1395_p13) target bundleno = 56 (0x38), region = 63  ;;  %291 = vst [vmem:[#allocation2] sm:$0xff] (!%p1395_p13), %v1597_v8  ;;  %292 = vst [vmem:[#allocation2 + $0x8] sm:$0xff] (!%p1395_p13), %v1597_v8 }
  0x38 PF: > { %v302_v9 = vld [vmem:[%s238_s7 + $0x8] sm:$0xff]  ;;  %v304_v10 = vld [vmem:[%s238_s7 + $0x18] sm:$0xff]  ;;  %v301_v11 = vld [vmem:[%s238_s7] sm:$0xff]  ;;  %v2615_v16 = vmov 0.0   ;;  %vm309_vm0 = vcmask 261120   ;;  %p1407_p0 = scmp.ne.s32.totalorder %s1579_s17, 1 }
  0x39   : > { %v1411_v12 = vpack.c.bf16 %v304_v10, %v302_v9  ;;  %v303_v13 = vld [vmem:[%s238_s7 + $0x10] sm:$0xff]  ;;  %v306_v14 = vld [vmem:[%s238_s7 + $0x28] sm:$0xff]  ;;  %v308_v15 = vld [vmem:[%s238_s7 + $0x38] sm:$0xff]  ;;  %398 = vmatprep.mubr.f32.mxu0 %v2615_v16  ;;  %1156 = vmatprep.mubr.f32.mxu1 %v2615_v16 }
  0x3a   : > { %v1413_v17 = vpack.c.bf16 %v303_v13, %v301_v11  ;;  %v1415_v18 = vpack.c.bf16 %v308_v15, %v306_v14  ;;  %v305_v19 = vld [vmem:[%s238_s7 + $0x20] sm:$0xff]  ;;  %v307_v20 = vld [vmem:[%s238_s7 + $0x30] sm:$0xff]  ;;  %v294_v23 = vld [vmem:[%s1690_s24 + $0x8] sm:$0xff] }
  0x3b   : > { %1412 = vmatprep.subr.bf16.mxu0 %v1411_v12  ;;  %v1417_v21 = vpack.c.bf16 %v307_v20, %v305_v19  ;;  %v293_v22 = vld [vmem:[%s1690_s24] sm:$0xff]  ;;  %v295_v24 = vld [vmem:[%s1690_s24 + $0x10] sm:$0xff]  ;;  %v296_v25 = vld [vmem:[%s1690_s24 + $0x18] sm:$0xff] }
  0x3c   : > { %1414 = vmatpush1.bf16.msra.mxu0 %v1413_v17  ;;  %v297_v26 = vld [vmem:[%s1690_s24 + $0x20] sm:$0xff]  ;;  %v298_v27 = vld [vmem:[%s1690_s24 + $0x28] sm:$0xff]  ;;  %v299_v28 = vld [vmem:[%s1690_s24 + $0x30] sm:$0xff] }
  0x3d   : > { %1416 = vmatprep.subr.bf16.mxu0 %v1415_v18  ;;  %v300_v29 = vld [vmem:[%s1690_s24 + $0x38] sm:$0xff] }
  0x40   : > { %1418 = vmatpush1.bf16.msra.mxu0 %v1417_v21 }
  0x43   : > { %1396 = vmatmul.mubr.msk.f32.vlgmr.msra.gmra.mrb[0].mxu0 %vm309_vm0, %v293_v22 }
  0x44   : > { %404 = vmatprep.mubr.f32.mxu0 %v2615_v16 }
  0x47   : > { %1397 = vmatmul.mubr.msk.f32.gmra.mrb[2].mxu0 %vm309_vm0, %v294_v23 }
  0x48   : > { %410 = vmatprep.mubr.f32.mxu0 %v2615_v16 }
  0x4b   : > { %1398 = vmatmul.mubr.msk.f32.gmra.mrb[4].mxu0 %vm309_vm0, %v295_v24 }
  0x4c   : > { %416 = vmatprep.mubr.f32.mxu0 %v2615_v16 }
  0x4f   : > { %1399 = vmatmul.mubr.msk.f32.gmra.mrb[6].mxu0 %vm309_vm0, %v296_v25 }
  0x50   : > { %422 = vmatprep.mubr.f32.mxu0 %v2615_v16 }
  0x53   : > { %1400 = vmatmul.mubr.msk.f32.gmra.mrb[8].mxu0 %vm309_vm0, %v297_v26 }
  0x54   : > { %428 = vmatprep.mubr.f32.mxu0 %v2615_v16 }
  0x57   : > { %1401 = vmatmul.mubr.msk.f32.gmra.mrb[10].mxu0 %vm309_vm0, %v298_v27 }
  0x58   : > { %434 = vmatprep.mubr.f32.mxu0 %v2615_v16 }
  0x5b   : > { %1402 = vmatmul.mubr.msk.f32.gmra.mrb[12].mxu0 %vm309_vm0, %v299_v28 }
  0x5c   : > { %440 = vmatprep.mubr.f32.mxu0 %v2615_v16 }
  0x5f   : > { %1403 = vmatmul.mubr.msk.f32.gmra.mrb[14].mxu0 %vm309_vm0, %v300_v29 }
 0x116   : > { %v400_v30 = vpop.f32.mrb[0].mxu0 }
 0x117   : > { %v447_v31 = vmul.f32 0.63661975, %v400_v30  ;;  %v402_v32 = vpop.f32.mrb[1].mxu0 }
 0x118   : > { %v448_v33 = vmul.f32 0.63661975, %v402_v32 }
 0x119   : > { %v463_v34 = vadd.f32 0.5, %v447_v31 }
 0x11a   : > { %v464_v35 = vadd.f32 0.5, %v448_v33  ;;  %v1729_v36 = vpop.f32.mrb[2].mxu0 }
 0x11b   : > { %v1731_v37 = vfloor.f32 %v463_v34  ;;  %v449_v38 = vmul.f32 0.63661975, %v1729_v36  ;;  %v1734_v39 = vpop.f32.mrb[3].mxu0 }
 0x11c   : > { %v1736_v40 = vfloor.f32 %v464_v35  ;;  %v450_v41 = vmul.f32 0.63661975, %v1734_v39 }
 0x11d   : > { %v495_v42 = vmul.f32 1.5703125, %v1731_v37  ;;  %v465_v43 = vadd.f32 0.5, %v449_v38  ;;  %v527_v57 = vmul.f32 0.0004837513, %v1731_v37  ;;  %v559_v61 = vmul.f32 7.54979e-08, %v1731_v37 }
 0x11e   : > { %v466_v44 = vadd.f32 0.5, %v450_v41  ;;  %v412_v45 = vpop.f32.mrb[4].mxu0  ;;  %v496_v48 = vmul.f32 1.5703125, %v1736_v40  ;;  %v528_v1 = vmul.f32 0.0004837513, %v1736_v40  ;;  %v560_v5 = vmul.f32 7.54979e-08, %v1736_v40 }
 0x11f   : > { %v451_v46 = vmul.f32 0.63661975, %v412_v45  ;;  %v414_v47 = vpop.f32.mrb[5].mxu0  ;;  %v511_v50 = vsub.f32 %v400_v30, %v495_v42  ;;  %v1741_v51 = vfloor.f32 %v465_v43 }
 0x120   : > { %v452_v49 = vmul.f32 0.63661975, %v414_v47  ;;  %v1743_v52 = vfloor.f32 %v466_v44  ;;  %v512_v58 = vsub.f32 %v402_v32, %v496_v48 }
 0x121   : > { %v467_v54 = vadd.f32 0.5, %v451_v46  ;;  %v543_v0 = vsub.f32 %v511_v50, %v527_v57  ;;  %v497_v2 = vmul.f32 1.5703125, %v1741_v51  ;;  %v529_v10 = vmul.f32 0.0004837513, %v1741_v51 }
 0x122   : > { %v1745_v53 = vpop.f32.mrb[6].mxu0  ;;  %v468_v55 = vadd.f32 0.5, %v452_v49  ;;  %v498_v3 = vmul.f32 1.5703125, %v1743_v52  ;;  %v544_v9 = vsub.f32 %v512_v58, %v528_v1  ;;  %v561_v11 = vmul.f32 7.54979e-08, %v1741_v51 }
 0x123   : > { %v1747_v56 = vpop.f32.mrb[7].mxu0  ;;  %v453_v59 = vmul.f32 0.63661975, %v1745_v53  ;;  %v1753_v62 = vfloor.f32 %v467_v54  ;;  %v530_v13 = vmul.f32 0.0004837513, %v1743_v52  ;;  %v1771_v18 = vsub.f32 %v543_v0, %v559_v61 }
 0x124   : > { %v454_v60 = vmul.f32 0.63661975, %v1747_v56  ;;  %v1755_v63 = vfloor.f32 %v468_v55  ;;  %v513_v19 = vsub.f32 %v1729_v36, %v497_v2  ;;  %v514_v20 = vsub.f32 %v1734_v39, %v498_v3 }
 0x125   : > { %v499_v6 = vmul.f32 1.5703125, %v1753_v62  ;;  %v469_v7 = vadd.f32 0.5, %v453_v59  ;;  %v531_v15 = vmul.f32 0.0004837513, %v1753_v62  ;;  %v563_v21 = vmul.f32 7.54979e-08, %v1753_v62 }
 0x126   : > { %v1760_v4 = vpop.f32.mrb[8].mxu0  ;;  %v470_v12 = vadd.f32 0.5, %v454_v60  ;;  %v500_v17 = vmul.f32 1.5703125, %v1755_v63  ;;  %v532_v25 = vmul.f32 0.0004837513, %v1755_v63  ;;  %v1783_v28 = vsub.f32 %v544_v9, %v560_v5 }
 0x127   : > { %v1764_v8 = vpop.f32.mrb[9].mxu0  ;;  %v515_v14 = vsub.f32 %v412_v45, %v499_v6  ;;  %v1779_v26 = vfloor.f32 %v469_v7  ;;  %v562_v29 = vmul.f32 7.54979e-08, %v1743_v52  ;;  %v455_v31 = vmul.f32 0.63661975, %v1760_v4 }
 0x128   : > { %v516_v24 = vsub.f32 %v414_v47, %v500_v17  ;;  %v1786_v30 = vfloor.f32 %v470_v12  ;;  %v564_v34 = vmul.f32 7.54979e-08, %v1755_v63  ;;  %v1795_v36 = vmul.f32 %v1771_v18, %v1771_v18 }
 0x129   : > { %v547_v23 = vsub.f32 %v515_v14, %v531_v15  ;;  %v501_v35 = vmul.f32 1.5703125, %v1779_v26  ;;  %v545_v38 = vsub.f32 %v513_v19, %v529_v10  ;;  %v546_v39 = vsub.f32 %v514_v20, %v530_v13 }
 0x12a   : > { %v1776_v22 = vpop.f32.mrb[10].mxu0  ;;  %v548_v33 = vsub.f32 %v516_v24, %v532_v25  ;;  %v502_v41 = vmul.f32 1.5703125, %v1786_v30  ;;  %v533_v46 = vmul.f32 0.0004837513, %v1779_v26  ;;  %v1812_v48 = vmul.f32 %v1783_v28, %v1783_v28 }
 0x12b   : > { %v1781_v27 = vpop.f32.mrb[11].mxu0  ;;  %v1789_v32 = vsub.f32 %v547_v23, %v563_v21  ;;  %v517_v45 = vsub.f32 %v1745_v53, %v501_v35  ;;  %v534_v50 = vmul.f32 0.0004837513, %v1786_v30  ;;  %v471_v54 = vadd.f32 0.5, %v455_v31 }
 0x12c   : > { %v1804_v44 = vsub.f32 %v548_v33, %v564_v34  ;;  %v518_v49 = vsub.f32 %v1747_v56, %v502_v41  ;;  %v565_v58 = vmul.f32 7.54979e-08, %v1779_v26  ;;  %v1822_v59 = vsub.f32 %v545_v38, %v561_v11 }
 0x12d   : > { %v1802_v43 = vmul.f32 %v1789_v32, %v1789_v32  ;;  %v549_v53 = vsub.f32 %v517_v45, %v533_v46  ;;  %v1824_v61 = vfloor.f32 %v471_v54  ;;  %v456_v0 = vmul.f32 0.63661975, %v1764_v8 }
 0x12e   : > { %v1798_v42 = vpop.f32.mrb[12].mxu0  ;;  %v1819_v57 = vmul.f32 %v1804_v44, %v1804_v44  ;;  %v550_v60 = vsub.f32 %v518_v49, %v534_v50  ;;  %v1829_v1 = vsub.f32 %v546_v39, %v562_v29  ;;  %v566_v5 = vmul.f32 7.54979e-08, %v1786_v30 }
 0x12f   : > { %v1808_v47 = vpop.f32.mrb[13].mxu0  ;;  %v755_v55 = vmul.f32 -0.00019515296, %v1802_v43  ;;  %v1832_v3 = vsub.f32 %v549_v53, %v565_v58  ;;  %v503_v9 = vmul.f32 1.5703125, %v1824_v61  ;;  %v1459_v12 = vtrunc.f32 %v1753_v62 }
 0x130   : > { %v756_v2 = vmul.f32 -0.00019515296, %v1819_v57  ;;  %v1845_v14 = vsub.f32 %v550_v60, %v566_v5  ;;  %v535_v15 = vmul.f32 0.0004837513, %v1824_v61  ;;  %v472_v20 = vadd.f32 0.5, %v456_v0 }
 0x131   : > { %v771_v7 = vadd.f32 0.008332161, %v755_v55  ;;  %v1843_v13 = vmul.f32 %v1832_v3, %v1832_v3  ;;  %v519_v19 = vsub.f32 %v1760_v4, %v503_v9  ;;  %v457_v21 = vmul.f32 0.63661975, %v1776_v22 }
 0x132   : > { %v1827_v56 = vpop.f32.mrb[14].mxu0  ;;  %v772_v17 = vadd.f32 0.008332161, %v756_v2  ;;  %v1852_v23 = vmul.f32 %v1795_v36, %v1771_v18  ;;  %v1856_v62 = vmul.f32 %v1812_v48, %v1783_v28  ;;  %v1860_v24 = vmul.f32 %v1822_v59, %v1822_v59 }
 0x133   : > { %v1835_v6 = vpop.f32.mrb[15].mxu0  ;;  %2650 = vst [vmem:[#allocation4_spill] sm:$0xff] %v1843_v13  ;;  %v1864_v25 = vmul.f32 %v1829_v1, %v1829_v1  ;;  %v787_v4 = vmul.f32 %v771_v7, %v1802_v43  ;;  %v1461_v29 = vtrunc.f32 %v1755_v63  ;;  %v1463_v31 = vtrunc.f32 %v1779_v26 }
 0x134   : > { %v551_v33 = vsub.f32 %v519_v19, %v535_v15  ;;  %v757_v34 = vmul.f32 -0.00019515296, %v1843_v13  ;;  %v1872_v35 = vmul.f32 %v1845_v14, %v1845_v14  ;;  %v567_v38 = vmul.f32 7.54979e-08, %v1824_v61 }
 0x135   : > { %v1875_v39 = vfloor.f32 %v472_v20  ;;  %v1877_v41 = vcvt.f32.s32 %v1459_v12  ;;  %v788_v45 = vmul.f32 %v772_v17, %v1819_v57  ;;  %v1465_v46 = vtrunc.f32 %v1786_v30 }
 0x136   : > { %v473_v63 = vadd.f32 0.5, %v457_v21  ;;  %v1883_v26 = vmul.f32 %v1860_v24, %v1822_v59  ;;  %v1885_v49 = vsub.f32 %v551_v33, %v567_v38  ;;  %v458_v54 = vmul.f32 0.63661975, %v1781_v27 }
 0x137   : > { %v504_v50 = vmul.f32 1.5703125, %v1875_v39  ;;  %v1891_v55 = vmul.f32 %v1864_v25, %v1829_v1  ;;  %v803_v53 = vadd.f32 -0.16666655, %v787_v4  ;;  %v1893_v58 = vcvt.f32.s32 %v1461_v29 }
 0x138   : > { %v1895_v60 = vcvt.f32.s32 %v1463_v31  ;;  %v773_v30 = vadd.f32 0.008332161, %v757_v34  ;;  %v758_v0 = vmul.f32 -0.00019515296, %v1872_v35  ;;  %v536_v5 = vmul.f32 0.0004837513, %v1875_v39 }
 0x139   : > { %v520_v2 = vsub.f32 %v1764_v8, %v504_v50  ;;  %v739_v7 = vmul.f32 %v1802_v43, %v1789_v32  ;;  %v804_v9 = vadd.f32 -0.16666655, %v788_v45  ;;  %v1902_v12 = vcvt.f32.s32 %v1465_v46 }
 0x13a   : > { %2651 = vst [vmem:[#allocation5_spill] sm:$0xff] %v1895_v60  ;;  %v1904_v15 = vfloor.f32 %v473_v63  ;;  %v1908_v17 = vmul.f32 %v1885_v49, %v1885_v49  ;;  %v568_v20 = vmul.f32 7.54979e-08, %v1875_v39  ;;  %v474_v21 = vadd.f32 0.5, %v458_v54 }
 0x13b   : > { %v552_v19 = vsub.f32 %v520_v2, %v536_v5  ;;  %v740_v8 = vmul.f32 %v1819_v57, %v1804_v44  ;;  %v741_v4 = vmul.f32 %v1843_v13, %v1832_v3  ;;  %v1467_v29 = vtrunc.f32 %v1824_v61 }
 0x13c   : > { %2652 = vst [vmem:[#allocation6_spill] sm:$0xff] %v1908_v17  ;;  %v505_v31 = vmul.f32 1.5703125, %v1904_v15  ;;  %v819_v33 = vmul.f32 %v803_v53, %v739_v7  ;;  %v789_v34 = vmul.f32 %v773_v30, %v1843_v13  ;;  %v774_v38 = vadd.f32 0.008332161, %v758_v0 }
 0x13d   : > { %v1918_v45 = vsub.f32 %v552_v19, %v568_v20  ;;  %v742_v46 = vmul.f32 %v1872_v35, %v1845_v14  ;;  %v537_v50 = vmul.f32 0.0004837513, %v1904_v15  ;;  %v1924_v54 = vfloor.f32 %v474_v21 }
 0x13e   : > { %v521_v63 = vsub.f32 %v1776_v22, %v505_v31  ;;  %v820_v2 = vmul.f32 %v804_v9, %v740_v8  ;;  %v759_v61 = vmul.f32 -0.00019515296, %v1908_v17  ;;  %v459_v5 = vmul.f32 0.63661975, %v1798_v42 }
 0x13f   : > { %v460_v53 = vmul.f32 0.63661975, %v1808_v47  ;;  %v1929_v30 = vcvt.f32.s32 %v1467_v29  ;;  %v569_v7 = vmul.f32 7.54979e-08, %v1904_v15  ;;  %v506_v19 = vmul.f32 1.5703125, %v1924_v54 }
 0x140   : > { %v553_v0 = vsub.f32 %v521_v63, %v537_v50  ;;  %v1934_v22 = vadd.f32 %v819_v33, %v1789_v32  ;;  %v805_v20 = vadd.f32 -0.16666655, %v789_v34  ;;  %v790_v21 = vmul.f32 %v774_v38, %v1872_v35 }
 0x141   : > { %2653 = vst [vmem:[#allocation7_spill] sm:$0xff] %v1929_v30  ;;  %v1939_v9 = vmul.f32 %v1918_v45, %v1918_v45  ;;  %v522_v29 = vsub.f32 %v1781_v27, %v506_v19  ;;  %v538_v31 = vmul.f32 0.0004837513, %v1924_v54  ;;  %v475_v63 = vadd.f32 0.5, %v459_v5 }
 0x142   : > { %2654 = vst [vmem:[#allocation8_spill] sm:$0xff] %v1934_v22  ;;  %v1941_v8 = vsub.f32 %v553_v0, %v569_v7  ;;  %v1946_v50 = vadd.f32 %v820_v2, %v1804_v44  ;;  %v775_v16 = vadd.f32 0.008332161, %v759_v61  ;;  %v476_v32 = vadd.f32 0.5, %v460_v53 }
 0x143   : > { %v461_v33 = vmul.f32 0.63661975, %v1827_v56  ;;  %v554_v38 = vsub.f32 %v522_v29, %v538_v31  ;;  %v570_v0 = vmul.f32 7.54979e-08, %v1924_v54  ;;  %v1954_v7 = vfloor.f32 %v475_v63 }
 0x144   : > { %2655 = vst [vmem:[#allocation9_spill] sm:$0xff] %v1946_v50  ;;  %v1951_v34 = vmul.f32 %v1941_v8, %v1941_v8  ;;  %v821_v27 = vmul.f32 %v805_v20, %v741_v4  ;;  %v806_v19 = vadd.f32 -0.16666655, %v790_v21  ;;  %v1469_v5 = vtrunc.f32 %v1875_v39 }
 0x145   : > { %v1957_v11 = vfloor.f32 %v476_v32  ;;  %v743_v44 = vmul.f32 %v1908_v17, %v1885_v49  ;;  %v760_v2 = vmul.f32 -0.00019515296, %v1939_v9  ;;  %v1962_v61 = vsub.f32 %v554_v38, %v570_v0 }
 0x146   : > { %v507_v53 = vmul.f32 1.5703125, %v1954_v7  ;;  %v791_v29 = vmul.f32 %v775_v16, %v1908_v17  ;;  %v761_v31 = vmul.f32 -0.00019515296, %v1951_v34  ;;  %v477_v63 = vadd.f32 0.5, %v461_v33 }
 0x147   : > { %v462_v4 = vmul.f32 0.63661975, %v1835_v6  ;;  %v1970_v39 = vmul.f32 %v1962_v61, %v1962_v61  ;;  %v539_v21 = vmul.f32 0.0004837513, %v1954_v7  ;;  %v508_v32 = vmul.f32 1.5703125, %v1957_v11 }
 0x148   : > { %v523_v20 = vsub.f32 %v1798_v42, %v507_v53  ;;  %v1976_v38 = vadd.f32 %v821_v27, %v1832_v3  ;;  %v822_v0 = vmul.f32 %v806_v19, %v742_v46  ;;  %v1978_v16 = vcvt.f32.s32 %v1469_v5 }
 0x149   : > { %v1471_v33 = vtrunc.f32 %v1904_v15  ;;  %v776_v10 = vadd.f32 0.008332161, %v760_v2  ;;  %v762_v17 = vmul.f32 -0.00019515296, %v1970_v39  ;;  %v571_v22 = vmul.f32 7.54979e-08, %v1954_v7 }
 0x14a   : > { %2656 = vst [vmem:[#allocation10_spill] sm:$0xff] %v1976_v38  ;;  %2657 = vst [vmem:[#allocation11_spill] sm:$0xff] %v1978_v16  ;;  %v555_v30 = vsub.f32 %v523_v20, %v539_v21  ;;  %v807_v50 = vadd.f32 -0.16666655, %v791_v29  ;;  %v524_v42 = vsub.f32 %v1808_v47, %v508_v32  ;;  %v540_v53 = vmul.f32 0.0004837513, %v1957_v11 }
 0x14b   : > { %v1985_v13 = vfloor.f32 %v477_v63  ;;  %v777_v3 = vadd.f32 0.008332161, %v761_v31  ;;  %v778_v27 = vadd.f32 0.008332161, %v762_v17  ;;  %v478_v19 = vadd.f32 0.5, %v462_v4 }
 0x14c   : > { %v1987_v46 = vsub.f32 %v555_v30, %v571_v22  ;;  %v1990_v15 = vadd.f32 %v822_v0, %v1845_v14  ;;  %v556_v5 = vsub.f32 %v524_v42, %v540_v53  ;;  %v572_v2 = vmul.f32 7.54979e-08, %v1957_v11 }
 0x14d   : > { %v509_v20 = vmul.f32 1.5703125, %v1985_v13  ;;  %v792_v29 = vmul.f32 %v776_v10, %v1939_v9  ;;  %v1995_v47 = vcvt.f32.s32 %v1471_v33  ;;  %v1473_v63 = vtrunc.f32 %v1924_v54 }
 0x14e   : > { %v2000_v17 = vmul.f32 %v1987_v46, %v1987_v46  ;;  %v2002_v30 = vsub.f32 %v556_v5, %v572_v2  ;;  %v541_v22 = vmul.f32 0.0004837513, %v1985_v13  ;;  %v494_v31 = vfloor.f32 %v478_v19 }
 0x14f   : > { %2658 = vst [vmem:[#allocation12_spill] sm:$0xff] %v1995_v47  ;;  %v525_v14 = vsub.f32 %v1827_v56, %v509_v20  ;;  %v823_v4 = vmul.f32 %v807_v50, %v743_v44  ;;  %v793_v21 = vmul.f32 %v777_v3, %v1951_v34  ;;  %v794_v10 = vmul.f32 %v778_v27, %v1970_v39 }
 0x150   : > { %2659 = vst [vmem:[#allocation13_spill] sm:$0xff] %v2000_v17  ;;  %v763_v32 = vmul.f32 -0.00019515296, %v2000_v17  ;;  %v2011_v54 = vmul.f32 %v2002_v30, %v2002_v30  ;;  %v573_v33 = vmul.f32 7.54979e-08, %v1985_v13  ;;  %v510_v42 = vmul.f32 1.5703125, %v494_v31 }
 0x151   : > { %v557_v0 = vsub.f32 %v525_v14, %v541_v22  ;;  %v744_v56 = vmul.f32 %v1939_v9, %v1918_v45  ;;  %v808_v53 = vadd.f32 -0.16666655, %v792_v29  ;;  %v2016_v19 = vcvt.f32.s32 %v1473_v63 }
 0x152   : > { %v779_v50 = vadd.f32 0.008332161, %v763_v32  ;;  %v764_v44 = vmul.f32 -0.00019515296, %v2011_v54  ;;  %v526_v27 = vsub.f32 %v1835_v6, %v510_v42  ;;  %v542_v5 = vmul.f32 0.0004837513, %v494_v31 }
 0x153   : > { %2660 = vst [vmem:[#allocation14_spill] sm:$0xff] %v2016_v19  ;;  %v2019_v3 = vsub.f32 %v557_v0, %v573_v33  ;;  %v2023_v2 = vadd.f32 %v823_v4, %v1885_v49  ;;  %v809_v20 = vadd.f32 -0.16666655, %v793_v21  ;;  %v810_v14 = vadd.f32 -0.16666655, %v794_v10 }
 0x154   : > { %v1475_v22 = vtrunc.f32 %v1954_v7  ;;  %v780_v47 = vadd.f32 0.008332161, %v764_v44  ;;  %v558_v63 = vsub.f32 %v526_v27, %v542_v5  ;;  %v574_v32 = vmul.f32 7.54979e-08, %v494_v31 }
 0x155   : > { %v2028_v29 = vmul.f32 %v2019_v3, %v2019_v3  ;;  %v824_v38 = vmul.f32 %v808_v53, %v744_v56  ;;  %v745_v0 = vmul.f32 %v1951_v34, %v1941_v8  ;;  %v795_v6 = vmul.f32 %v779_v50, %v2000_v17 }
 0x156   : > { %v1477_v49 = vtrunc.f32 %v1957_v11  ;;  %v746_v4 = vmul.f32 %v1970_v39, %v1962_v61  ;;  %v2037_v21 = vsub.f32 %v558_v63, %v574_v32  ;;  %v2661_v10 = vtrunc.f32 %v1736_v40 }
 0x157   : > { %v765_v7 = vmul.f32 -0.00019515296, %v2028_v29  ;;  %v825_v42 = vmul.f32 %v809_v20, %v745_v0  ;;  %v2043_v56 = vcvt.f32.s32 %v1475_v22  ;;  %v796_v53 = vmul.f32 %v780_v47, %v2011_v54 }
 0x158   : > { %v2041_v33 = vcvt.f32.s32 %v2661_v10  ;;  %v1457_v50 = vtrunc.f32 %v1743_v52  ;;  %v826_v44 = vmul.f32 %v810_v14, %v746_v4  ;;  %v1479_v11 = vtrunc.f32 %v1985_v13 }
 0x159   : > { %2663 = vst [vmem:[#allocation16_spill] sm:$0xff] %v2043_v56  ;;  %v2050_v27 = vmul.f32 %v2037_v21, %v2037_v21  ;;  %v752_v5 = vmul.f32 -0.00019515296, %v1812_v48  ;;  %v2054_v40 = vadd.f32 %v824_v38, %v1918_v45  ;;  %v811_v63 = vadd.f32 -0.16666655, %v795_v6 }
 0x15a   : > { %2662 = vst [vmem:[#allocation15_spill] sm:$0xff] %v2041_v33  ;;  %v2056_v20 = vcvt.f32.s32 %v1477_v49  ;;  %v781_v22 = vadd.f32 0.008332161, %v765_v7  ;;  %v747_v47 = vmul.f32 %v2000_v17, %v1987_v46  ;;  %v1481_v52 = vtrunc.f32 %v494_v31 }
 0x15b   : > { %v766_v14 = vmul.f32 -0.00019515296, %v2050_v27  ;;  %v672_v13 = vadd.s32 1, %v2041_v33  ;;  %v812_v32 = vadd.f32 -0.16666655, %v796_v53  ;;  %v2062_v0 = vcvt.f32.s32 %v1457_v50 }
 0x15c   : > { %2664 = vst [vmem:[#allocation17_spill] sm:$0xff] %v2056_v20  ;;  %v754_v4 = vmul.f32 -0.00019515296, %v1864_v25  ;;  %v768_v10 = vadd.f32 0.008332161, %v752_v5  ;;  %v2066_v45 = vadd.f32 %v825_v42, %v1941_v8  ;;  %v2069_v38 = vadd.f32 %v826_v44, %v1962_v61 }
 0x15d   : > { %2665 = vst [vmem:[#allocation18_spill] sm:$0xff] %v2062_v0  ;;  %v748_v6 = vmul.f32 %v2011_v54, %v2002_v30  ;;  %v2073_v31 = vcvt.f32.s32 %v1479_v11  ;;  %v827_v49 = vmul.f32 %v811_v63, %v747_v47  ;;  %v797_v7 = vmul.f32 %v781_v22, %v2028_v29 }
 0x15e   : > { %v770_v53 = vadd.f32 0.008332161, %v754_v4  ;;  %v784_v50 = vmul.f32 %v768_v10, %v1812_v48  ;;  %v2077_v17 = vcvt.f32.s32 %v1481_v52  ;;  %v782_v5 = vadd.f32 0.008332161, %v766_v14 }
 0x15f   : > { %2666 = vst [vmem:[#allocation19_spill] sm:$0xff] %v2073_v31  ;;  %v608_v8 = vand.u32 1, %v2041_v33  ;;  %v688_v42 = vand.u32 2, %v672_v13  ;;  %v828_v56 = vmul.f32 %v812_v32, %v748_v6  ;;  %v610_v61 = vand.u32 1, %v2062_v0 }
 0x160   : > { %2667 = vst [vmem:[#allocation20_spill] sm:$0xff] %v2077_v17  ;;  %v674_v44 = vadd.s32 1, %v2062_v0  ;;  %v786_v11 = vmul.f32 %v770_v53, %v1864_v25  ;;  %v749_v63 = vmul.f32 %v2028_v29, %v2019_v3  ;;  %v800_v22 = vadd.f32 -0.16666655, %v784_v50 }
 0x161   : > { %v896_v47 = vmul.f32 2.4433157e-05, %v1812_v48  ;;  %v898_v52 = vmul.f32 2.4433157e-05, %v1864_v25  ;;  %v2088_v14 = vadd.f32 %v827_v49, %v1987_v46  ;;  %v813_v4 = vadd.f32 -0.16666655, %v797_v7 }
 0x162   : > { %v802_v13 = vadd.f32 -0.16666655, %v786_v11  ;;  %v848_v32 = vmul.f32 0.5, %v1812_v48  ;;  %v750_v10 = vmul.f32 %v2050_v27, %v2037_v21  ;;  %v798_v6 = vmul.f32 %v782_v5, %v2050_v27 }
 0x163   : > { %2668 = vst [vmem:[#allocation21_spill] sm:$0xff] %v2088_v14  ;;  %v912_v53 = vadd.f32 -0.0013887316, %v896_v47  ;;  %v914_v0 = vadd.f32 -0.0013887316, %v898_v52  ;;  %v2095_v50 = vadd.f32 %v828_v56, %v2002_v30  ;;  %vm2097_vm1 = vcmp.eq.s32.totalorder %v608_v8, 1 }
 0x164   : > { %vm2101_vm2 = vcmp.eq.s32.totalorder %v610_v61, 1  ;;  %v690_v49 = vand.u32 2, %v674_v44  ;;  %v850_v7 = vmul.f32 0.5, %v1864_v25  ;;  %v751_v11 = vmul.f32 -0.00019515296, %v1795_v36 }
 0x165   : > { %2669 = vst [vmem:[#allocation22_spill] sm:$0xff] %v2095_v50  ;;  %v816_v5 = vmul.f32 %v800_v22, %v1856_v62  ;;  %v818_v47 = vmul.f32 %v802_v13, %v1891_v55  ;;  %v928_v30 = vmul.f32 %v912_v53, %v1812_v48  ;;  %v930_v56 = vmul.f32 %v914_v0, %v1864_v25 }
 0x166   : > { %v829_v8 = vmul.f32 %v813_v4, %v749_v63  ;;  %v864_v52 = vsub.f32 1.0, %v848_v32  ;;  %v880_v61 = vmul.f32 %v1812_v48, %v1812_v48  ;;  %v1455_v14 = vtrunc.f32 %v1741_v51 }
 0x167   : > { %v814_v44 = vadd.f32 -0.16666655, %v798_v6  ;;  %vm2114_vm3 = vcmp.eq.s32.totalorder %v688_v42, 2  ;;  %v882_v62 = vmul.f32 %v1864_v25, %v1864_v25  ;;  %v944_v55 = vadd.f32 0.041666646, %v928_v30 }
 0x168   : > { %v946_v22 = vadd.f32 0.041666646, %v930_v56  ;;  %v866_v13 = vsub.f32 1.0, %v850_v7  ;;  %v2676_v0 = vtrunc.f32 %v1731_v37  ;;  %v753_v4 = vmul.f32 -0.00019515296, %v1860_v24 }
 0x169   : > { %v767_v48 = vadd.f32 0.008332161, %v751_v11  ;;  %v2126_v51 = vadd.f32 %v816_v5, %v1783_v28  ;;  %v2129_v42 = vadd.f32 %v818_v47, %v1829_v1  ;;  %v960_v32 = vmul.f32 %v944_v55, %v880_v61 }
 0x16a   : > { %v2122_v63 = vcvt.f32.s32 %v2676_v0  ;;  %v962_v6 = vmul.f32 %v946_v22, %v882_v62  ;;  %vm2131_vm4 = vcmp.eq.s32.totalorder %v690_v49, 2  ;;  %v2135_v53 = vcvt.f32.s32 %v1455_v14 }
 0x16b   : > { %v769_v37 = vadd.f32 0.008332161, %v753_v4  ;;  %v783_v7 = vmul.f32 %v767_v48, %v1795_v36  ;;  %v2139_v30 = vadd.f32 %v829_v8, %v2019_v3  ;;  %v830_v11 = vmul.f32 %v814_v44, %v750_v10 }
 0x16c   : > { %v2141_v28 = vadd.f32 %v960_v32, %v864_v52  ;;  %v2143_v5 = vadd.f32 %v962_v6, %v866_v13  ;;  %v607_v1 = vand.u32 1, %v2122_v63  ;;  %v895_v56 = vmul.f32 2.4433157e-05, %v1795_v36 }
 0x16d   : > { %2679 = vst [vmem:[#allocation23_spill] sm:$0xff] %v2139_v30  ;;  %v785_v49 = vmul.f32 %v769_v37, %v1860_v24  ;;  %v799_v47 = vadd.f32 -0.16666655, %v783_v7  ;;  %v671_v10 = vadd.s32 1, %v2122_v63  ;;  %v897_v8 = vmul.f32 2.4433157e-05, %v1860_v24 }
 0x16e   : > { %v1008_v14 = vsel %vm2097_vm1, %v2126_v51, %v2141_v28  ;;  %v1010_v3 = vsel %vm2101_vm2, %v2129_v42, %v2143_v5  ;;  %v673_v44 = vadd.s32 1, %v2135_v53  ;;  %v847_v55 = vmul.f32 0.5, %v1795_v36 }
 0x16f   : > { %v1056_v52 = vsub.f32 0.0, %v1008_v14  ;;  %v1058_v61 = vsub.f32 0.0, %v1010_v3  ;;  %v801_v62 = vadd.f32 -0.16666655, %v785_v49  ;;  %v849_v22 = vmul.f32 0.5, %v1860_v24 }
 0x170   : > { %v911_v13 = vadd.f32 -0.0013887316, %v895_v56  ;;  %v913_v0 = vadd.f32 -0.0013887316, %v897_v8  ;;  %v815_v32 = vmul.f32 %v799_v47, %v1852_v23  ;;  %v2168_v37 = vadd.f32 %v830_v11, %v2037_v21 }
 0x171   : > { %v1072_v4 = vsel %vm2114_vm3, %v1056_v52, %v1008_v14  ;;  %v1074_v48 = vsel %vm2131_vm4, %v1058_v61, %v1010_v3  ;;  %v817_v6 = vmul.f32 %v801_v62, %v1883_v26  ;;  %v609_v56 = vand.u32 1, %v2135_v53 }
 0x172   : > { %v1419_v7 = vpack.c.bf16 %v1074_v48, %v1072_v4  ;;  %v927_v49 = vmul.f32 %v911_v13, %v1795_v36  ;;  %v929_v30 = vmul.f32 %v913_v0, %v1860_v24  ;;  %vm2173_vm5 = vcmp.eq.s32.totalorder %v607_v1, 1 }
 0x173   : > { %v687_v25 = vand.u32 2, %v671_v10  ;;  %v689_v14 = vand.u32 2, %v673_v44  ;;  %v879_v23 = vmul.f32 %v1795_v36, %v1795_v36  ;;  %v881_v26 = vmul.f32 %v1860_v24, %v1860_v24 }
 0x174   : > { %1420 = vmatprep.subr.bf16.mxu1 %v1419_v7  ;;  %v943_v21 = vadd.f32 0.041666646, %v927_v49  ;;  %v945_v11 = vadd.f32 0.041666646, %v929_v30  ;;  %v831_v47 = vadd.f32 %v815_v32, %v1771_v18  ;;  %v833_v3 = vadd.f32 %v817_v6, %v1822_v59 }
 0x175   : > { %v863_v8 = vsub.f32 1.0, %v847_v55  ;;  %v865_v1 = vsub.f32 1.0, %v849_v22  ;;  %v676_v10 = vadd.s32 1, %v1893_v58  ;;  %v900_v44 = vmul.f32 2.4433157e-05, %v1819_v57 }
 0x176   : > { %v959_v52 = vmul.f32 %v943_v21, %v879_v23  ;;  %v961_v61 = vmul.f32 %v945_v11, %v881_v26  ;;  %v612_v62 = vand.u32 1, %v1893_v58  ;;  %v614_v36 = vand.u32 1, %v1902_v12  ;;  %v2754_v23 = vld [vmem:[#allocation21_spill] sm:$0xff] }
 0x177   : > { %v678_v24 = vadd.s32 1, %v1902_v12  ;;  %v902_v30 = vmul.f32 2.4433157e-05, %v1872_v35  ;;  %v852_v59 = vmul.f32 0.5, %v1819_v57  ;;  %v916_v55 = vadd.f32 -0.0013887316, %v900_v44 }
 0x178   : > { %v975_v13 = vadd.f32 %v959_v52, %v863_v8  ;;  %v977_v18 = vadd.f32 %v961_v61, %v865_v1  ;;  %vm2190_vm6 = vcmp.eq.s32.totalorder %v609_v56, 1  ;;  %vm2194_vm7 = vcmp.eq.s32.totalorder %v687_v25, 2 }
 0x179   : > { %v854_v4 = vmul.f32 0.5, %v1872_v35  ;;  %v918_v48 = vadd.f32 -0.0013887316, %v902_v30  ;;  %vm705_vm8 = vcmp.eq.s32.totalorder %v689_v14, 2  ;;  %v692_v7 = vand.u32 2, %v676_v10 }
 0x17a   : > { %v1007_v32 = vsel %vm2173_vm5, %v831_v47, %v975_v13  ;;  %v1009_v6 = vsel %vm2190_vm6, %v833_v3, %v977_v18  ;;  %vm2203_vm9 = vcmp.eq.s32.totalorder %v612_v62, 1  ;;  %vm2207_vm10 = vcmp.eq.s32.totalorder %v614_v36, 1 }
 0x17b   : > { %v1055_v49 = vsub.f32 0.0, %v1007_v32  ;;  %v1057_v56 = vsub.f32 0.0, %v1009_v6  ;;  %v884_v14 = vmul.f32 %v1819_v57, %v1819_v57  ;;  %v694_v26 = vand.u32 2, %v678_v24 }
 0x17c   : > { %v868_v21 = vsub.f32 1.0, %v852_v59  ;;  %v932_v11 = vmul.f32 %v916_v55, %v1819_v57  ;;  %v934_v8 = vmul.f32 %v918_v48, %v1872_v35  ;;  %v870_v61 = vsub.f32 1.0, %v854_v4 }
 0x17d   : > { %v1071_v1 = vsel %vm2194_vm7, %v1055_v49, %v1007_v32  ;;  %v1073_v52 = vsel %vm705_vm8, %v1057_v56, %v1009_v6  ;;  %v886_v10 = vmul.f32 %v1872_v35, %v1872_v35  ;;  %vm2219_vm11 = vcmp.eq.s32.totalorder %v692_v7, 2 }
 0x17e   : > { %v1421_v44 = vpack.c.bf16 %v1073_v52, %v1071_v1  ;;  %v948_v36 = vadd.f32 0.041666646, %v932_v11  ;;  %v950_v24 = vadd.f32 0.041666646, %v934_v8  ;;  %v2225_v57 = vsel %vm2173_vm5, %v975_v13, %v831_v47  ;;  %v2694_v13 = vld [vmem:[#allocation4_spill] sm:$0xff]  ;;  %v2698_v8 = vld [vmem:[#allocation9_spill] sm:$0xff] }
 0x17f   : > { %v611_v30 = vand.u32 1, %v1877_v41  ;;  %v675_v59 = vadd.s32 1, %v1877_v41  ;;  %v677_v55 = vadd.s32 1, %v1895_v60  ;;  %v2232_v35 = vsel %vm2190_vm6, %v977_v18, %v833_v3 }
 0x180   : > { %1422 = vmatpush1.bf16.msra.mxu1 %v1421_v44  ;;  %v964_v0 = vmul.f32 %v948_v36, %v884_v14  ;;  %v966_v4 = vmul.f32 %v950_v24, %v886_v10  ;;  %v899_v48 = vmul.f32 2.4433157e-05, %v1802_v43  ;;  %vm2235_vm12 = vcmp.eq.s32.totalorder %v694_v26, 2 }
 0x181   : > { %v613_v50 = vand.u32 1, %v1895_v60  ;;  %v851_v47 = vmul.f32 0.5, %v1802_v43  ;;  %v901_v6 = vmul.f32 2.4433157e-05, %v2694_v13  ;;  %v853_v3 = vmul.f32 0.5, %v2694_v13 }
 0x182   : > { %v2242_v7 = vadd.f32 %v964_v0, %v868_v21  ;;  %v2244_v22 = vadd.f32 %v966_v4, %v870_v61  ;;  %v915_v18 = vadd.f32 -0.0013887316, %v899_v48  ;;  %vm2249_vm13 = vcmp.eq.s32.totalorder %v611_v30, 1 }
 0x183   : > { %v2695_v14 = vmov 0  ;;  %v691_v26 = vand.u32 2, %v675_v59  ;;  %v917_v11 = vadd.f32 -0.0013887316, %v901_v6  ;;  %v693_v52 = vand.u32 2, %v677_v55 }
 0x184   : > { %v2696_v14 = vsel %vm2249_vm13, 4294967295, %v2695_v14  ;;  %v1012_v21 = vsel %vm2203_vm9, %v2698_v8, %v2242_v7  ;;  %v1014_v1 = vsel %vm2207_vm10, %v1990_v15, %v2244_v22  ;;  %v931_v61 = vmul.f32 %v915_v18, %v1802_v43 }
 0x185   : > { %2697 = vst [vmem:[#allocation4_spill] sm:$0xff] %v2696_v14  ;;  %v1060_v10 = vsub.f32 0.0, %v1012_v21  ;;  %v1062_v44 = vsub.f32 0.0, %v1014_v1  ;;  %v867_v36 = vsub.f32 1.0, %v851_v47  ;;  %v933_v24 = vmul.f32 %v917_v11, %v2694_v13 }
 0x186   : > { %v869_v30 = vsub.f32 1.0, %v853_v3  ;;  %v883_v59 = vmul.f32 %v1802_v43, %v1802_v43  ;;  %v885_v0 = vmul.f32 %v2694_v13, %v2694_v13  ;;  %v947_v4 = vadd.f32 0.041666646, %v931_v61 }
 0x187   : > { %v1076_v48 = vsel %vm2219_vm11, %v1060_v10, %v1012_v21  ;;  %v1078_v55 = vsel %vm2235_vm12, %v1062_v44, %v1014_v1  ;;  %v949_v6 = vadd.f32 0.041666646, %v933_v24  ;;  %v680_v18 = vadd.s32 1, %v1978_v16 }
 0x188   : > { %v1423_v47 = vpack.c.bf16 %v1078_v55, %v1076_v48  ;;  %v963_v56 = vmul.f32 %v947_v4, %v883_v59  ;;  %v616_v3 = vand.u32 1, %v1978_v16  ;;  %v682_v11 = vadd.s32 1, %v2016_v19  ;;  %v2711_v4 = vld [vmem:[#allocation10_spill] sm:$0xff]  ;;  %v2716_v16 = vld [vmem:[#allocation12_spill] sm:$0xff] }
 0x189   : > { %v965_v43 = vmul.f32 %v949_v6, %v885_v0  ;;  %v618_v49 = vand.u32 1, %v2016_v19  ;;  %v856_v13 = vmul.f32 0.5, %v1939_v9  ;;  %v904_v62 = vmul.f32 2.4433157e-05, %v1939_v9 }
 0x18a   : > { %1424 = vmatprep.subr.bf16.mxu1 %v1423_v47  ;;  %vm2277_vm14 = vcmp.eq.s32.totalorder %v613_v50, 1  ;;  %v2699_v32 = vmov 0  ;;  %vm2281_vm15 = vcmp.eq.s32.totalorder %v691_v26, 2  ;;  %v2285_v1 = vadd.f32 %v963_v56, %v867_v36  ;;  %v2708_v50 = vld [vmem:[#allocation8_spill] sm:$0xff] }
 0x18b   : > { %v2700_v32 = vsel %vm2277_vm14, 4294967295, %v2699_v32  ;;  %v906_v61 = vmul.f32 2.4433157e-05, %v1970_v39  ;;  %vm2288_vm0 = vcmp.eq.s32.totalorder %v693_v52, 2  ;;  %v2292_v44 = vadd.f32 %v965_v43, %v869_v30 }
 0x18c   : > { %2701 = vst [vmem:[#allocation9_spill] sm:$0xff] %v2700_v32  ;;  %2704 = vst [vmem:[#allocation24_spill] sm:$0xff] %v2285_v1  ;;  %v696_v24 = vand.u32 2, %v680_v18  ;;  %v920_v59 = vadd.f32 -0.0013887316, %v904_v62  ;;  %v1011_v26 = vsel %vm2249_vm13, %v2708_v50, %v2285_v1  ;;  %vm2298_vm3 = vcmp.eq.s32.totalorder %v616_v3, 1 }
 0x18d   : > { %2707 = vst [vmem:[#allocation25_spill] sm:$0xff] %v2292_v44  ;;  %v698_v56 = vand.u32 2, %v682_v11  ;;  %v858_v36 = vmul.f32 0.5, %v1970_v39  ;;  %v922_v52 = vadd.f32 -0.0013887316, %v906_v61  ;;  %v1013_v30 = vsel %vm2277_vm14, %v2711_v4, %v2292_v44  ;;  %v2715_v61 = vld [vmem:[#allocation7_spill] sm:$0xff] }
 0x18e   : > { %v1059_v48 = vsub.f32 0.0, %v1011_v26  ;;  %vm2307_vm4 = vcmp.eq.s32.totalorder %v618_v49, 1  ;;  %v2712_v55 = vmov 0  ;;  %v872_v6 = vsub.f32 1.0, %v856_v13  ;;  %v2717_v1 = vld [vmem:[#allocation6_spill] sm:$0xff] }
 0x18f   : > { %v2713_v55 = vsel %vm2307_vm4, 4294967295, %v2712_v55  ;;  %v936_v18 = vmul.f32 %v920_v59, %v1939_v9  ;;  %v1061_v47 = vsub.f32 0.0, %v1013_v30  ;;  %v888_v3 = vmul.f32 %v1939_v9, %v1939_v9 }
 0x190   : > { %2714 = vst [vmem:[#allocation26_spill] sm:$0xff] %v2713_v55  ;;  %v890_v11 = vmul.f32 %v1970_v39, %v1970_v39  ;;  %v938_v43 = vmul.f32 %v922_v52, %v1970_v39  ;;  %v615_v19 = vand.u32 1, %v2715_v61  ;;  %v617_v49 = vand.u32 1, %v2716_v16 }
 0x191   : > { %v952_v62 = vadd.f32 0.041666646, %v936_v18  ;;  %v679_v32 = vadd.s32 1, %v2715_v61  ;;  %v1075_v13 = vsel %vm2281_vm15, %v1059_v48, %v1011_v26  ;;  %v1077_v59 = vsel %vm2288_vm0, %v1061_v47, %v1013_v30 }
 0x192   : > { %v954_v44 = vadd.f32 0.041666646, %v938_v43  ;;  %v681_v9 = vadd.s32 1, %v2716_v16  ;;  %v1425_v4 = vpack.c.bf16 %v1077_v59, %v1075_v13  ;;  %v855_v39 = vmul.f32 0.5, %v2717_v1 }
 0x193   : > { %v968_v14 = vmul.f32 %v952_v62, %v888_v3  ;;  %v857_v52 = vmul.f32 0.5, %v1951_v34  ;;  %v874_v18 = vsub.f32 1.0, %v858_v36  ;;  %v903_v60 = vmul.f32 2.4433157e-05, %v2717_v1 }
 0x194   : > { %v970_v50 = vmul.f32 %v954_v44, %v890_v11  ;;  %v905_v61 = vmul.f32 2.4433157e-05, %v1951_v34  ;;  %1426 = vmatpush1.bf16.msra.mxu1 %v1425_v4  ;;  %vm2329_vm5 = vcmp.eq.s32.totalorder %v696_v24, 2  ;;  %vm2333_vm6 = vcmp.eq.s32.totalorder %v698_v56, 2 }
 0x195   : > { %v2337_v26 = vadd.f32 %v968_v14, %v872_v6  ;;  %v695_v30 = vand.u32 2, %v679_v32  ;;  %v697_v36 = vand.u32 2, %v681_v9  ;;  %v919_v44 = vadd.f32 -0.0013887316, %v903_v60 }
 0x196   : > { %v2339_v48 = vadd.f32 %v970_v50, %v874_v18  ;;  %v921_v47 = vadd.f32 -0.0013887316, %v905_v61  ;;  %vm2345_vm7 = vcmp.eq.s32.totalorder %v615_v19, 1  ;;  %vm2349_vm8 = vcmp.eq.s32.totalorder %v617_v49, 1 }
 0x197   : > { %v1016_v24 = vsel %vm2298_vm3, %v2054_v40, %v2337_v26  ;;  %v2724_v56 = vmov 0  ;;  %v871_v14 = vsub.f32 1.0, %v855_v39  ;;  %v873_v32 = vsub.f32 1.0, %v857_v52 }
 0x198   : > { %v2725_v56 = vsel %vm2349_vm8, 4294967295, %v2724_v56  ;;  %v1018_v60 = vsel %vm2307_vm4, %v2069_v38, %v2339_v48  ;;  %v1064_v50 = vsub.f32 0.0, %v1016_v24  ;;  %v935_v6 = vmul.f32 %v919_v44, %v2717_v1 }
 0x199   : > { %2726 = vst [vmem:[#allocation6_spill] sm:$0xff] %v2725_v56  ;;  %v937_v3 = vmul.f32 %v921_v47, %v1951_v34  ;;  %v1066_v19 = vsub.f32 0.0, %v1018_v60  ;;  %v887_v11 = vmul.f32 %v2717_v1, %v2717_v1  ;;  %v684_v43 = vadd.s32 1, %v2056_v20 }
 0x19a   : > { %v686_v62 = vadd.s32 1, %v2077_v17  ;;  %vm2363_vm11 = vcmp.eq.s32.totalorder %v695_v30, 2  ;;  %vm2367_vm12 = vcmp.eq.s32.totalorder %v697_v36, 2  ;;  %v889_v13 = vmul.f32 %v1951_v34, %v1951_v34 }
 0x19b   : > { %v951_v59 = vadd.f32 0.041666646, %v935_v6  ;;  %v953_v9 = vadd.f32 0.041666646, %v937_v3  ;;  %v860_v39 = vmul.f32 0.5, %v2011_v54  ;;  %v1080_v1 = vsel %vm2329_vm5, %v1064_v50, %v1016_v24 }
 0x19c   : > { %v1082_v52 = vsel %vm2333_vm6, %v1066_v19, %v1018_v60  ;;  %v620_v18 = vand.u32 1, %v2056_v20  ;;  %v862_v30 = vmul.f32 0.5, %v2050_v27  ;;  %v622_v16 = vand.u32 1, %v2077_v17 }
 0x19d   : > { %v1427_v36 = vpack.c.bf16 %v1082_v52, %v1080_v1  ;;  %v967_v44 = vmul.f32 %v951_v59, %v887_v11  ;;  %v969_v47 = vmul.f32 %v953_v9, %v889_v13  ;;  %v700_v34 = vand.u32 2, %v684_v43  ;;  %v2735_v59 = vld [vmem:[#allocation16_spill] sm:$0xff] }
 0x19e   : > { %v702_v6 = vand.u32 2, %v686_v62  ;;  %v908_v3 = vmul.f32 2.4433157e-05, %v2011_v54  ;;  %v910_v55 = vmul.f32 2.4433157e-05, %v2050_v27  ;;  %v876_v24 = vsub.f32 1.0, %v860_v39 }
 0x19f   : > { %1428 = vmatprep.subr.bf16.mxu1 %v1427_v36  ;;  %v2383_v21 = vadd.f32 %v967_v44, %v871_v14  ;;  %v2385_v10 = vadd.f32 %v969_v47, %v873_v32  ;;  %v892_v60 = vmul.f32 %v2011_v54, %v2011_v54  ;;  %v878_v50 = vsub.f32 1.0, %v862_v30  ;;  %v2736_v44 = vld [vmem:[#allocation13_spill] sm:$0xff]  ;;  %v2779_v32 = vld [vmem:[#allocation19_spill] sm:$0xff] }
 0x1a0   : > { %v894_v19 = vmul.f32 %v2050_v27, %v2050_v27  ;;  %v924_v11 = vadd.f32 -0.0013887316, %v908_v3  ;;  %v926_v43 = vadd.f32 -0.0013887316, %v910_v55  ;;  %vm2399_vm15 = vcmp.eq.s32.totalorder %v620_v18, 1 }
 0x1a1   : > { %v1015_v62 = vsel %vm2345_vm7, %v2023_v2, %v2383_v21  ;;  %v1017_v14 = vsel %vm2349_vm8, %v2066_v45, %v2385_v10  ;;  %vm2403_vm0 = vcmp.eq.s32.totalorder %v622_v16, 1  ;;  %v2733_v13 = vmov 0 }
 0x1a2   : > { %v2734_v13 = vsel %vm2403_vm0, 4294967295, %v2733_v13  ;;  %v683_v55 = vadd.s32 1, %v2735_v59  ;;  %v685_v9 = vadd.s32 1, %v2073_v31  ;;  %v1063_v39 = vsub.f32 0.0, %v1015_v62 }
 0x1a3   : > { %v1065_v1 = vsub.f32 0.0, %v1017_v14  ;;  %v940_v52 = vmul.f32 %v924_v11, %v2011_v54  ;;  %v942_v30 = vmul.f32 %v926_v43, %v2050_v27  ;;  %v619_v36 = vand.u32 1, %v2735_v59 }
 0x1a4   : > { %v621_v18 = vand.u32 1, %v2073_v31  ;;  %v2414_v47 = vmul.f32 0.5, %v2736_v44  ;;  %v2417_v16 = vmul.f32 0.5, %v2028_v29  ;;  %v1079_v3 = vsel %vm2363_vm11, %v1063_v39, %v1015_v62  ;;  %v2741_v39 = vld [vmem:[#allocation15_spill] sm:$0xff] }
 0x1a5   : > { %v1081_v17 = vsel %vm2367_vm12, %v1065_v1, %v1017_v14  ;;  %vm2423_vm5 = vcmp.eq.s32.totalorder %v700_v34, 2  ;;  %vm2427_vm6 = vcmp.eq.s32.totalorder %v702_v6, 2  ;;  %v956_v11 = vadd.f32 0.041666646, %v940_v52  ;;  %v2742_v52 = vld [vmem:[#allocation18_spill] sm:$0xff] }
 0x1a6   : > { %v958_v43 = vadd.f32 0.041666646, %v942_v30  ;;  %v1429_v31 = vpack.c.bf16 %v1081_v17, %v1079_v3  ;;  %v699_v59 = vand.u32 2, %v683_v55  ;;  %v701_v20 = vand.u32 2, %v685_v9 }
 0x1a7   : > { %v875_v56 = vsub.f32 1.0, %v2414_v47  ;;  %v972_v61 = vmul.f32 %v956_v11, %v892_v60  ;;  %v877_v49 = vsub.f32 1.0, %v2417_v16  ;;  %v891_v34 = vmul.f32 %v2736_v44, %v2736_v44  ;;  %v2743_v47 = vld [vmem:[#allocation22_spill] sm:$0xff] }
 0x1a8   : > { %v974_v62 = vmul.f32 %v958_v43, %v894_v19  ;;  %1430 = vmatpush1.bf16.msra.mxu1 %v1429_v31  ;;  %v907_v6 = vmul.f32 2.4433157e-05, %v2736_v44  ;;  %v909_v14 = vmul.f32 2.4433157e-05, %v2028_v29  ;;  %v640_v1 = vand.u32 2, %v2741_v39 }
 0x1a9   : > { %v642_v17 = vand.u32 2, %v2742_v52  ;;  %v2439_v55 = vadd.f32 %v972_v61, %v876_v24  ;;  %v992_v60 = vsel %vm2097_vm1, %v2141_v28, %v2126_v51  ;;  %v994_v31 = vsel %vm2101_vm2, %v2143_v5, %v2129_v42 }
 0x1aa   : > { %v2441_v9 = vadd.f32 %v974_v62, %v878_v50  ;;  %v923_v19 = vadd.f32 -0.0013887316, %v907_v6  ;;  %v925_v30 = vadd.f32 -0.0013887316, %v909_v14  ;;  %vm656_vm11 = vcmp.eq.s32.totalorder %v640_v1, 2 }
 0x1ab   : > { %vm658_vm12 = vcmp.eq.s32.totalorder %v642_v17, 2  ;;  %v1020_v24 = vsel %vm2399_vm15, %v2743_v47, %v2439_v55  ;;  %vm2459_vm1 = vcmp.eq.s32.totalorder %v619_v36, 1  ;;  %vm2463_vm8 = vcmp.eq.s32.totalorder %v621_v18, 1 }
 0x1ac   : > { %v1022_v33 = vsel %vm2403_vm0, %v2168_v37, %v2441_v9  ;;  %v1024_v42 = vsub.f32 0.0, %v992_v60  ;;  %v1026_v28 = vsub.f32 0.0, %v994_v31  ;;  %v1068_v5 = vsub.f32 0.0, %v1020_v24 }
 0x1ad   : > { %v1070_v50 = vsub.f32 0.0, %v1022_v33  ;;  %v939_v16 = vmul.f32 %v923_v19, %v2736_v44  ;;  %v941_v3 = vmul.f32 %v925_v30, %v2028_v29  ;;  %v893_v11 = vmul.f32 %v2028_v29, %v2028_v29  ;;  %v1237_v44 = vld [vmem:[#allocation2] sm:$0xff] }
 0x1ae   : > { %v1040_v43 = vsel %vm656_vm11, %v1024_v42, %v992_v60  ;;  %v1042_v36 = vsel %vm658_vm12, %v1026_v28, %v994_v31  ;;  %v639_v61 = vand.u32 2, %v2122_v63  ;;  %v1084_v18 = vsel %vm2423_vm5, %v1068_v5, %v1020_v24  ;;  %v2759_v5 = vld [vmem:[#allocation8_spill] sm:$0xff] }
 0x1af   : > { %v1086_v62 = vsel %vm2427_vm6, %v1070_v50, %v1022_v33  ;;  %vm2476_vm2 = vcmp.eq.s32.totalorder %v699_v59, 2  ;;  %vm2480_vm0 = vcmp.eq.s32.totalorder %v701_v20, 2  ;;  %v955_v14 = vadd.f32 0.041666646, %v939_v16  ;;  %v2760_v50 = vld [vmem:[#allocation24_spill] sm:$0xff] }
 0x1b0   : > { %v957_v29 = vadd.f32 0.041666646, %v941_v3  ;;  %v1431_v39 = vpack.c.bf16 %v1086_v62, %v1084_v18  ;;  %v1435_v1 = vpack.c.bf16 %v1042_v36, %v1040_v43  ;;  %v641_v63 = vand.u32 2, %v2135_v53  ;;  %v2762_v43 = vld [vmem:[#allocation10_spill] sm:$0xff]  ;;  %v2763_v36 = vld [vmem:[#allocation25_spill] sm:$0xff] }
 0x1b1   : > { %vm655_vm11 = vcmp.eq.s32.totalorder %v639_v61, 2  ;;  %v971_v54 = vmul.f32 %v955_v14, %v891_v34  ;;  %v2752_v27 = vsub.f32 0.0, %v2225_v57  ;;  %v644_v17 = vand.u32 2, %v1893_v58  ;;  %v1406_v61 = vld [vmem:[%s1696_s15 + $0x1] ss:$2 sm:$0x3] }
 0x1b2   : > { %v973_v52 = vmul.f32 %v957_v29, %v893_v11  ;;  %1432 = vmatprep.subr.bf16.mxu1 %v1431_v39  ;;  %vm657_vm5 = vcmp.eq.s32.totalorder %v641_v63, 2  ;;  %v646_v20 = vand.u32 2, %v1902_v12  ;;  %v996_v60 = vsel %vm2203_vm9, %v2242_v7, %v2698_v8  ;;  %v2756_v8 = vld [vmem:[#allocation5_spill] sm:$0xff]  ;;  %v2765_v39 = vld [vmem:[#allocation11_spill] sm:$0xff] }
 0x1b3   : > { %v1039_v59 = vsel %vm655_vm11, %v2752_v27, %v2225_v57  ;;  %v998_v53 = vsel %vm2207_vm10, %v2244_v22, %v1990_v15  ;;  %v2498_v34 = vadd.f32 %v971_v54, %v875_v56  ;;  %v2753_v58 = vsub.f32 0.0, %v2232_v35  ;;  %v2755_v15 = vld [vmem:[#allocation23_spill] sm:$0xff]  ;;  %v2766_v54 = vld [vmem:[#allocation14_spill] sm:$0xff] }
 0x1b4   : > { %v2500_v31 = vadd.f32 %v973_v52, %v877_v49  ;;  %vm660_vm6 = vcmp.eq.s32.totalorder %v644_v17, 2  ;;  %vm662_vm12 = vcmp.eq.s32.totalorder %v646_v20, 2  ;;  %v1028_v19 = vsub.f32 0.0, %v996_v60  ;;  %v1087_v20 = vld [vmem:[%s2613_s3] sm:$0xff] }
 0x1b5   : > { %v1041_v57 = vsel %vm657_vm5, %v2753_v58, %v2232_v35  ;;  %v1030_v30 = vsub.f32 0.0, %v998_v53  ;;  %v1019_v7 = vsel %vm2459_vm1, %v2754_v23, %v2498_v34  ;;  %v643_v22 = vand.u32 2, %v1877_v41 }
 0x1b6   : > { %v1437_v12 = vpack.c.bf16 %v1041_v57, %v1039_v59  ;;  %v1021_v25 = vsel %vm2463_vm8, %v2755_v15, %v2500_v31  ;;  %v645_v56 = vand.u32 2, %v2756_v8  ;;  %v1067_v35 = vsub.f32 0.0, %v1019_v7  ;;  %v2768_v59 = vld [vmem:[#allocation7_spill] sm:$0xff] }
 0x1b7   : > { %v1069_v49 = vsub.f32 0.0, %v1021_v25  ;;  %v1044_v24 = vsel %vm660_vm6, %v1028_v19, %v996_v60  ;;  %v1046_v33 = vsel %vm662_vm12, %v1030_v30, %v998_v53  ;;  %vm1088_vm9 = vcmask 523264   ;;  %v2772_v19 = vld [vmem:[#allocation6_spill] sm:$0xff] }
 0x1b8   : > { %v1439_v42 = vpack.c.bf16 %v1046_v33, %v1044_v24  ;;  %vm2515_vm10 = vcmp.eq.s32.totalorder %v643_v22, 2  ;;  %v995_v3 = vsel %vm2249_vm13, %v2760_v50, %v2759_v5  ;;  %v1083_v41 = vsel %vm2476_vm2, %v1067_v35, %v1019_v7  ;;  %v2778_v5 = vld [vmem:[#allocation16_spill] sm:$0xff] }
 0x1b9   : > { %v1085_v11 = vsel %vm2480_vm0, %v1069_v49, %v1021_v25  ;;  %v997_v18 = vsel %vm2277_vm14, %v2763_v36, %v2762_v43  ;;  %v1027_v62 = vsub.f32 0.0, %v995_v3  ;;  %v648_v63 = vand.u32 2, %v2765_v39  ;;  %v2775_v49 = vld [vmem:[#allocation20_spill] sm:$0xff] }
 0x1ba   : > { %v1433_v14 = vpack.c.bf16 %v1085_v11, %v1083_v41  ;;  %v1029_v29 = vsub.f32 0.0, %v997_v18  ;;  %v650_v52 = vand.u32 2, %v2766_v54  ;;  %vm661_vm11 = vcmp.eq.s32.totalorder %v645_v56, 2 }
 0x1bb   : > { %v1000_v6 = vsel %vm2298_vm3, %v2337_v26, %v2054_v40  ;;  %v1002_v27 = vsel %vm2307_vm4, %v2339_v48, %v2069_v38  ;;  %v647_v17 = vand.u32 2, %v2768_v59  ;;  %v1043_v60 = vsel %vm2515_vm10, %v1027_v62, %v995_v3  ;;  %v2769_v26 = vld [vmem:[#allocation12_spill] sm:$0xff] }
 0x1bc   : > { %1434 = vmatpush1.bf16.msra.mxu1 %v1433_v14  ;;  %v1045_v53 = vsel %vm661_vm11, %v1029_v29, %v997_v18  ;;  %vm664_vm13 = vcmp.eq.s32.totalorder %v648_v63, 2  ;;  %v1032_v58 = vsub.f32 0.0, %v1000_v6  ;;  %vm666_vm14 = vcmp.eq.s32.totalorder %v650_v52, 2 }
 0x1bd   : > { %1436 = vmatprep.subr.bf16.mxu1 %v1435_v1  ;;  %v1441_v40 = vpack.c.bf16 %v1045_v53, %v1043_v60  ;;  %v1034_v0 = vsub.f32 0.0, %v1002_v27  ;;  %v649_v57 = vand.u32 2, %v2769_v26  ;;  %vm2548_vm3 = vcmp.eq.s32.totalorder %v647_v17, 2  ;;  %v2774_v1 = vld [vmem:[#allocation17_spill] sm:$0xff]  ;;  %v1238_v17 = vld [vmem:[#allocation2 + $0x8] sm:$0xff] }
 0x1be   : > { %v999_v48 = vsel %vm2345_vm7, %v2383_v21, %v2023_v2  ;;  %vm2773_vm4 = vnez %v2772_v19  ;;  %v652_v7 = vand.u32 2, %v2774_v1  ;;  %v1048_v25 = vsel %vm664_vm13, %v1032_v58, %v1000_v6 }
 0x1bf   : > { %v1001_v30 = vsel %vm2773_vm4, %v2385_v10, %v2066_v45  ;;  %1404 = vmatmul.mubr.msk.f32.vlgmr.msra.gmra.mrb[0].mxu1 %vm1088_vm9, %v1087_v20  ;;  %v1050_v22 = vsel %vm666_vm14, %v1034_v0, %v1002_v27  ;;  %v1031_v8 = vsub.f32 0.0, %v999_v48  ;;  %vm665_vm0 = vcmp.eq.s32.totalorder %v649_v57, 2 }
 0x1c0   : > { %v1033_v56 = vsub.f32 0.0, %v1001_v30  ;;  %1438 = vmatpush1.bf16.msra.mxu1 %v1437_v12  ;;  %v1443_v35 = vpack.c.bf16 %v1050_v22, %v1048_v25  ;;  %v654_v24 = vand.u32 2, %v2775_v49  ;;  %v1004_v2 = vsel %vm2399_vm15, %v2439_v55, %v2743_v47 }
 0x1c1   : > { %v2776_v4 = vmov 0.0   ;;  %1440 = vmatprep.subr.bf16.mxu1 %v1439_v42  ;;  %v1047_v45 = vsel %vm2548_vm3, %v1031_v8, %v999_v48  ;;  %vm2777_vm7 = vnez %v2734_v13  ;;  %v1036_v12 = vsub.f32 0.0, %v1004_v2 }
 0x1c2   : > { %1227 = vmatprep.mubr.f32.mxu1 %v2776_v4  ;;  %v1049_v21 = vsel %vm665_vm0, %v1033_v56, %v1001_v30  ;;  %v1006_v10 = vsel %vm2777_vm7, %v2441_v9, %v2168_v37  ;;  %vm668_vm2 = vcmp.eq.s32.totalorder %v652_v7, 2  ;;  %v651_v50 = vand.u32 2, %v2778_v5 }
 0x1c3   : > { %v1445_v33 = vpack.c.bf16 %v1049_v21, %v1047_v45  ;;  %v1038_v28 = vsub.f32 0.0, %v1006_v10  ;;  %vm670_vm5 = vcmp.eq.s32.totalorder %v654_v24, 2  ;;  %v653_v55 = vand.u32 2, %v2779_v32 }
 0x1c4   : > { %v1003_v47 = vsel %vm2459_vm1, %v2498_v34, %v2754_v23  ;;  %v1005_v13 = vsel %vm2463_vm8, %v2500_v31, %v2755_v15  ;;  %1442 = vmatpush1.bf16.msra.mxu1 %v1441_v40  ;;  %v1052_v37 = vsel %vm668_vm2, %v1036_v12, %v1004_v2  ;;  %vm667_vm15 = vcmp.eq.s32.totalorder %v651_v50, 2  ;;  %v1234_v15 = vld [vmem:[%s1696_s15] ss:$2 sm:$0x3] }
 0x1c5   : > { %v1054_v9 = vsel %vm670_vm5, %v1038_v28, %v1006_v10  ;;  %v1035_v42 = vsub.f32 0.0, %v1003_v47  ;;  %v1037_v16 = vsub.f32 0.0, %v1005_v13  ;;  %1444 = vmatprep.subr.bf16.mxu1 %v1443_v35  ;;  %vm669_vm6 = vcmp.eq.s32.totalorder %v653_v55, 2 }
 0x1c6   : > { %v1447_v3 = vpack.c.bf16 %v1054_v9, %v1052_v37  ;;  %v1240_v34 = vlaneseq  ;;  %vm1281_vm8 = vcmask (!%p1407_p0), 7168  }
 0x1c7   : > { %v1051_v41 = vsel %vm667_vm15, %v1035_v42, %v1003_v47  ;;  %v1053_v11 = vsel %vm669_vm6, %v1037_v16, %v1005_v13 }
 0x1c8   : > { %v1449_v51 = vpack.c.bf16 %v1053_v11, %v1051_v41  ;;  %1446 = vmatpush1.bf16.msra.mxu1 %v1445_v33  ;;  %v1241_v23 = vshrl.u32 %v1240_v34, 7 }
 0x1c9   : > { %1448 = vmatprep.subr.bf16.mxu1 %v1447_v3 }
 0x1ca   : > { %v1242_v43 = vsub.s32 0, %v1241_v23  ;;  %v1246_v36 = vsub.s32 1, %v1241_v23 }
 0x1cc   : > { %1450 = vmatpush1.bf16.msra.mxu1 %v1449_v51  ;;  %v1243_v18 = vrot.slane %v1234_v15, %v1242_v43  ;;  %v1256_v62 = vrot.slane %v1406_v61, %v1242_v43  ;;  %v1247_v14 = vrot.slane %v1234_v15, %v1246_v36  ;;  %v1260_v29 = vrot.slane %v1406_v61, %v1246_v36 }
 0x1cf   : > { %1405 = vmatmul.mubr.msk.f32.vlgmr.msra.gmra.mrb[2].mxu1 %vm1088_vm9, %v1087_v20 }
 0x292   : > { %v1158_v46 = vpop.f32.mrb[0].mxu1 }
 0x293   : > { %v1160_v31 = vpop.f32.mrb[1].mxu1  ;;  %v1250_v63 = vmul.f32 %v1243_v18, %v1158_v46 }
 0x294   : > { %v1251_v6 = vmul.f32 %v1247_v14, %v1160_v31 }
 0x2a2   : > { %v1229_v39 = vpop.f32.mrb[2].mxu1 }
 0x2a3   : > { %v1263_v54 = vmul.f32 %v1256_v62, %v1229_v39  ;;  %v1231_v52 = vpop.f32.mrb[3].mxu1 }
 0x2a4   : > { %v1264_v27 = vmul.f32 %v1260_v29, %v1231_v52  ;;  %1274 = sbr.rel (%p1407_p0) target bundleno = 837 (0x345), region = 67 }
 0x2a5   : > { %v1265_v59 = vadd.f32 %v1263_v54, %v1250_v63 }
 0x2a6   : > { %v1266_v20 = vadd.f32 %v1264_v27, %v1251_v6 }
 0x2a7   : > { %v1267_v60 = vadd.f32 %v1265_v59, %v1237_v44 }
 0x2a8   : > { %v1268_v53 = vadd.f32 %v1266_v20, %v1238_v17 }
 0x2a9   : > { %1269 = vst [vmem:[#allocation2] sm:$0xff] %v1267_v60 }
 0x2aa   : > { %1270 = vst [vmem:[#allocation2 + $0x8] sm:$0xff] %v1268_v53 }
 0x2b0   : > { %v1275_v58 = vld [vmem:[#allocation2] sm:$0xff] }
 0x2b1   : > { %v1276_v40 = vld [vmem:[#allocation2 + $0x8] sm:$0xff] }
 0x2b2   : > { %v1277_v0 = vadd.f32 %v1276_v40, %v1275_v58 }
 0x2b4   : > { %1278 = vadd.xlane.f32.xlu0 %v1277_v0 }
 0x341   : > { %v1279_v26 = vpop.xlane.xlu0 %1278 }
 0x342   : > { %v1280_v57 = vmul.f32 0.0078125, %v1279_v26 }
 0x344   : > { %1282 = vst.msk [vmem:[%s1701_s6] sm:$0xff] %vm1281_vm8, %v1280_v57 }
 0x345 PF: > { %s14_s21 = sadd.s32 1, %s1595_s21   ;;  %s2780_s15 = smov %s1575_s16 }
 0x346   : > { %p11_p1 = scmp.ge.s32.totalorder %s14_s21, 6   ;;  %s2781_s16 = smov %s1673_s26 }
 0x347   : > { %s2782_s17 = smov %s1587_s19  ;;  %s2783_s18 = smov %s1591_s20 }
 0x348   : > { %s2784_s19 = smov %s2787_s22  ;;  %s2785_s20 = smov %s2791_s23 }
 0x349   :  { %13 = sbr.rel (!%p11_p1) target bundleno = 4 (0x4), region = 109 }

// kernel: tpu_custom_call.1
= control target key start
LH: loop header
LB: loop body
LE: loop exit
PB: predicated region body
PF: predicated region fallthrough
CT: control target
= control target key end

     0   :  { %s1620_s15 = smov 0   ;;  %s1622_s16 = smov 0   ;;  %s2606_s0 = inlined_call_operand.vmem [shape: f32[128,32], index: 0, kind: input, shape index: {}]   ;;  %s2607_s1 = inlined_call_operand.vmem [shape: f32[32,512], index: 1, kind: input, shape index: {}]   ;;  %s2608_s2 = inlined_call_operand.vmem [shape: f32[2,512], index: 2, kind: input, shape index: {}]   ;;  %s2609_s3 = inlined_call_operand.vmem [shape: f32[8,64], index: 3, kind: input, shape index: {}]   ;;  %s2610_s4 = inlined_call_operand.vmem [shape: f32[16,1], index: 4, kind: output, shape index: {}]  }
   0x1   :  { %s1624_s17 = smov 0   ;;  %s1626_s18 = smov 0  }
   0x2   :  { %s1628_s19 = smov 0   ;;  %s1630_s20 = smov 0  }
   0x3   :  { %s1632_s21 = smov 0  }
   0x4 LB: > { %s23_s22 = sadd.s32 1, %s1583_s19  ;;  %s26_s23 = sadd.s32 1, %s1587_s20  ;;  %s1591_s21 = sphi %s1632_s21, %s14_s21   ;;  %s1587_s20 = sphi %s1630_s20, %s2781_s20   ;;  %s1583_s19 = sphi %s1628_s19, %s2780_s19   ;;  %s1579_s18 = sphi %s1626_s18, %s2779_s18   ;;  %s1575_s17 = sphi %s1624_s17, %s2778_s17   ;;  %s1571_s16 = sphi %s1622_s16, %s2777_s16   ;;  %s1567_s15 = sphi %s1620_s15, %s2776_s15  }
   0x5   : > { %p24_p0 = scmp.ge.s32.totalorder %s23_s22, 2  ;;  %s59_s24 = sadd.s32 1, %s1571_s16 }
   0x6   : > { %p66_p1 = scmp.ne.s32.totalorder %s1571_s16, %s1567_s15  ;;  %p67_p2 = scmp.eq.s32.totalorder %s1591_s21, 0 }
   0x7   : > { %s2783_s22 = smov (%p24_p0, %s23_s22), 0  ;;  %s2785_s23 = smov (!%p24_p0, %s26_s23), %s1587_s20 }
   0x8   : > { %s56_s25 = ssub.s32 %s1583_s19, %s2783_s22  ;;  %p68_p3 = por %p67_p2, %p66_p1 }
   0x9   : > { %p28_p4 = scmp.ge.s32.totalorder %s2785_s23, 2  ;;  %p57_p5 = scmp.eq.s32.totalorder %s56_s25, 0 }
   0xa   : > { %p1380_p6 = scmp.ge.s32.totalorder %s1591_s21, 4 }
   0xb   : > { %s2787_s23 = smov (%p28_p4, %s2785_s23), 0 }
   0xc   : > { %s1669_s26 = scalar_select %p57_p5, %s1571_s16, %s59_s24  }
   0xd   : > { %168 = sbr.rel (%p1380_p6) target bundleno = 28 (0x1c), region = 20 }
  0x14   : > { %180 = sbr.rel (!%p68_p3) target bundleno = 28 (0x1c), region = 28  ;;  %s182_s27 = sand.u32 (%p68_p3), 1, %s1571_s16  }
  0x15   : > { %s1406_s28 = sshll.u32 (%p68_p3), %s1583_s19, 4  ;;  %s1381_s29 = sshll.u32 (%p68_p3), %s182_s27, 6 }
  0x16   : > { %s187_s6 = scalar_lea.vmem (%p68_p3), %s2607_s1, %s1406_s28  ;;  %s184_s7 = scalar_lea.vmem (%p68_p3), [#allocation3], %s1381_s29 }
  0x17   : > { %v200_v0 = vld [vmem:[%s187_s6] sm:$0xff] (%p68_p3)  ;;  %v202_v1 = vld [vmem:[%s187_s6 + $0x8] sm:$0xff] (%p68_p3) }
  0x18   : > { %v204_v2 = vld [vmem:[%s187_s6 + $0x20] sm:$0xff] (%p68_p3)  ;;  %201 = vst [vmem:[%s184_s7] sm:$0xff] (%p68_p3), %v200_v0  ;;  %203 = vst [vmem:[%s184_s7 + $0x8] sm:$0xff] (%p68_p3), %v202_v1  ;;  %v206_v3 = vld [vmem:[%s187_s6 + $0x28] sm:$0xff] (%p68_p3) }
  0x19   : > { %205 = vst [vmem:[%s184_s7 + $0x10] sm:$0xff] (%p68_p3), %v204_v2  ;;  %v208_v4 = vld [vmem:[%s187_s6 + $0x40] sm:$0xff] (%p68_p3)  ;;  %v210_v5 = vld [vmem:[%s187_s6 + $0x48] sm:$0xff] (%p68_p3)  ;;  %207 = vst [vmem:[%s184_s7 + $0x18] sm:$0xff] (%p68_p3), %v206_v3 }
  0x1a   : > { %209 = vst [vmem:[%s184_s7 + $0x20] sm:$0xff] (%p68_p3), %v208_v4  ;;  %211 = vst [vmem:[%s184_s7 + $0x28] sm:$0xff] (%p68_p3), %v210_v5  ;;  %v212_v6 = vld [vmem:[%s187_s6 + $0x60] sm:$0xff] (%p68_p3)  ;;  %v214_v7 = vld [vmem:[%s187_s6 + $0x68] sm:$0xff] (%p68_p3) }
  0x1b   : > { %213 = vst [vmem:[%s184_s7 + $0x30] sm:$0xff] %v212_v6  ;;  %215 = vst [vmem:[%s184_s7 + $0x38] sm:$0xff] %v214_v7 }
  0x1c PF: > { %p1384_p7 = scmp.ge.s32.totalorder %s1591_s21, 1  ;;  %p229_p8 = scmp.lt.s32.totalorder %s1591_s21, 5 }
  0x1e   : > { %p230_p9 = pnand %p1384_p7, %p229_p8 }
  0x20   : > { %233 = sbr.rel (%p230_p9) target bundleno = 837 (0x345), region = 55 }
  0x27   : > { %s236_s8 = sand.u32 1, %s1567_s15   ;;  %s1386_s9 = sshll.u32 %s1579_s18, 3 }
  0x28   : > { %s1385_s10 = sshll.u32 %s236_s8, 6  ;;  %p271_p10 = scmp.lt.s32.totalorder %s1386_s9, 15 }
  0x29   : > { %s1388_s11 = sshll.u32 %s1575_s17, 1  ;;  %p283_p12 = scmp.lt.s32.totalorder %s1579_s18, 1 }
  0x2a   : > { %s2789_s9 = smov (!%p271_p10, %s1386_s9), 15  ;;  %p278_p11 = scmp.lt.s32.totalorder %s1388_s11, 3 }
  0x2b   : > { %s1387_s12 = sshll.u32 %s2789_s9, 3  ;;  %s2793_s18 = smov (!%p283_p12, %s1579_s18), 1 }
  0x2c   : > { %s1686_s24 = scalar_lea.vmem %s2606_s0, %s1387_s12  ;;  %s2791_s11 = smov (!%p278_p11, %s1388_s11), 3 }
  0x2d   : > { %s1389_s25 = sshll.u32 %s2791_s11, 1  ;;  %s1390_s29 = sshll.u32 %s2793_s18, 3 }
  0x2e   : > { %s1692_s15 = scalar_lea.vmem %s2608_s2, %s1389_s25  ;;  %s1697_s6 = scalar_lea.vmem %s2610_s4, %s1390_s29 }
  0x2f   : > { %s238_s7 = scalar_lea.vmem [#allocation3], %s1385_s10  ;;  %p1391_p13 = scmp.ne.s32.totalorder %s1575_s17, 0 }
  0x30   : > { %v1593_v8 = vmov (!%p1391_p13), 0.0  }
  0x31   : > { %290 = sbr.rel (%p1391_p13) target bundleno = 56 (0x38), region = 63  ;;  %291 = vst [vmem:[#allocation2] sm:$0xff] (!%p1391_p13), %v1593_v8  ;;  %292 = vst [vmem:[#allocation2 + $0x8] sm:$0xff] (!%p1391_p13), %v1593_v8 }
  0x38 PF: > { %v302_v9 = vld [vmem:[%s238_s7 + $0x8] sm:$0xff]  ;;  %v304_v10 = vld [vmem:[%s238_s7 + $0x18] sm:$0xff]  ;;  %v301_v11 = vld [vmem:[%s238_s7] sm:$0xff]  ;;  %v2611_v16 = vmov 0.0   ;;  %vm309_vm0 = vcmask 261120   ;;  %p1403_p0 = scmp.ne.s32.totalorder %s1575_s17, 1 }
  0x39   : > { %v1407_v12 = vpack.c.bf16 %v304_v10, %v302_v9  ;;  %v303_v13 = vld [vmem:[%s238_s7 + $0x10] sm:$0xff]  ;;  %v306_v14 = vld [vmem:[%s238_s7 + $0x28] sm:$0xff]  ;;  %v308_v15 = vld [vmem:[%s238_s7 + $0x38] sm:$0xff]  ;;  %398 = vmatprep.mubr.f32.mxu0 %v2611_v16  ;;  %1156 = vmatprep.mubr.f32.mxu1 %v2611_v16 }
  0x3a   : > { %v1409_v17 = vpack.c.bf16 %v303_v13, %v301_v11  ;;  %v1411_v18 = vpack.c.bf16 %v308_v15, %v306_v14  ;;  %v305_v19 = vld [vmem:[%s238_s7 + $0x20] sm:$0xff]  ;;  %v307_v20 = vld [vmem:[%s238_s7 + $0x30] sm:$0xff]  ;;  %v294_v23 = vld [vmem:[%s1686_s24 + $0x8] sm:$0xff] }
  0x3b   : > { %1408 = vmatprep.subr.bf16.mxu0 %v1407_v12  ;;  %v1413_v21 = vpack.c.bf16 %v307_v20, %v305_v19  ;;  %v293_v22 = vld [vmem:[%s1686_s24] sm:$0xff]  ;;  %v295_v24 = vld [vmem:[%s1686_s24 + $0x10] sm:$0xff]  ;;  %v296_v25 = vld [vmem:[%s1686_s24 + $0x18] sm:$0xff] }
  0x3c   : > { %1410 = vmatpush1.bf16.msra.mxu0 %v1409_v17  ;;  %v297_v26 = vld [vmem:[%s1686_s24 + $0x20] sm:$0xff]  ;;  %v298_v27 = vld [vmem:[%s1686_s24 + $0x28] sm:$0xff]  ;;  %v299_v28 = vld [vmem:[%s1686_s24 + $0x30] sm:$0xff] }
  0x3d   : > { %1412 = vmatprep.subr.bf16.mxu0 %v1411_v18  ;;  %v300_v29 = vld [vmem:[%s1686_s24 + $0x38] sm:$0xff] }
  0x40   : > { %1414 = vmatpush1.bf16.msra.mxu0 %v1413_v21 }
  0x43   : > { %1392 = vmatmul.mubr.msk.f32.vlgmr.msra.gmra.mrb[0].mxu0 %vm309_vm0, %v293_v22 }
  0x44   : > { %404 = vmatprep.mubr.f32.mxu0 %v2611_v16 }
  0x47   : > { %1393 = vmatmul.mubr.msk.f32.gmra.mrb[2].mxu0 %vm309_vm0, %v294_v23 }
  0x48   : > { %410 = vmatprep.mubr.f32.mxu0 %v2611_v16 }
  0x4b   : > { %1394 = vmatmul.mubr.msk.f32.gmra.mrb[4].mxu0 %vm309_vm0, %v295_v24 }
  0x4c   : > { %416 = vmatprep.mubr.f32.mxu0 %v2611_v16 }
  0x4f   : > { %1395 = vmatmul.mubr.msk.f32.gmra.mrb[6].mxu0 %vm309_vm0, %v296_v25 }
  0x50   : > { %422 = vmatprep.mubr.f32.mxu0 %v2611_v16 }
  0x53   : > { %1396 = vmatmul.mubr.msk.f32.gmra.mrb[8].mxu0 %vm309_vm0, %v297_v26 }
  0x54   : > { %428 = vmatprep.mubr.f32.mxu0 %v2611_v16 }
  0x57   : > { %1397 = vmatmul.mubr.msk.f32.gmra.mrb[10].mxu0 %vm309_vm0, %v298_v27 }
  0x58   : > { %434 = vmatprep.mubr.f32.mxu0 %v2611_v16 }
  0x5b   : > { %1398 = vmatmul.mubr.msk.f32.gmra.mrb[12].mxu0 %vm309_vm0, %v299_v28 }
  0x5c   : > { %440 = vmatprep.mubr.f32.mxu0 %v2611_v16 }
  0x5f   : > { %1399 = vmatmul.mubr.msk.f32.gmra.mrb[14].mxu0 %vm309_vm0, %v300_v29 }
 0x116   : > { %v400_v30 = vpop.f32.mrb[0].mxu0 }
 0x117   : > { %v447_v31 = vmul.f32 0.63661975, %v400_v30  ;;  %v402_v32 = vpop.f32.mrb[1].mxu0 }
 0x118   : > { %v448_v33 = vmul.f32 0.63661975, %v402_v32 }
 0x119   : > { %v463_v34 = vadd.f32 0.5, %v447_v31 }
 0x11a   : > { %v464_v35 = vadd.f32 0.5, %v448_v33  ;;  %v1725_v36 = vpop.f32.mrb[2].mxu0 }
 0x11b   : > { %v1727_v37 = vfloor.f32 %v463_v34  ;;  %v449_v38 = vmul.f32 0.63661975, %v1725_v36  ;;  %v1730_v39 = vpop.f32.mrb[3].mxu0 }
 0x11c   : > { %v1732_v40 = vfloor.f32 %v464_v35  ;;  %v450_v41 = vmul.f32 0.63661975, %v1730_v39 }
 0x11d   : > { %v495_v42 = vmul.f32 1.5703125, %v1727_v37  ;;  %v465_v43 = vadd.f32 0.5, %v449_v38  ;;  %v527_v57 = vmul.f32 0.0004837513, %v1727_v37  ;;  %v559_v61 = vmul.f32 7.54979e-08, %v1727_v37 }
 0x11e   : > { %v466_v44 = vadd.f32 0.5, %v450_v41  ;;  %v412_v45 = vpop.f32.mrb[4].mxu0  ;;  %v496_v48 = vmul.f32 1.5703125, %v1732_v40  ;;  %v528_v1 = vmul.f32 0.0004837513, %v1732_v40  ;;  %v560_v5 = vmul.f32 7.54979e-08, %v1732_v40 }
 0x11f   : > { %v451_v46 = vmul.f32 0.63661975, %v412_v45  ;;  %v414_v47 = vpop.f32.mrb[5].mxu0  ;;  %v511_v50 = vsub.f32 %v400_v30, %v495_v42  ;;  %v1737_v51 = vfloor.f32 %v465_v43 }
 0x120   : > { %v452_v49 = vmul.f32 0.63661975, %v414_v47  ;;  %v1739_v52 = vfloor.f32 %v466_v44  ;;  %v512_v58 = vsub.f32 %v402_v32, %v496_v48 }
 0x121   : > { %v467_v54 = vadd.f32 0.5, %v451_v46  ;;  %v543_v0 = vsub.f32 %v511_v50, %v527_v57  ;;  %v497_v2 = vmul.f32 1.5703125, %v1737_v51  ;;  %v529_v10 = vmul.f32 0.0004837513, %v1737_v51 }
 0x122   : > { %v1741_v53 = vpop.f32.mrb[6].mxu0  ;;  %v468_v55 = vadd.f32 0.5, %v452_v49  ;;  %v498_v3 = vmul.f32 1.5703125, %v1739_v52  ;;  %v544_v9 = vsub.f32 %v512_v58, %v528_v1  ;;  %v561_v11 = vmul.f32 7.54979e-08, %v1737_v51 }
 0x123   : > { %v1743_v56 = vpop.f32.mrb[7].mxu0  ;;  %v453_v59 = vmul.f32 0.63661975, %v1741_v53  ;;  %v1749_v62 = vfloor.f32 %v467_v54  ;;  %v530_v13 = vmul.f32 0.0004837513, %v1739_v52  ;;  %v1767_v18 = vsub.f32 %v543_v0, %v559_v61 }
 0x124   : > { %v454_v60 = vmul.f32 0.63661975, %v1743_v56  ;;  %v1751_v63 = vfloor.f32 %v468_v55  ;;  %v513_v19 = vsub.f32 %v1725_v36, %v497_v2  ;;  %v514_v20 = vsub.f32 %v1730_v39, %v498_v3 }
 0x125   : > { %v499_v6 = vmul.f32 1.5703125, %v1749_v62  ;;  %v469_v7 = vadd.f32 0.5, %v453_v59  ;;  %v531_v15 = vmul.f32 0.0004837513, %v1749_v62  ;;  %v563_v21 = vmul.f32 7.54979e-08, %v1749_v62 }
 0x126   : > { %v1756_v4 = vpop.f32.mrb[8].mxu0  ;;  %v470_v12 = vadd.f32 0.5, %v454_v60  ;;  %v500_v17 = vmul.f32 1.5703125, %v1751_v63  ;;  %v532_v25 = vmul.f32 0.0004837513, %v1751_v63  ;;  %v1779_v28 = vsub.f32 %v544_v9, %v560_v5 }
 0x127   : > { %v1760_v8 = vpop.f32.mrb[9].mxu0  ;;  %v515_v14 = vsub.f32 %v412_v45, %v499_v6  ;;  %v1775_v26 = vfloor.f32 %v469_v7  ;;  %v562_v29 = vmul.f32 7.54979e-08, %v1739_v52  ;;  %v455_v31 = vmul.f32 0.63661975, %v1756_v4 }
 0x128   : > { %v516_v24 = vsub.f32 %v414_v47, %v500_v17  ;;  %v1782_v30 = vfloor.f32 %v470_v12  ;;  %v564_v34 = vmul.f32 7.54979e-08, %v1751_v63  ;;  %v1791_v36 = vmul.f32 %v1767_v18, %v1767_v18 }
 0x129   : > { %v547_v23 = vsub.f32 %v515_v14, %v531_v15  ;;  %v501_v35 = vmul.f32 1.5703125, %v1775_v26  ;;  %v545_v38 = vsub.f32 %v513_v19, %v529_v10  ;;  %v546_v39 = vsub.f32 %v514_v20, %v530_v13 }
 0x12a   : > { %v1772_v22 = vpop.f32.mrb[10].mxu0  ;;  %v548_v33 = vsub.f32 %v516_v24, %v532_v25  ;;  %v502_v41 = vmul.f32 1.5703125, %v1782_v30  ;;  %v533_v46 = vmul.f32 0.0004837513, %v1775_v26  ;;  %v1808_v48 = vmul.f32 %v1779_v28, %v1779_v28 }
 0x12b   : > { %v1777_v27 = vpop.f32.mrb[11].mxu0  ;;  %v1785_v32 = vsub.f32 %v547_v23, %v563_v21  ;;  %v517_v45 = vsub.f32 %v1741_v53, %v501_v35  ;;  %v534_v50 = vmul.f32 0.0004837513, %v1782_v30  ;;  %v471_v54 = vadd.f32 0.5, %v455_v31 }
 0x12c   : > { %v1800_v44 = vsub.f32 %v548_v33, %v564_v34  ;;  %v518_v49 = vsub.f32 %v1743_v56, %v502_v41  ;;  %v565_v58 = vmul.f32 7.54979e-08, %v1775_v26  ;;  %v1818_v59 = vsub.f32 %v545_v38, %v561_v11 }
 0x12d   : > { %v1798_v43 = vmul.f32 %v1785_v32, %v1785_v32  ;;  %v549_v53 = vsub.f32 %v517_v45, %v533_v46  ;;  %v1820_v61 = vfloor.f32 %v471_v54  ;;  %v456_v0 = vmul.f32 0.63661975, %v1760_v8 }
 0x12e   : > { %v1794_v42 = vpop.f32.mrb[12].mxu0  ;;  %v1815_v57 = vmul.f32 %v1800_v44, %v1800_v44  ;;  %v550_v60 = vsub.f32 %v518_v49, %v534_v50  ;;  %v1825_v1 = vsub.f32 %v546_v39, %v562_v29  ;;  %v566_v5 = vmul.f32 7.54979e-08, %v1782_v30 }
 0x12f   : > { %v1804_v47 = vpop.f32.mrb[13].mxu0  ;;  %v755_v55 = vmul.f32 -0.00019515296, %v1798_v43  ;;  %v1828_v3 = vsub.f32 %v549_v53, %v565_v58  ;;  %v503_v9 = vmul.f32 1.5703125, %v1820_v61  ;;  %v1455_v12 = vtrunc.f32 %v1749_v62 }
 0x130   : > { %v756_v2 = vmul.f32 -0.00019515296, %v1815_v57  ;;  %v1841_v14 = vsub.f32 %v550_v60, %v566_v5  ;;  %v535_v15 = vmul.f32 0.0004837513, %v1820_v61  ;;  %v472_v20 = vadd.f32 0.5, %v456_v0 }
 0x131   : > { %v771_v7 = vadd.f32 0.008332161, %v755_v55  ;;  %v1839_v13 = vmul.f32 %v1828_v3, %v1828_v3  ;;  %v519_v19 = vsub.f32 %v1756_v4, %v503_v9  ;;  %v457_v21 = vmul.f32 0.63661975, %v1772_v22 }
 0x132   : > { %v1823_v56 = vpop.f32.mrb[14].mxu0  ;;  %v772_v17 = vadd.f32 0.008332161, %v756_v2  ;;  %v1848_v23 = vmul.f32 %v1791_v36, %v1767_v18  ;;  %v1852_v62 = vmul.f32 %v1808_v48, %v1779_v28  ;;  %v1856_v24 = vmul.f32 %v1818_v59, %v1818_v59 }
 0x133   : > { %v1831_v6 = vpop.f32.mrb[15].mxu0  ;;  %2646 = vst [vmem:[#allocation4_spill] sm:$0xff] %v1839_v13  ;;  %v1860_v25 = vmul.f32 %v1825_v1, %v1825_v1  ;;  %v787_v4 = vmul.f32 %v771_v7, %v1798_v43  ;;  %v1457_v29 = vtrunc.f32 %v1751_v63  ;;  %v1459_v31 = vtrunc.f32 %v1775_v26 }
 0x134   : > { %v551_v33 = vsub.f32 %v519_v19, %v535_v15  ;;  %v757_v34 = vmul.f32 -0.00019515296, %v1839_v13  ;;  %v1868_v35 = vmul.f32 %v1841_v14, %v1841_v14  ;;  %v567_v38 = vmul.f32 7.54979e-08, %v1820_v61 }
 0x135   : > { %v1871_v39 = vfloor.f32 %v472_v20  ;;  %v1873_v41 = vcvt.f32.s32 %v1455_v12  ;;  %v788_v45 = vmul.f32 %v772_v17, %v1815_v57  ;;  %v1461_v46 = vtrunc.f32 %v1782_v30 }
 0x136   : > { %v473_v63 = vadd.f32 0.5, %v457_v21  ;;  %v1879_v26 = vmul.f32 %v1856_v24, %v1818_v59  ;;  %v1881_v49 = vsub.f32 %v551_v33, %v567_v38  ;;  %v458_v54 = vmul.f32 0.63661975, %v1777_v27 }
 0x137   : > { %v504_v50 = vmul.f32 1.5703125, %v1871_v39  ;;  %v1887_v55 = vmul.f32 %v1860_v25, %v1825_v1  ;;  %v803_v53 = vadd.f32 -0.16666655, %v787_v4  ;;  %v1889_v58 = vcvt.f32.s32 %v1457_v29 }
 0x138   : > { %v1891_v60 = vcvt.f32.s32 %v1459_v31  ;;  %v773_v30 = vadd.f32 0.008332161, %v757_v34  ;;  %v758_v0 = vmul.f32 -0.00019515296, %v1868_v35  ;;  %v536_v5 = vmul.f32 0.0004837513, %v1871_v39 }
 0x139   : > { %v520_v2 = vsub.f32 %v1760_v8, %v504_v50  ;;  %v739_v7 = vmul.f32 %v1798_v43, %v1785_v32  ;;  %v804_v9 = vadd.f32 -0.16666655, %v788_v45  ;;  %v1898_v12 = vcvt.f32.s32 %v1461_v46 }
 0x13a   : > { %2647 = vst [vmem:[#allocation5_spill] sm:$0xff] %v1891_v60  ;;  %v1900_v15 = vfloor.f32 %v473_v63  ;;  %v1904_v17 = vmul.f32 %v1881_v49, %v1881_v49  ;;  %v568_v20 = vmul.f32 7.54979e-08, %v1871_v39  ;;  %v474_v21 = vadd.f32 0.5, %v458_v54 }
 0x13b   : > { %v552_v19 = vsub.f32 %v520_v2, %v536_v5  ;;  %v740_v8 = vmul.f32 %v1815_v57, %v1800_v44  ;;  %v741_v4 = vmul.f32 %v1839_v13, %v1828_v3  ;;  %v1463_v29 = vtrunc.f32 %v1820_v61 }
 0x13c   : > { %2648 = vst [vmem:[#allocation6_spill] sm:$0xff] %v1904_v17  ;;  %v505_v31 = vmul.f32 1.5703125, %v1900_v15  ;;  %v819_v33 = vmul.f32 %v803_v53, %v739_v7  ;;  %v789_v34 = vmul.f32 %v773_v30, %v1839_v13  ;;  %v774_v38 = vadd.f32 0.008332161, %v758_v0 }
 0x13d   : > { %v1914_v45 = vsub.f32 %v552_v19, %v568_v20  ;;  %v742_v46 = vmul.f32 %v1868_v35, %v1841_v14  ;;  %v537_v50 = vmul.f32 0.0004837513, %v1900_v15  ;;  %v1920_v54 = vfloor.f32 %v474_v21 }
 0x13e   : > { %v521_v63 = vsub.f32 %v1772_v22, %v505_v31  ;;  %v820_v2 = vmul.f32 %v804_v9, %v740_v8  ;;  %v759_v61 = vmul.f32 -0.00019515296, %v1904_v17  ;;  %v459_v5 = vmul.f32 0.63661975, %v1794_v42 }
 0x13f   : > { %v460_v53 = vmul.f32 0.63661975, %v1804_v47  ;;  %v1925_v30 = vcvt.f32.s32 %v1463_v29  ;;  %v569_v7 = vmul.f32 7.54979e-08, %v1900_v15  ;;  %v506_v19 = vmul.f32 1.5703125, %v1920_v54 }
 0x140   : > { %v553_v0 = vsub.f32 %v521_v63, %v537_v50  ;;  %v1930_v22 = vadd.f32 %v819_v33, %v1785_v32  ;;  %v805_v20 = vadd.f32 -0.16666655, %v789_v34  ;;  %v790_v21 = vmul.f32 %v774_v38, %v1868_v35 }
 0x141   : > { %2649 = vst [vmem:[#allocation7_spill] sm:$0xff] %v1925_v30  ;;  %v1935_v9 = vmul.f32 %v1914_v45, %v1914_v45  ;;  %v522_v29 = vsub.f32 %v1777_v27, %v506_v19  ;;  %v538_v31 = vmul.f32 0.0004837513, %v1920_v54  ;;  %v475_v63 = vadd.f32 0.5, %v459_v5 }
 0x142   : > { %2650 = vst [vmem:[#allocation8_spill] sm:$0xff] %v1930_v22  ;;  %v1937_v8 = vsub.f32 %v553_v0, %v569_v7  ;;  %v1942_v50 = vadd.f32 %v820_v2, %v1800_v44  ;;  %v775_v16 = vadd.f32 0.008332161, %v759_v61  ;;  %v476_v32 = vadd.f32 0.5, %v460_v53 }
 0x143   : > { %v461_v33 = vmul.f32 0.63661975, %v1823_v56  ;;  %v554_v38 = vsub.f32 %v522_v29, %v538_v31  ;;  %v570_v0 = vmul.f32 7.54979e-08, %v1920_v54  ;;  %v1950_v7 = vfloor.f32 %v475_v63 }
 0x144   : > { %2651 = vst [vmem:[#allocation9_spill] sm:$0xff] %v1942_v50  ;;  %v1947_v34 = vmul.f32 %v1937_v8, %v1937_v8  ;;  %v821_v27 = vmul.f32 %v805_v20, %v741_v4  ;;  %v806_v19 = vadd.f32 -0.16666655, %v790_v21  ;;  %v1465_v5 = vtrunc.f32 %v1871_v39 }
 0x145   : > { %v1953_v11 = vfloor.f32 %v476_v32  ;;  %v743_v44 = vmul.f32 %v1904_v17, %v1881_v49  ;;  %v760_v2 = vmul.f32 -0.00019515296, %v1935_v9  ;;  %v1958_v61 = vsub.f32 %v554_v38, %v570_v0 }
 0x146   : > { %v507_v53 = vmul.f32 1.5703125, %v1950_v7  ;;  %v791_v29 = vmul.f32 %v775_v16, %v1904_v17  ;;  %v761_v31 = vmul.f32 -0.00019515296, %v1947_v34  ;;  %v477_v63 = vadd.f32 0.5, %v461_v33 }
 0x147   : > { %v462_v4 = vmul.f32 0.63661975, %v1831_v6  ;;  %v1966_v39 = vmul.f32 %v1958_v61, %v1958_v61  ;;  %v539_v21 = vmul.f32 0.0004837513, %v1950_v7  ;;  %v508_v32 = vmul.f32 1.5703125, %v1953_v11 }
 0x148   : > { %v523_v20 = vsub.f32 %v1794_v42, %v507_v53  ;;  %v1972_v38 = vadd.f32 %v821_v27, %v1828_v3  ;;  %v822_v0 = vmul.f32 %v806_v19, %v742_v46  ;;  %v1974_v16 = vcvt.f32.s32 %v1465_v5 }
 0x149   : > { %v1467_v33 = vtrunc.f32 %v1900_v15  ;;  %v776_v10 = vadd.f32 0.008332161, %v760_v2  ;;  %v762_v17 = vmul.f32 -0.00019515296, %v1966_v39  ;;  %v571_v22 = vmul.f32 7.54979e-08, %v1950_v7 }
 0x14a   : > { %2652 = vst [vmem:[#allocation10_spill] sm:$0xff] %v1972_v38  ;;  %2653 = vst [vmem:[#allocation11_spill] sm:$0xff] %v1974_v16  ;;  %v555_v30 = vsub.f32 %v523_v20, %v539_v21  ;;  %v807_v50 = vadd.f32 -0.16666655, %v791_v29  ;;  %v524_v42 = vsub.f32 %v1804_v47, %v508_v32  ;;  %v540_v53 = vmul.f32 0.0004837513, %v1953_v11 }
 0x14b   : > { %v1981_v13 = vfloor.f32 %v477_v63  ;;  %v777_v3 = vadd.f32 0.008332161, %v761_v31  ;;  %v778_v27 = vadd.f32 0.008332161, %v762_v17  ;;  %v478_v19 = vadd.f32 0.5, %v462_v4 }
 0x14c   : > { %v1983_v46 = vsub.f32 %v555_v30, %v571_v22  ;;  %v1986_v15 = vadd.f32 %v822_v0, %v1841_v14  ;;  %v556_v5 = vsub.f32 %v524_v42, %v540_v53  ;;  %v572_v2 = vmul.f32 7.54979e-08, %v1953_v11 }
 0x14d   : > { %v509_v20 = vmul.f32 1.5703125, %v1981_v13  ;;  %v792_v29 = vmul.f32 %v776_v10, %v1935_v9  ;;  %v1991_v47 = vcvt.f32.s32 %v1467_v33  ;;  %v1469_v63 = vtrunc.f32 %v1920_v54 }
 0x14e   : > { %v1996_v17 = vmul.f32 %v1983_v46, %v1983_v46  ;;  %v1998_v30 = vsub.f32 %v556_v5, %v572_v2  ;;  %v541_v22 = vmul.f32 0.0004837513, %v1981_v13  ;;  %v494_v31 = vfloor.f32 %v478_v19 }
 0x14f   : > { %2654 = vst [vmem:[#allocation12_spill] sm:$0xff] %v1991_v47  ;;  %v525_v14 = vsub.f32 %v1823_v56, %v509_v20  ;;  %v823_v4 = vmul.f32 %v807_v50, %v743_v44  ;;  %v793_v21 = vmul.f32 %v777_v3, %v1947_v34  ;;  %v794_v10 = vmul.f32 %v778_v27, %v1966_v39 }
 0x150   : > { %2655 = vst [vmem:[#allocation13_spill] sm:$0xff] %v1996_v17  ;;  %v763_v32 = vmul.f32 -0.00019515296, %v1996_v17  ;;  %v2007_v54 = vmul.f32 %v1998_v30, %v1998_v30  ;;  %v573_v33 = vmul.f32 7.54979e-08, %v1981_v13  ;;  %v510_v42 = vmul.f32 1.5703125, %v494_v31 }
 0x151   : > { %v557_v0 = vsub.f32 %v525_v14, %v541_v22  ;;  %v744_v56 = vmul.f32 %v1935_v9, %v1914_v45  ;;  %v808_v53 = vadd.f32 -0.16666655, %v792_v29  ;;  %v2012_v19 = vcvt.f32.s32 %v1469_v63 }
 0x152   : > { %v779_v50 = vadd.f32 0.008332161, %v763_v32  ;;  %v764_v44 = vmul.f32 -0.00019515296, %v2007_v54  ;;  %v526_v27 = vsub.f32 %v1831_v6, %v510_v42  ;;  %v542_v5 = vmul.f32 0.0004837513, %v494_v31 }
 0x153   : > { %2656 = vst [vmem:[#allocation14_spill] sm:$0xff] %v2012_v19  ;;  %v2015_v3 = vsub.f32 %v557_v0, %v573_v33  ;;  %v2019_v2 = vadd.f32 %v823_v4, %v1881_v49  ;;  %v809_v20 = vadd.f32 -0.16666655, %v793_v21  ;;  %v810_v14 = vadd.f32 -0.16666655, %v794_v10 }
 0x154   : > { %v1471_v22 = vtrunc.f32 %v1950_v7  ;;  %v780_v47 = vadd.f32 0.008332161, %v764_v44  ;;  %v558_v63 = vsub.f32 %v526_v27, %v542_v5  ;;  %v574_v32 = vmul.f32 7.54979e-08, %v494_v31 }
 0x155   : > { %v2024_v29 = vmul.f32 %v2015_v3, %v2015_v3  ;;  %v824_v38 = vmul.f32 %v808_v53, %v744_v56  ;;  %v745_v0 = vmul.f32 %v1947_v34, %v1937_v8  ;;  %v795_v6 = vmul.f32 %v779_v50, %v1996_v17 }
 0x156   : > { %v1473_v49 = vtrunc.f32 %v1953_v11  ;;  %v746_v4 = vmul.f32 %v1966_v39, %v1958_v61  ;;  %v2033_v21 = vsub.f32 %v558_v63, %v574_v32  ;;  %v2657_v10 = vtrunc.f32 %v1732_v40 }
 0x157   : > { %v765_v7 = vmul.f32 -0.00019515296, %v2024_v29  ;;  %v825_v42 = vmul.f32 %v809_v20, %v745_v0  ;;  %v2039_v56 = vcvt.f32.s32 %v1471_v22  ;;  %v796_v53 = vmul.f32 %v780_v47, %v2007_v54 }
 0x158   : > { %v2037_v33 = vcvt.f32.s32 %v2657_v10  ;;  %v1453_v50 = vtrunc.f32 %v1739_v52  ;;  %v826_v44 = vmul.f32 %v810_v14, %v746_v4  ;;  %v1475_v11 = vtrunc.f32 %v1981_v13 }
 0x159   : > { %2659 = vst [vmem:[#allocation16_spill] sm:$0xff] %v2039_v56  ;;  %v2046_v27 = vmul.f32 %v2033_v21, %v2033_v21  ;;  %v752_v5 = vmul.f32 -0.00019515296, %v1808_v48  ;;  %v2050_v40 = vadd.f32 %v824_v38, %v1914_v45  ;;  %v811_v63 = vadd.f32 -0.16666655, %v795_v6 }
 0x15a   : > { %2658 = vst [vmem:[#allocation15_spill] sm:$0xff] %v2037_v33  ;;  %v2052_v20 = vcvt.f32.s32 %v1473_v49  ;;  %v781_v22 = vadd.f32 0.008332161, %v765_v7  ;;  %v747_v47 = vmul.f32 %v1996_v17, %v1983_v46  ;;  %v1477_v52 = vtrunc.f32 %v494_v31 }
 0x15b   : > { %v766_v14 = vmul.f32 -0.00019515296, %v2046_v27  ;;  %v672_v13 = vadd.s32 1, %v2037_v33  ;;  %v812_v32 = vadd.f32 -0.16666655, %v796_v53  ;;  %v2058_v0 = vcvt.f32.s32 %v1453_v50 }
 0x15c   : > { %2660 = vst [vmem:[#allocation17_spill] sm:$0xff] %v2052_v20  ;;  %v754_v4 = vmul.f32 -0.00019515296, %v1860_v25  ;;  %v768_v10 = vadd.f32 0.008332161, %v752_v5  ;;  %v2062_v45 = vadd.f32 %v825_v42, %v1937_v8  ;;  %v2065_v38 = vadd.f32 %v826_v44, %v1958_v61 }
 0x15d   : > { %2661 = vst [vmem:[#allocation18_spill] sm:$0xff] %v2058_v0  ;;  %v748_v6 = vmul.f32 %v2007_v54, %v1998_v30  ;;  %v2069_v31 = vcvt.f32.s32 %v1475_v11  ;;  %v827_v49 = vmul.f32 %v811_v63, %v747_v47  ;;  %v797_v7 = vmul.f32 %v781_v22, %v2024_v29 }
 0x15e   : > { %v770_v53 = vadd.f32 0.008332161, %v754_v4  ;;  %v784_v50 = vmul.f32 %v768_v10, %v1808_v48  ;;  %v2073_v17 = vcvt.f32.s32 %v1477_v52  ;;  %v782_v5 = vadd.f32 0.008332161, %v766_v14 }
 0x15f   : > { %2662 = vst [vmem:[#allocation19_spill] sm:$0xff] %v2069_v31  ;;  %v608_v8 = vand.u32 1, %v2037_v33  ;;  %v688_v42 = vand.u32 2, %v672_v13  ;;  %v828_v56 = vmul.f32 %v812_v32, %v748_v6  ;;  %v610_v61 = vand.u32 1, %v2058_v0 }
 0x160   : > { %2663 = vst [vmem:[#allocation20_spill] sm:$0xff] %v2073_v17  ;;  %v674_v44 = vadd.s32 1, %v2058_v0  ;;  %v786_v11 = vmul.f32 %v770_v53, %v1860_v25  ;;  %v749_v63 = vmul.f32 %v2024_v29, %v2015_v3  ;;  %v800_v22 = vadd.f32 -0.16666655, %v784_v50 }
 0x161   : > { %v896_v47 = vmul.f32 2.4433157e-05, %v1808_v48  ;;  %v898_v52 = vmul.f32 2.4433157e-05, %v1860_v25  ;;  %v2084_v14 = vadd.f32 %v827_v49, %v1983_v46  ;;  %v813_v4 = vadd.f32 -0.16666655, %v797_v7 }
 0x162   : > { %v802_v13 = vadd.f32 -0.16666655, %v786_v11  ;;  %v848_v32 = vmul.f32 0.5, %v1808_v48  ;;  %v750_v10 = vmul.f32 %v2046_v27, %v2033_v21  ;;  %v798_v6 = vmul.f32 %v782_v5, %v2046_v27 }
 0x163   : > { %2664 = vst [vmem:[#allocation21_spill] sm:$0xff] %v2084_v14  ;;  %v912_v53 = vadd.f32 -0.0013887316, %v896_v47  ;;  %v914_v0 = vadd.f32 -0.0013887316, %v898_v52  ;;  %v2091_v50 = vadd.f32 %v828_v56, %v1998_v30  ;;  %vm2093_vm1 = vcmp.eq.s32.totalorder %v608_v8, 1 }
 0x164   : > { %vm2097_vm2 = vcmp.eq.s32.totalorder %v610_v61, 1  ;;  %v690_v49 = vand.u32 2, %v674_v44  ;;  %v850_v7 = vmul.f32 0.5, %v1860_v25  ;;  %v751_v11 = vmul.f32 -0.00019515296, %v1791_v36 }
 0x165   : > { %2665 = vst [vmem:[#allocation22_spill] sm:$0xff] %v2091_v50  ;;  %v816_v5 = vmul.f32 %v800_v22, %v1852_v62  ;;  %v818_v47 = vmul.f32 %v802_v13, %v1887_v55  ;;  %v928_v30 = vmul.f32 %v912_v53, %v1808_v48  ;;  %v930_v56 = vmul.f32 %v914_v0, %v1860_v25 }
 0x166   : > { %v829_v8 = vmul.f32 %v813_v4, %v749_v63  ;;  %v864_v52 = vsub.f32 1.0, %v848_v32  ;;  %v880_v61 = vmul.f32 %v1808_v48, %v1808_v48  ;;  %v1451_v14 = vtrunc.f32 %v1737_v51 }
 0x167   : > { %v814_v44 = vadd.f32 -0.16666655, %v798_v6  ;;  %vm2110_vm3 = vcmp.eq.s32.totalorder %v688_v42, 2  ;;  %v882_v62 = vmul.f32 %v1860_v25, %v1860_v25  ;;  %v944_v55 = vadd.f32 0.041666646, %v928_v30 }
 0x168   : > { %v946_v22 = vadd.f32 0.041666646, %v930_v56  ;;  %v866_v13 = vsub.f32 1.0, %v850_v7  ;;  %v2672_v0 = vtrunc.f32 %v1727_v37  ;;  %v753_v4 = vmul.f32 -0.00019515296, %v1856_v24 }
 0x169   : > { %v767_v48 = vadd.f32 0.008332161, %v751_v11  ;;  %v2122_v51 = vadd.f32 %v816_v5, %v1779_v28  ;;  %v2125_v42 = vadd.f32 %v818_v47, %v1825_v1  ;;  %v960_v32 = vmul.f32 %v944_v55, %v880_v61 }
 0x16a   : > { %v2118_v63 = vcvt.f32.s32 %v2672_v0  ;;  %v962_v6 = vmul.f32 %v946_v22, %v882_v62  ;;  %vm2127_vm4 = vcmp.eq.s32.totalorder %v690_v49, 2  ;;  %v2131_v53 = vcvt.f32.s32 %v1451_v14 }
 0x16b   : > { %v769_v37 = vadd.f32 0.008332161, %v753_v4  ;;  %v783_v7 = vmul.f32 %v767_v48, %v1791_v36  ;;  %v2135_v30 = vadd.f32 %v829_v8, %v2015_v3  ;;  %v830_v11 = vmul.f32 %v814_v44, %v750_v10 }
 0x16c   : > { %v2137_v28 = vadd.f32 %v960_v32, %v864_v52  ;;  %v2139_v5 = vadd.f32 %v962_v6, %v866_v13  ;;  %v607_v1 = vand.u32 1, %v2118_v63  ;;  %v895_v56 = vmul.f32 2.4433157e-05, %v1791_v36 }
 0x16d   : > { %2675 = vst [vmem:[#allocation23_spill] sm:$0xff] %v2135_v30  ;;  %v785_v49 = vmul.f32 %v769_v37, %v1856_v24  ;;  %v799_v47 = vadd.f32 -0.16666655, %v783_v7  ;;  %v671_v10 = vadd.s32 1, %v2118_v63  ;;  %v897_v8 = vmul.f32 2.4433157e-05, %v1856_v24 }
 0x16e   : > { %v1008_v14 = vsel %vm2093_vm1, %v2122_v51, %v2137_v28  ;;  %v1010_v3 = vsel %vm2097_vm2, %v2125_v42, %v2139_v5  ;;  %v673_v44 = vadd.s32 1, %v2131_v53  ;;  %v847_v55 = vmul.f32 0.5, %v1791_v36 }
 0x16f   : > { %v1056_v52 = vsub.f32 0.0, %v1008_v14  ;;  %v1058_v61 = vsub.f32 0.0, %v1010_v3  ;;  %v801_v62 = vadd.f32 -0.16666655, %v785_v49  ;;  %v849_v22 = vmul.f32 0.5, %v1856_v24 }
 0x170   : > { %v911_v13 = vadd.f32 -0.0013887316, %v895_v56  ;;  %v913_v0 = vadd.f32 -0.0013887316, %v897_v8  ;;  %v815_v32 = vmul.f32 %v799_v47, %v1848_v23  ;;  %v2164_v37 = vadd.f32 %v830_v11, %v2033_v21 }
 0x171   : > { %v1072_v4 = vsel %vm2110_vm3, %v1056_v52, %v1008_v14  ;;  %v1074_v48 = vsel %vm2127_vm4, %v1058_v61, %v1010_v3  ;;  %v817_v6 = vmul.f32 %v801_v62, %v1879_v26  ;;  %v609_v56 = vand.u32 1, %v2131_v53 }
 0x172   : > { %v1415_v7 = vpack.c.bf16 %v1074_v48, %v1072_v4  ;;  %v927_v49 = vmul.f32 %v911_v13, %v1791_v36  ;;  %v929_v30 = vmul.f32 %v913_v0, %v1856_v24  ;;  %vm2169_vm5 = vcmp.eq.s32.totalorder %v607_v1, 1 }
 0x173   : > { %v687_v25 = vand.u32 2, %v671_v10  ;;  %v689_v14 = vand.u32 2, %v673_v44  ;;  %v879_v23 = vmul.f32 %v1791_v36, %v1791_v36  ;;  %v881_v26 = vmul.f32 %v1856_v24, %v1856_v24 }
 0x174   : > { %1416 = vmatprep.subr.bf16.mxu1 %v1415_v7  ;;  %v943_v21 = vadd.f32 0.041666646, %v927_v49  ;;  %v945_v11 = vadd.f32 0.041666646, %v929_v30  ;;  %v831_v47 = vadd.f32 %v815_v32, %v1767_v18  ;;  %v833_v3 = vadd.f32 %v817_v6, %v1818_v59 }
 0x175   : > { %v863_v8 = vsub.f32 1.0, %v847_v55  ;;  %v865_v1 = vsub.f32 1.0, %v849_v22  ;;  %v676_v10 = vadd.s32 1, %v1889_v58  ;;  %v900_v44 = vmul.f32 2.4433157e-05, %v1815_v57 }
 0x176   : > { %v959_v52 = vmul.f32 %v943_v21, %v879_v23  ;;  %v961_v61 = vmul.f32 %v945_v11, %v881_v26  ;;  %v612_v62 = vand.u32 1, %v1889_v58  ;;  %v614_v36 = vand.u32 1, %v1898_v12  ;;  %v2750_v23 = vld [vmem:[#allocation21_spill] sm:$0xff] }
 0x177   : > { %v678_v24 = vadd.s32 1, %v1898_v12  ;;  %v902_v30 = vmul.f32 2.4433157e-05, %v1868_v35  ;;  %v852_v59 = vmul.f32 0.5, %v1815_v57  ;;  %v916_v55 = vadd.f32 -0.0013887316, %v900_v44 }
 0x178   : > { %v975_v13 = vadd.f32 %v959_v52, %v863_v8  ;;  %v977_v18 = vadd.f32 %v961_v61, %v865_v1  ;;  %vm2186_vm6 = vcmp.eq.s32.totalorder %v609_v56, 1  ;;  %vm2190_vm7 = vcmp.eq.s32.totalorder %v687_v25, 2 }
 0x179   : > { %v854_v4 = vmul.f32 0.5, %v1868_v35  ;;  %v918_v48 = vadd.f32 -0.0013887316, %v902_v30  ;;  %vm705_vm8 = vcmp.eq.s32.totalorder %v689_v14, 2  ;;  %v692_v7 = vand.u32 2, %v676_v10 }
 0x17a   : > { %v1007_v32 = vsel %vm2169_vm5, %v831_v47, %v975_v13  ;;  %v1009_v6 = vsel %vm2186_vm6, %v833_v3, %v977_v18  ;;  %vm2199_vm9 = vcmp.eq.s32.totalorder %v612_v62, 1  ;;  %vm2203_vm10 = vcmp.eq.s32.totalorder %v614_v36, 1 }
 0x17b   : > { %v1055_v49 = vsub.f32 0.0, %v1007_v32  ;;  %v1057_v56 = vsub.f32 0.0, %v1009_v6  ;;  %v884_v14 = vmul.f32 %v1815_v57, %v1815_v57  ;;  %v694_v26 = vand.u32 2, %v678_v24 }
 0x17c   : > { %v868_v21 = vsub.f32 1.0, %v852_v59  ;;  %v932_v11 = vmul.f32 %v916_v55, %v1815_v57  ;;  %v934_v8 = vmul.f32 %v918_v48, %v1868_v35  ;;  %v870_v61 = vsub.f32 1.0, %v854_v4 }
 0x17d   : > { %v1071_v1 = vsel %vm2190_vm7, %v1055_v49, %v1007_v32  ;;  %v1073_v52 = vsel %vm705_vm8, %v1057_v56, %v1009_v6  ;;  %v886_v10 = vmul.f32 %v1868_v35, %v1868_v35  ;;  %vm2215_vm11 = vcmp.eq.s32.totalorder %v692_v7, 2 }
 0x17e   : > { %v1417_v44 = vpack.c.bf16 %v1073_v52, %v1071_v1  ;;  %v948_v36 = vadd.f32 0.041666646, %v932_v11  ;;  %v950_v24 = vadd.f32 0.041666646, %v934_v8  ;;  %v2221_v57 = vsel %vm2169_vm5, %v975_v13, %v831_v47  ;;  %v2690_v13 = vld [vmem:[#allocation4_spill] sm:$0xff]  ;;  %v2694_v8 = vld [vmem:[#allocation9_spill] sm:$0xff] }
 0x17f   : > { %v611_v30 = vand.u32 1, %v1873_v41  ;;  %v675_v59 = vadd.s32 1, %v1873_v41  ;;  %v677_v55 = vadd.s32 1, %v1891_v60  ;;  %v2228_v35 = vsel %vm2186_vm6, %v977_v18, %v833_v3 }
 0x180   : > { %1418 = vmatpush1.bf16.msra.mxu1 %v1417_v44  ;;  %v964_v0 = vmul.f32 %v948_v36, %v884_v14  ;;  %v966_v4 = vmul.f32 %v950_v24, %v886_v10  ;;  %v899_v48 = vmul.f32 2.4433157e-05, %v1798_v43  ;;  %vm2231_vm12 = vcmp.eq.s32.totalorder %v694_v26, 2 }
 0x181   : > { %v613_v50 = vand.u32 1, %v1891_v60  ;;  %v851_v47 = vmul.f32 0.5, %v1798_v43  ;;  %v901_v6 = vmul.f32 2.4433157e-05, %v2690_v13  ;;  %v853_v3 = vmul.f32 0.5, %v2690_v13 }
 0x182   : > { %v2238_v7 = vadd.f32 %v964_v0, %v868_v21  ;;  %v2240_v22 = vadd.f32 %v966_v4, %v870_v61  ;;  %v915_v18 = vadd.f32 -0.0013887316, %v899_v48  ;;  %vm2245_vm13 = vcmp.eq.s32.totalorder %v611_v30, 1 }
 0x183   : > { %v2691_v14 = vmov 0  ;;  %v691_v26 = vand.u32 2, %v675_v59  ;;  %v917_v11 = vadd.f32 -0.0013887316, %v901_v6  ;;  %v693_v52 = vand.u32 2, %v677_v55 }
 0x184   : > { %v2692_v14 = vsel %vm2245_vm13, 4294967295, %v2691_v14  ;;  %v1012_v21 = vsel %vm2199_vm9, %v2694_v8, %v2238_v7  ;;  %v1014_v1 = vsel %vm2203_vm10, %v1986_v15, %v2240_v22  ;;  %v931_v61 = vmul.f32 %v915_v18, %v1798_v43 }
 0x185   : > { %2693 = vst [vmem:[#allocation4_spill] sm:$0xff] %v2692_v14  ;;  %v1060_v10 = vsub.f32 0.0, %v1012_v21  ;;  %v1062_v44 = vsub.f32 0.0, %v1014_v1  ;;  %v867_v36 = vsub.f32 1.0, %v851_v47  ;;  %v933_v24 = vmul.f32 %v917_v11, %v2690_v13 }
 0x186   : > { %v869_v30 = vsub.f32 1.0, %v853_v3  ;;  %v883_v59 = vmul.f32 %v1798_v43, %v1798_v43  ;;  %v885_v0 = vmul.f32 %v2690_v13, %v2690_v13  ;;  %v947_v4 = vadd.f32 0.041666646, %v931_v61 }
 0x187   : > { %v1076_v48 = vsel %vm2215_vm11, %v1060_v10, %v1012_v21  ;;  %v1078_v55 = vsel %vm2231_vm12, %v1062_v44, %v1014_v1  ;;  %v949_v6 = vadd.f32 0.041666646, %v933_v24  ;;  %v680_v18 = vadd.s32 1, %v1974_v16 }
 0x188   : > { %v1419_v47 = vpack.c.bf16 %v1078_v55, %v1076_v48  ;;  %v963_v56 = vmul.f32 %v947_v4, %v883_v59  ;;  %v616_v3 = vand.u32 1, %v1974_v16  ;;  %v682_v11 = vadd.s32 1, %v2012_v19  ;;  %v2707_v4 = vld [vmem:[#allocation10_spill] sm:$0xff]  ;;  %v2712_v16 = vld [vmem:[#allocation12_spill] sm:$0xff] }
 0x189   : > { %v965_v43 = vmul.f32 %v949_v6, %v885_v0  ;;  %v618_v49 = vand.u32 1, %v2012_v19  ;;  %v856_v13 = vmul.f32 0.5, %v1935_v9  ;;  %v904_v62 = vmul.f32 2.4433157e-05, %v1935_v9 }
 0x18a   : > { %1420 = vmatprep.subr.bf16.mxu1 %v1419_v47  ;;  %vm2273_vm14 = vcmp.eq.s32.totalorder %v613_v50, 1  ;;  %v2695_v32 = vmov 0  ;;  %vm2277_vm15 = vcmp.eq.s32.totalorder %v691_v26, 2  ;;  %v2281_v1 = vadd.f32 %v963_v56, %v867_v36  ;;  %v2704_v50 = vld [vmem:[#allocation8_spill] sm:$0xff] }
 0x18b   : > { %v2696_v32 = vsel %vm2273_vm14, 4294967295, %v2695_v32  ;;  %v906_v61 = vmul.f32 2.4433157e-05, %v1966_v39  ;;  %vm2284_vm0 = vcmp.eq.s32.totalorder %v693_v52, 2  ;;  %v2288_v44 = vadd.f32 %v965_v43, %v869_v30 }
 0x18c   : > { %2697 = vst [vmem:[#allocation9_spill] sm:$0xff] %v2696_v32  ;;  %2700 = vst [vmem:[#allocation24_spill] sm:$0xff] %v2281_v1  ;;  %v696_v24 = vand.u32 2, %v680_v18  ;;  %v920_v59 = vadd.f32 -0.0013887316, %v904_v62  ;;  %v1011_v26 = vsel %vm2245_vm13, %v2704_v50, %v2281_v1  ;;  %vm2294_vm3 = vcmp.eq.s32.totalorder %v616_v3, 1 }
 0x18d   : > { %2703 = vst [vmem:[#allocation25_spill] sm:$0xff] %v2288_v44  ;;  %v698_v56 = vand.u32 2, %v682_v11  ;;  %v858_v36 = vmul.f32 0.5, %v1966_v39  ;;  %v922_v52 = vadd.f32 -0.0013887316, %v906_v61  ;;  %v1013_v30 = vsel %vm2273_vm14, %v2707_v4, %v2288_v44  ;;  %v2711_v61 = vld [vmem:[#allocation7_spill] sm:$0xff] }
 0x18e   : > { %v1059_v48 = vsub.f32 0.0, %v1011_v26  ;;  %vm2303_vm4 = vcmp.eq.s32.totalorder %v618_v49, 1  ;;  %v2708_v55 = vmov 0  ;;  %v872_v6 = vsub.f32 1.0, %v856_v13  ;;  %v2713_v1 = vld [vmem:[#allocation6_spill] sm:$0xff] }
 0x18f   : > { %v2709_v55 = vsel %vm2303_vm4, 4294967295, %v2708_v55  ;;  %v936_v18 = vmul.f32 %v920_v59, %v1935_v9  ;;  %v1061_v47 = vsub.f32 0.0, %v1013_v30  ;;  %v888_v3 = vmul.f32 %v1935_v9, %v1935_v9 }
 0x190   : > { %2710 = vst [vmem:[#allocation26_spill] sm:$0xff] %v2709_v55  ;;  %v890_v11 = vmul.f32 %v1966_v39, %v1966_v39  ;;  %v938_v43 = vmul.f32 %v922_v52, %v1966_v39  ;;  %v615_v19 = vand.u32 1, %v2711_v61  ;;  %v617_v49 = vand.u32 1, %v2712_v16 }
 0x191   : > { %v952_v62 = vadd.f32 0.041666646, %v936_v18  ;;  %v679_v32 = vadd.s32 1, %v2711_v61  ;;  %v1075_v13 = vsel %vm2277_vm15, %v1059_v48, %v1011_v26  ;;  %v1077_v59 = vsel %vm2284_vm0, %v1061_v47, %v1013_v30 }
 0x192   : > { %v954_v44 = vadd.f32 0.041666646, %v938_v43  ;;  %v681_v9 = vadd.s32 1, %v2712_v16  ;;  %v1421_v4 = vpack.c.bf16 %v1077_v59, %v1075_v13  ;;  %v855_v39 = vmul.f32 0.5, %v2713_v1 }
 0x193   : > { %v968_v14 = vmul.f32 %v952_v62, %v888_v3  ;;  %v857_v52 = vmul.f32 0.5, %v1947_v34  ;;  %v874_v18 = vsub.f32 1.0, %v858_v36  ;;  %v903_v60 = vmul.f32 2.4433157e-05, %v2713_v1 }
 0x194   : > { %v970_v50 = vmul.f32 %v954_v44, %v890_v11  ;;  %v905_v61 = vmul.f32 2.4433157e-05, %v1947_v34  ;;  %1422 = vmatpush1.bf16.msra.mxu1 %v1421_v4  ;;  %vm2325_vm5 = vcmp.eq.s32.totalorder %v696_v24, 2  ;;  %vm2329_vm6 = vcmp.eq.s32.totalorder %v698_v56, 2 }
 0x195   : > { %v2333_v26 = vadd.f32 %v968_v14, %v872_v6  ;;  %v695_v30 = vand.u32 2, %v679_v32  ;;  %v697_v36 = vand.u32 2, %v681_v9  ;;  %v919_v44 = vadd.f32 -0.0013887316, %v903_v60 }
 0x196   : > { %v2335_v48 = vadd.f32 %v970_v50, %v874_v18  ;;  %v921_v47 = vadd.f32 -0.0013887316, %v905_v61  ;;  %vm2341_vm7 = vcmp.eq.s32.totalorder %v615_v19, 1  ;;  %vm2345_vm8 = vcmp.eq.s32.totalorder %v617_v49, 1 }
 0x197   : > { %v1016_v24 = vsel %vm2294_vm3, %v2050_v40, %v2333_v26  ;;  %v2720_v56 = vmov 0  ;;  %v871_v14 = vsub.f32 1.0, %v855_v39  ;;  %v873_v32 = vsub.f32 1.0, %v857_v52 }
 0x198   : > { %v2721_v56 = vsel %vm2345_vm8, 4294967295, %v2720_v56  ;;  %v1018_v60 = vsel %vm2303_vm4, %v2065_v38, %v2335_v48  ;;  %v1064_v50 = vsub.f32 0.0, %v1016_v24  ;;  %v935_v6 = vmul.f32 %v919_v44, %v2713_v1 }
 0x199   : > { %2722 = vst [vmem:[#allocation6_spill] sm:$0xff] %v2721_v56  ;;  %v937_v3 = vmul.f32 %v921_v47, %v1947_v34  ;;  %v1066_v19 = vsub.f32 0.0, %v1018_v60  ;;  %v887_v11 = vmul.f32 %v2713_v1, %v2713_v1  ;;  %v684_v43 = vadd.s32 1, %v2052_v20 }
 0x19a   : > { %v686_v62 = vadd.s32 1, %v2073_v17  ;;  %vm2359_vm11 = vcmp.eq.s32.totalorder %v695_v30, 2  ;;  %vm2363_vm12 = vcmp.eq.s32.totalorder %v697_v36, 2  ;;  %v889_v13 = vmul.f32 %v1947_v34, %v1947_v34 }
 0x19b   : > { %v951_v59 = vadd.f32 0.041666646, %v935_v6  ;;  %v953_v9 = vadd.f32 0.041666646, %v937_v3  ;;  %v860_v39 = vmul.f32 0.5, %v2007_v54  ;;  %v1080_v1 = vsel %vm2325_vm5, %v1064_v50, %v1016_v24 }
 0x19c   : > { %v1082_v52 = vsel %vm2329_vm6, %v1066_v19, %v1018_v60  ;;  %v620_v18 = vand.u32 1, %v2052_v20  ;;  %v862_v30 = vmul.f32 0.5, %v2046_v27  ;;  %v622_v16 = vand.u32 1, %v2073_v17 }
 0x19d   : > { %v1423_v36 = vpack.c.bf16 %v1082_v52, %v1080_v1  ;;  %v967_v44 = vmul.f32 %v951_v59, %v887_v11  ;;  %v969_v47 = vmul.f32 %v953_v9, %v889_v13  ;;  %v700_v34 = vand.u32 2, %v684_v43  ;;  %v2731_v59 = vld [vmem:[#allocation16_spill] sm:$0xff] }
 0x19e   : > { %v702_v6 = vand.u32 2, %v686_v62  ;;  %v908_v3 = vmul.f32 2.4433157e-05, %v2007_v54  ;;  %v910_v55 = vmul.f32 2.4433157e-05, %v2046_v27  ;;  %v876_v24 = vsub.f32 1.0, %v860_v39 }
 0x19f   : > { %1424 = vmatprep.subr.bf16.mxu1 %v1423_v36  ;;  %v2379_v21 = vadd.f32 %v967_v44, %v871_v14  ;;  %v2381_v10 = vadd.f32 %v969_v47, %v873_v32  ;;  %v892_v60 = vmul.f32 %v2007_v54, %v2007_v54  ;;  %v878_v50 = vsub.f32 1.0, %v862_v30  ;;  %v2732_v44 = vld [vmem:[#allocation13_spill] sm:$0xff]  ;;  %v2775_v32 = vld [vmem:[#allocation19_spill] sm:$0xff] }
 0x1a0   : > { %v894_v19 = vmul.f32 %v2046_v27, %v2046_v27  ;;  %v924_v11 = vadd.f32 -0.0013887316, %v908_v3  ;;  %v926_v43 = vadd.f32 -0.0013887316, %v910_v55  ;;  %vm2395_vm15 = vcmp.eq.s32.totalorder %v620_v18, 1 }
 0x1a1   : > { %v1015_v62 = vsel %vm2341_vm7, %v2019_v2, %v2379_v21  ;;  %v1017_v14 = vsel %vm2345_vm8, %v2062_v45, %v2381_v10  ;;  %vm2399_vm0 = vcmp.eq.s32.totalorder %v622_v16, 1  ;;  %v2729_v13 = vmov 0 }
 0x1a2   : > { %v2730_v13 = vsel %vm2399_vm0, 4294967295, %v2729_v13  ;;  %v683_v55 = vadd.s32 1, %v2731_v59  ;;  %v685_v9 = vadd.s32 1, %v2069_v31  ;;  %v1063_v39 = vsub.f32 0.0, %v1015_v62 }
 0x1a3   : > { %v1065_v1 = vsub.f32 0.0, %v1017_v14  ;;  %v940_v52 = vmul.f32 %v924_v11, %v2007_v54  ;;  %v942_v30 = vmul.f32 %v926_v43, %v2046_v27  ;;  %v619_v36 = vand.u32 1, %v2731_v59 }
 0x1a4   : > { %v621_v18 = vand.u32 1, %v2069_v31  ;;  %v2410_v47 = vmul.f32 0.5, %v2732_v44  ;;  %v2413_v16 = vmul.f32 0.5, %v2024_v29  ;;  %v1079_v3 = vsel %vm2359_vm11, %v1063_v39, %v1015_v62  ;;  %v2737_v39 = vld [vmem:[#allocation15_spill] sm:$0xff] }
 0x1a5   : > { %v1081_v17 = vsel %vm2363_vm12, %v1065_v1, %v1017_v14  ;;  %vm2419_vm5 = vcmp.eq.s32.totalorder %v700_v34, 2  ;;  %vm2423_vm6 = vcmp.eq.s32.totalorder %v702_v6, 2  ;;  %v956_v11 = vadd.f32 0.041666646, %v940_v52  ;;  %v2738_v52 = vld [vmem:[#allocation18_spill] sm:$0xff] }
 0x1a6   : > { %v958_v43 = vadd.f32 0.041666646, %v942_v30  ;;  %v1425_v31 = vpack.c.bf16 %v1081_v17, %v1079_v3  ;;  %v699_v59 = vand.u32 2, %v683_v55  ;;  %v701_v20 = vand.u32 2, %v685_v9 }
 0x1a7   : > { %v875_v56 = vsub.f32 1.0, %v2410_v47  ;;  %v972_v61 = vmul.f32 %v956_v11, %v892_v60  ;;  %v877_v49 = vsub.f32 1.0, %v2413_v16  ;;  %v891_v34 = vmul.f32 %v2732_v44, %v2732_v44  ;;  %v2739_v47 = vld [vmem:[#allocation22_spill] sm:$0xff] }
 0x1a8   : > { %v974_v62 = vmul.f32 %v958_v43, %v894_v19  ;;  %1426 = vmatpush1.bf16.msra.mxu1 %v1425_v31  ;;  %v907_v6 = vmul.f32 2.4433157e-05, %v2732_v44  ;;  %v909_v14 = vmul.f32 2.4433157e-05, %v2024_v29  ;;  %v640_v1 = vand.u32 2, %v2737_v39 }
 0x1a9   : > { %v642_v17 = vand.u32 2, %v2738_v52  ;;  %v2435_v55 = vadd.f32 %v972_v61, %v876_v24  ;;  %v992_v60 = vsel %vm2093_vm1, %v2137_v28, %v2122_v51  ;;  %v994_v31 = vsel %vm2097_vm2, %v2139_v5, %v2125_v42 }
 0x1aa   : > { %v2437_v9 = vadd.f32 %v974_v62, %v878_v50  ;;  %v923_v19 = vadd.f32 -0.0013887316, %v907_v6  ;;  %v925_v30 = vadd.f32 -0.0013887316, %v909_v14  ;;  %vm656_vm11 = vcmp.eq.s32.totalorder %v640_v1, 2 }
 0x1ab   : > { %vm658_vm12 = vcmp.eq.s32.totalorder %v642_v17, 2  ;;  %v1020_v24 = vsel %vm2395_vm15, %v2739_v47, %v2435_v55  ;;  %vm2455_vm1 = vcmp.eq.s32.totalorder %v619_v36, 1  ;;  %vm2459_vm8 = vcmp.eq.s32.totalorder %v621_v18, 1 }
 0x1ac   : > { %v1022_v33 = vsel %vm2399_vm0, %v2164_v37, %v2437_v9  ;;  %v1024_v42 = vsub.f32 0.0, %v992_v60  ;;  %v1026_v28 = vsub.f32 0.0, %v994_v31  ;;  %v1068_v5 = vsub.f32 0.0, %v1020_v24 }
 0x1ad   : > { %v1070_v50 = vsub.f32 0.0, %v1022_v33  ;;  %v939_v16 = vmul.f32 %v923_v19, %v2732_v44  ;;  %v941_v3 = vmul.f32 %v925_v30, %v2024_v29  ;;  %v893_v11 = vmul.f32 %v2024_v29, %v2024_v29  ;;  %v1237_v44 = vld [vmem:[#allocation2] sm:$0xff] }
 0x1ae   : > { %v1040_v43 = vsel %vm656_vm11, %v1024_v42, %v992_v60  ;;  %v1042_v36 = vsel %vm658_vm12, %v1026_v28, %v994_v31  ;;  %v639_v61 = vand.u32 2, %v2118_v63  ;;  %v1084_v18 = vsel %vm2419_vm5, %v1068_v5, %v1020_v24  ;;  %v2755_v5 = vld [vmem:[#allocation8_spill] sm:$0xff] }
 0x1af   : > { %v1086_v62 = vsel %vm2423_vm6, %v1070_v50, %v1022_v33  ;;  %vm2472_vm2 = vcmp.eq.s32.totalorder %v699_v59, 2  ;;  %vm2476_vm0 = vcmp.eq.s32.totalorder %v701_v20, 2  ;;  %v955_v14 = vadd.f32 0.041666646, %v939_v16  ;;  %v2756_v50 = vld [vmem:[#allocation24_spill] sm:$0xff] }
 0x1b0   : > { %v957_v29 = vadd.f32 0.041666646, %v941_v3  ;;  %v1427_v39 = vpack.c.bf16 %v1086_v62, %v1084_v18  ;;  %v1431_v1 = vpack.c.bf16 %v1042_v36, %v1040_v43  ;;  %v641_v63 = vand.u32 2, %v2131_v53  ;;  %v2758_v43 = vld [vmem:[#allocation10_spill] sm:$0xff]  ;;  %v2759_v36 = vld [vmem:[#allocation25_spill] sm:$0xff] }
 0x1b1   : > { %vm655_vm11 = vcmp.eq.s32.totalorder %v639_v61, 2  ;;  %v971_v54 = vmul.f32 %v955_v14, %v891_v34  ;;  %v2748_v27 = vsub.f32 0.0, %v2221_v57  ;;  %v644_v17 = vand.u32 2, %v1889_v58  ;;  %v1402_v61 = vld [vmem:[%s1692_s15 + $0x1] ss:$2 sm:$0x3] }
 0x1b2   : > { %v973_v52 = vmul.f32 %v957_v29, %v893_v11  ;;  %1428 = vmatprep.subr.bf16.mxu1 %v1427_v39  ;;  %vm657_vm5 = vcmp.eq.s32.totalorder %v641_v63, 2  ;;  %v646_v20 = vand.u32 2, %v1898_v12  ;;  %v996_v60 = vsel %vm2199_vm9, %v2238_v7, %v2694_v8  ;;  %v2752_v8 = vld [vmem:[#allocation5_spill] sm:$0xff]  ;;  %v2761_v39 = vld [vmem:[#allocation11_spill] sm:$0xff] }
 0x1b3   : > { %v1039_v59 = vsel %vm655_vm11, %v2748_v27, %v2221_v57  ;;  %v998_v53 = vsel %vm2203_vm10, %v2240_v22, %v1986_v15  ;;  %v2494_v34 = vadd.f32 %v971_v54, %v875_v56  ;;  %v2749_v58 = vsub.f32 0.0, %v2228_v35  ;;  %v2751_v15 = vld [vmem:[#allocation23_spill] sm:$0xff]  ;;  %v2762_v54 = vld [vmem:[#allocation14_spill] sm:$0xff] }
 0x1b4   : > { %v2496_v31 = vadd.f32 %v973_v52, %v877_v49  ;;  %vm660_vm6 = vcmp.eq.s32.totalorder %v644_v17, 2  ;;  %vm662_vm12 = vcmp.eq.s32.totalorder %v646_v20, 2  ;;  %v1028_v19 = vsub.f32 0.0, %v996_v60  ;;  %v1087_v20 = vld [vmem:[%s2609_s3] sm:$0xff] }
 0x1b5   : > { %v1041_v57 = vsel %vm657_vm5, %v2749_v58, %v2228_v35  ;;  %v1030_v30 = vsub.f32 0.0, %v998_v53  ;;  %v1019_v7 = vsel %vm2455_vm1, %v2750_v23, %v2494_v34  ;;  %v643_v22 = vand.u32 2, %v1873_v41 }
 0x1b6   : > { %v1433_v12 = vpack.c.bf16 %v1041_v57, %v1039_v59  ;;  %v1021_v25 = vsel %vm2459_vm8, %v2751_v15, %v2496_v31  ;;  %v645_v56 = vand.u32 2, %v2752_v8  ;;  %v1067_v35 = vsub.f32 0.0, %v1019_v7  ;;  %v2764_v59 = vld [vmem:[#allocation7_spill] sm:$0xff] }
 0x1b7   : > { %v1069_v49 = vsub.f32 0.0, %v1021_v25  ;;  %v1044_v24 = vsel %vm660_vm6, %v1028_v19, %v996_v60  ;;  %v1046_v33 = vsel %vm662_vm12, %v1030_v30, %v998_v53  ;;  %vm1088_vm9 = vcmask 523264   ;;  %v2768_v19 = vld [vmem:[#allocation6_spill] sm:$0xff] }
 0x1b8   : > { %v1435_v42 = vpack.c.bf16 %v1046_v33, %v1044_v24  ;;  %vm2511_vm10 = vcmp.eq.s32.totalorder %v643_v22, 2  ;;  %v995_v3 = vsel %vm2245_vm13, %v2756_v50, %v2755_v5  ;;  %v1083_v41 = vsel %vm2472_vm2, %v1067_v35, %v1019_v7  ;;  %v2774_v5 = vld [vmem:[#allocation16_spill] sm:$0xff] }
 0x1b9   : > { %v1085_v11 = vsel %vm2476_vm0, %v1069_v49, %v1021_v25  ;;  %v997_v18 = vsel %vm2273_vm14, %v2759_v36, %v2758_v43  ;;  %v1027_v62 = vsub.f32 0.0, %v995_v3  ;;  %v648_v63 = vand.u32 2, %v2761_v39  ;;  %v2771_v49 = vld [vmem:[#allocation20_spill] sm:$0xff] }
 0x1ba   : > { %v1429_v14 = vpack.c.bf16 %v1085_v11, %v1083_v41  ;;  %v1029_v29 = vsub.f32 0.0, %v997_v18  ;;  %v650_v52 = vand.u32 2, %v2762_v54  ;;  %vm661_vm11 = vcmp.eq.s32.totalorder %v645_v56, 2 }
 0x1bb   : > { %v1000_v6 = vsel %vm2294_vm3, %v2333_v26, %v2050_v40  ;;  %v1002_v27 = vsel %vm2303_vm4, %v2335_v48, %v2065_v38  ;;  %v647_v17 = vand.u32 2, %v2764_v59  ;;  %v1043_v60 = vsel %vm2511_vm10, %v1027_v62, %v995_v3  ;;  %v2765_v26 = vld [vmem:[#allocation12_spill] sm:$0xff] }
 0x1bc   : > { %1430 = vmatpush1.bf16.msra.mxu1 %v1429_v14  ;;  %v1045_v53 = vsel %vm661_vm11, %v1029_v29, %v997_v18  ;;  %vm664_vm13 = vcmp.eq.s32.totalorder %v648_v63, 2  ;;  %v1032_v58 = vsub.f32 0.0, %v1000_v6  ;;  %vm666_vm14 = vcmp.eq.s32.totalorder %v650_v52, 2 }
 0x1bd   : > { %1432 = vmatprep.subr.bf16.mxu1 %v1431_v1  ;;  %v1437_v40 = vpack.c.bf16 %v1045_v53, %v1043_v60  ;;  %v1034_v0 = vsub.f32 0.0, %v1002_v27  ;;  %v649_v57 = vand.u32 2, %v2765_v26  ;;  %vm2544_vm3 = vcmp.eq.s32.totalorder %v647_v17, 2  ;;  %v2770_v1 = vld [vmem:[#allocation17_spill] sm:$0xff]  ;;  %v1238_v17 = vld [vmem:[#allocation2 + $0x8] sm:$0xff] }
 0x1be   : > { %v999_v48 = vsel %vm2341_vm7, %v2379_v21, %v2019_v2  ;;  %vm2769_vm4 = vnez %v2768_v19  ;;  %v652_v7 = vand.u32 2, %v2770_v1  ;;  %v1048_v25 = vsel %vm664_vm13, %v1032_v58, %v1000_v6 }
 0x1bf   : > { %v1001_v30 = vsel %vm2769_vm4, %v2381_v10, %v2062_v45  ;;  %1400 = vmatmul.mubr.msk.f32.vlgmr.msra.gmra.mrb[0].mxu1 %vm1088_vm9, %v1087_v20  ;;  %v1050_v22 = vsel %vm666_vm14, %v1034_v0, %v1002_v27  ;;  %v1031_v8 = vsub.f32 0.0, %v999_v48  ;;  %vm665_vm0 = vcmp.eq.s32.totalorder %v649_v57, 2 }
 0x1c0   : > { %v1033_v56 = vsub.f32 0.0, %v1001_v30  ;;  %1434 = vmatpush1.bf16.msra.mxu1 %v1433_v12  ;;  %v1439_v35 = vpack.c.bf16 %v1050_v22, %v1048_v25  ;;  %v654_v24 = vand.u32 2, %v2771_v49  ;;  %v1004_v2 = vsel %vm2395_vm15, %v2435_v55, %v2739_v47 }
 0x1c1   : > { %v2772_v4 = vmov 0.0   ;;  %1436 = vmatprep.subr.bf16.mxu1 %v1435_v42  ;;  %v1047_v45 = vsel %vm2544_vm3, %v1031_v8, %v999_v48  ;;  %vm2773_vm7 = vnez %v2730_v13  ;;  %v1036_v12 = vsub.f32 0.0, %v1004_v2 }
 0x1c2   : > { %1227 = vmatprep.mubr.f32.mxu1 %v2772_v4  ;;  %v1049_v21 = vsel %vm665_vm0, %v1033_v56, %v1001_v30  ;;  %v1006_v10 = vsel %vm2773_vm7, %v2437_v9, %v2164_v37  ;;  %vm668_vm2 = vcmp.eq.s32.totalorder %v652_v7, 2  ;;  %v651_v50 = vand.u32 2, %v2774_v5 }
 0x1c3   : > { %v1441_v33 = vpack.c.bf16 %v1049_v21, %v1047_v45  ;;  %v1038_v28 = vsub.f32 0.0, %v1006_v10  ;;  %vm670_vm5 = vcmp.eq.s32.totalorder %v654_v24, 2  ;;  %v653_v55 = vand.u32 2, %v2775_v32 }
 0x1c4   : > { %v1003_v47 = vsel %vm2455_vm1, %v2494_v34, %v2750_v23  ;;  %v1005_v13 = vsel %vm2459_vm8, %v2496_v31, %v2751_v15  ;;  %1438 = vmatpush1.bf16.msra.mxu1 %v1437_v40  ;;  %v1052_v37 = vsel %vm668_vm2, %v1036_v12, %v1004_v2  ;;  %vm667_vm15 = vcmp.eq.s32.totalorder %v651_v50, 2  ;;  %v1234_v15 = vld [vmem:[%s1692_s15] ss:$2 sm:$0x3] }
 0x1c5   : > { %v1054_v9 = vsel %vm670_vm5, %v1038_v28, %v1006_v10  ;;  %v1035_v42 = vsub.f32 0.0, %v1003_v47  ;;  %v1037_v16 = vsub.f32 0.0, %v1005_v13  ;;  %1440 = vmatprep.subr.bf16.mxu1 %v1439_v35  ;;  %vm669_vm6 = vcmp.eq.s32.totalorder %v653_v55, 2 }
 0x1c6   : > { %v1443_v3 = vpack.c.bf16 %v1054_v9, %v1052_v37  ;;  %v1240_v34 = vlaneseq  ;;  %vm1281_vm8 = vcmask (!%p1403_p0), 7168  }
 0x1c7   : > { %v1051_v41 = vsel %vm667_vm15, %v1035_v42, %v1003_v47  ;;  %v1053_v11 = vsel %vm669_vm6, %v1037_v16, %v1005_v13 }
 0x1c8   : > { %v1445_v51 = vpack.c.bf16 %v1053_v11, %v1051_v41  ;;  %1442 = vmatpush1.bf16.msra.mxu1 %v1441_v33  ;;  %v1241_v23 = vshrl.u32 %v1240_v34, 7 }
 0x1c9   : > { %1444 = vmatprep.subr.bf16.mxu1 %v1443_v3 }
 0x1ca   : > { %v1242_v43 = vsub.s32 0, %v1241_v23  ;;  %v1246_v36 = vsub.s32 1, %v1241_v23 }
 0x1cc   : > { %1446 = vmatpush1.bf16.msra.mxu1 %v1445_v51  ;;  %v1243_v18 = vrot.slane %v1234_v15, %v1242_v43  ;;  %v1256_v62 = vrot.slane %v1402_v61, %v1242_v43  ;;  %v1247_v14 = vrot.slane %v1234_v15, %v1246_v36  ;;  %v1260_v29 = vrot.slane %v1402_v61, %v1246_v36 }
 0x1cf   : > { %1401 = vmatmul.mubr.msk.f32.vlgmr.msra.gmra.mrb[2].mxu1 %vm1088_vm9, %v1087_v20 }
 0x292   : > { %v1158_v46 = vpop.f32.mrb[0].mxu1 }
 0x293   : > { %v1160_v31 = vpop.f32.mrb[1].mxu1  ;;  %v1250_v63 = vmul.f32 %v1243_v18, %v1158_v46 }
 0x294   : > { %v1251_v6 = vmul.f32 %v1247_v14, %v1160_v31 }
 0x2a2   : > { %v1229_v39 = vpop.f32.mrb[2].mxu1 }
 0x2a3   : > { %v1263_v54 = vmul.f32 %v1256_v62, %v1229_v39  ;;  %v1231_v52 = vpop.f32.mrb[3].mxu1 }
 0x2a4   : > { %v1264_v27 = vmul.f32 %v1260_v29, %v1231_v52  ;;  %1274 = sbr.rel (%p1403_p0) target bundleno = 837 (0x345), region = 67 }
 0x2a5   : > { %v1265_v59 = vadd.f32 %v1263_v54, %v1250_v63 }
 0x2a6   : > { %v1266_v20 = vadd.f32 %v1264_v27, %v1251_v6 }
 0x2a7   : > { %v1267_v60 = vadd.f32 %v1265_v59, %v1237_v44 }
 0x2a8   : > { %v1268_v53 = vadd.f32 %v1266_v20, %v1238_v17 }
 0x2a9   : > { %1269 = vst [vmem:[#allocation2] sm:$0xff] %v1267_v60 }
 0x2aa   : > { %1270 = vst [vmem:[#allocation2 + $0x8] sm:$0xff] %v1268_v53 }
 0x2b0   : > { %v1275_v58 = vld [vmem:[#allocation2] sm:$0xff] }
 0x2b1   : > { %v1276_v40 = vld [vmem:[#allocation2 + $0x8] sm:$0xff] }
 0x2b2   : > { %v1277_v0 = vadd.f32 %v1276_v40, %v1275_v58 }
 0x2b4   : > { %1278 = vadd.xlane.f32.xlu0 %v1277_v0 }
 0x341   : > { %v1279_v26 = vpop.xlane.xlu0 %1278 }
 0x342   : > { %v1280_v57 = vmul.f32 0.0078125, %v1279_v26 }
 0x344   : > { %1282 = vst.msk [vmem:[%s1697_s6] sm:$0xff] %vm1281_vm8, %v1280_v57 }
 0x345 PF: > { %s14_s21 = sadd.s32 1, %s1591_s21   ;;  %s2776_s15 = smov %s1571_s16 }
 0x346   : > { %p11_p1 = scmp.ge.s32.totalorder %s14_s21, 6   ;;  %s2777_s16 = smov %s1669_s26 }
 0x347   : > { %s2778_s17 = smov %s1583_s19  ;;  %s2779_s18 = smov %s1587_s20 }
 0x348   : > { %s2780_s19 = smov %s2783_s22  ;;  %s2781_s20 = smov %s2787_s23 }
 0x349   :  { %13 = sbr.rel (!%p11_p1) target bundleno = 4 (0x4), region = 109 }

</bundles_post_ra>
